<compile_context>
chip_gen: v5e
topology: v5e:2x2
jax: 0.10.0
libtpu: 0.0.40
codegen_flags: <defaults>
</compile_context>

<pallas_src>
import math

import jax
import jax.numpy as jnp
from jax.experimental import pallas as pl
from jax.experimental.pallas import tpu as pltpu

NEG_INF = -1e9


def _layernorm(v, gamma, beta, eps=1e-5):
    mu = jnp.mean(v, axis=-1, keepdims=True)
    var = jnp.mean((v - mu) ** 2, axis=-1, keepdims=True)
    return (v - mu) * jax.lax.rsqrt(var + eps) * gamma + beta


def make_decoder_kernel(Bb, T, Tm, D, n_self_heads, n_encdec_heads):
    """Fused decoder kernel: one batch-block (Bb elements) per grid step."""
    M = Bb * T

    def kernel(x_ref, selfpad_ref, mem_ref, crosspad_ref,
               ln_g_ref, ln_b_ref,
               swqkv_ref, sbqkv_ref, swo_ref, sbo_ref,
               cwqkv_ref, cbqkv_ref, cwo_ref, cbo_ref,
               fc_w1_ref, fc_b1_ref, fc_w2_ref, fc_b2_ref,
               out_ref):
        x = x_ref[...]                                   # (Bb*T, D)  f32
        mem_bf = mem_ref[...].astype(jnp.bfloat16)       # (Bb*Tm, D) bf16 (cast once)

        # Causal additive bias rebuilt in-kernel (no (B,T,T) HBM traffic).
        rows = jax.lax.broadcasted_iota(jnp.int32, (T, T), 0)
        cols = jax.lax.broadcasted_iota(jnp.int32, (T, T), 1)
        causal = jnp.where(cols > rows, NEG_INF, 0.0).astype(jnp.float32)
        self_bias = causal[None, :, :] + selfpad_ref[...]   # (Bb, T, T)
        cross_bias = crosspad_ref[...]                       # (Bb, 1, Tm)

        def ln(v, idx):
            return _layernorm(v, ln_g_ref[idx], ln_b_ref[idx])

        def make_mha(wqkv_ref, bqkv_ref, wo_ref, bo_ref, n_heads):
            dh = D // n_heads

            def mha(layer, q_in_bf, kv_bf, Tkv, bias):
                # Start the accumulator with the output-projection bias.
                out = jnp.zeros((M, D), jnp.float32) + bo_ref[layer]
                base = layer * 3 * n_heads
                # Static (unrolled) head loop; all weight reads index the
                # LEADING dim of the refs -> full-tile loads, no relayouts.
                for h in range(n_heads):
                    qi = base + h
                    ki = base + n_heads + h
                    vi = base + 2 * n_heads + h
                    q_h = (jnp.dot(q_in_bf, wqkv_ref[qi],
                                   preferred_element_type=jnp.float32)
                           + bqkv_ref[qi]).astype(jnp.bfloat16)      # (M, dh)
                    k_h = (jnp.dot(kv_bf, wqkv_ref[ki],
                                   preferred_element_type=jnp.float32)
                           + bqkv_ref[ki]).astype(jnp.bfloat16)      # (Bb*Tkv, dh)
                    v_h = (jnp.dot(kv_bf, wqkv_ref[vi],
                                   preferred_element_type=jnp.float32)
                           + bqkv_ref[vi]).astype(jnp.bfloat16)

                    s = jnp.einsum('bqd,bkd->bqk',
                                   q_h.reshape(Bb, T, dh),
                                   k_h.reshape(Bb, Tkv, dh),
                                   preferred_element_type=jnp.float32)
                    s = s + bias
                    s = s - jnp.max(s, axis=-1, keepdims=True)
                    e = jnp.exp(s)
                    # approx=True -> EUP slot; switch to exact division if a
                    # tight parity test vs. the PyTorch reference is required.
                    p = e * pl.reciprocal(jnp.sum(e, axis=-1, keepdims=True),
                                          approx=True)
                    ctx = jnp.einsum('bqk,bkd->bqd', p.astype(jnp.bfloat16),
                                     v_h.reshape(Bb, Tkv, dh),
                                     preferred_element_type=jnp.float32)
                    # Per-head output projection accumulated in f32 (replaces
                    # the old lane-offset scratch writes + single Wo matmul).
                    out = out + jnp.dot(ctx.reshape(M, dh).astype(jnp.bfloat16),
                                        wo_ref[layer * n_heads + h],
                                        preferred_element_type=jnp.float32)
                return out

            return mha

        self_mha = make_mha(swqkv_ref, sbqkv_ref, swo_ref, sbo_ref, n_self_heads)
        cross_mha = make_mha(cwqkv_ref, cbqkv_ref, cwo_ref, cbo_ref, n_encdec_heads)

        # ---- decoder forward (dropout == identity in eval mode) ----
        x0 = ln(x, 0)                                   # pre_self_norm
        x0_bf = x0.astype(jnp.bfloat16)
        sa = self_mha(0, x0_bf, x0_bf, T, self_bias)    # self_attn[0]
        x1 = ln(x0 + sa, 1)                             # self_attn_norms[0]

        a = cross_mha(0, x1.astype(jnp.bfloat16), mem_bf, Tm, cross_bias)  # attn[0]
        a = ln(a, 2)                                                       # attn_norms[0]
        a = cross_mha(1, a.astype(jnp.bfloat16), mem_bf, Tm, cross_bias)   # attn[1]
        a = ln(a, 3)                                                       # attn_norms[1]
        a = cross_mha(2, a.astype(jnp.bfloat16), mem_bf, Tm, cross_bias)   # attn[2]
        x2 = ln(x1 + a, 4)                                                 # attn_norms[2]

        # mlp_ffn (FCNet): Linear(D,H) -> ReLU -> Linear(H, D)
        hdn = jnp.maximum(
            jnp.dot(x2.astype(jnp.bfloat16), fc_w1_ref[...],
                    preferred_element_type=jnp.float32) + fc_b1_ref[...], 0.0)
        ff = jnp.dot(hdn.astype(jnp.bfloat16), fc_w2_ref[...],
                     preferred_element_type=jnp.float32) + fc_b2_ref[...]

        out_ref[...] = ln(ff + x2, 5)                   # mlp_ffn_norm, (Bb*T, D)

    return kernel


def _pick_batch_block(B, T, target_rows=256, min_grid=2):
    # Target ~256 MXU rows per step (v6e/v7x; 128 already saturates v5e) while
    # keeping at least `min_grid` grid steps so both v7x TensorCores get work
    # and input/output DMA can pipeline against compute.
    cap = B if B < min_grid else max(1, B // min_grid)
    bb = min(cap, max(1, target_rows // max(T, 1)))
    while B % bb:
        bb -= 1
    return bb


def _prep_attn(attn_w, attn_b, layer_ids, n_heads, D):
    """Per-head weight layout so the kernel indexes leading dims only."""
    dh = D // n_heads
    L = len(layer_ids)
    idx = jnp.asarray(layer_ids)
    w = attn_w[idx].astype(jnp.float32)            # (L, 4, D, D)
    b = attn_b[idx].astype(jnp.float32)            # (L, 4, D)
    scale = 1.0 / math.sqrt(dh)
    w = w.at[:, 0].multiply(scale)                 # fold 1/sqrt(dh) into Wq
    b = b.at[:, 0].multiply(scale)
    # q/k/v: (L,3,D,D) -> (L,3,H,D,dh) -> (L*3*H, D, dh)
    wqkv = (w[:, :3].reshape(L, 3, D, n_heads, dh)
            .transpose(0, 1, 3, 2, 4)
            .reshape(L * 3 * n_heads, D, dh).astype(jnp.bfloat16))
    bqkv = b[:, :3].reshape(L * 3 * n_heads, 1, dh)          # f32
    # output proj: (L,D,D) rows head-major -> (L*H, dh, D)
    wo = w[:, 3].reshape(L * n_heads, dh, D).astype(jnp.bfloat16)
    bo = b[:, 3]                                             # (L, D) f32
    return wqkv, bqkv, wo, bo


def _vmem_limit_bytes(stream_bytes, param_bytes, act_bytes):
    try:
        info = pltpu.get_tpu_info()
        cap = int(getattr(info, "vmem_capacity_bytes", 128 << 20))
    except Exception:
        cap = 128 << 20
    need = int((2 * stream_bytes + param_bytes + act_bytes) * 1.5) + (4 << 20)
    return max(16 << 20, min(need, int(cap * 3 // 4)))


def decoder_forward(inputs, input_mask, memories, memories_mask, params,
                    n_self_heads=4, n_encdec_heads=4, batch_block=None):
    B, T, D = inputs.shape
    Tm = memories.shape[1]
    Hf = params["fc_w1"].shape[1]

    Bb = batch_block or _pick_batch_block(B, T)
    assert B % Bb == 0
    G = B // Bb

    # Only key-padding additive biases are streamed (causal built in-kernel).
    self_pad = jnp.where(input_mask.astype(bool), NEG_INF, 0.0
                         ).astype(jnp.float32)[:, None, :]        # (B, 1, T)
    cross_pad = jnp.where(memories_mask.astype(bool), NEG_INF, 0.0
                          ).astype(jnp.float32)[:, None, :]       # (B, 1, Tm)

    swqkv, sbqkv, swo, sbo = _prep_attn(params["attn_w"], params["attn_b"],
                                        [0], n_self_heads, D)
    cwqkv, cbqkv, cwo, cbo = _prep_attn(params["attn_w"], params["attn_b"],
                                        [1, 2, 3], n_encdec_heads, D)

    ln_g = params["ln_g"].astype(jnp.float32)
    ln_b = params["ln_b"].astype(jnp.float32)
    fc_w1 = params["fc_w1"].astype(jnp.bfloat16)
    fc_b1 = params["fc_b1"].astype(jnp.float32)
    fc_w2 = params["fc_w2"].astype(jnp.bfloat16)
    fc_b2 = params["fc_b2"].astype(jnp.float32)

    # Lane-dense 2-D activation layout; reshape back in the wrapper (free).
    x2d = inputs.reshape(B * T, D).astype(jnp.float32)
    mem2d = memories.reshape(B * Tm, D).astype(jnp.float32)

    param_arrays = (ln_g, ln_b, swqkv, sbqkv, swo, sbo,
                    cwqkv, cbqkv, cwo, cbo, fc_w1, fc_b1, fc_w2, fc_b2)
    param_bytes = sum(int(a.size) * a.dtype.itemsize for a in param_arrays)
    stream_bytes = 4 * (2 * Bb * T * D + Bb * Tm * D + Bb * T + Bb * Tm)
    act_bytes = 4 * (12 * Bb * T * D + 2 * Bb * T * Hf + 4 * Bb * T * max(T, Tm))
    vmem_limit = _vmem_limit_bytes(stream_bytes, param_bytes, act_bytes)

    kernel = make_decoder_kernel(Bb, T, Tm, D, n_self_heads, n_encdec_heads)

    # Resident parameters: whole-array in VMEM, single copy (no double-buffer).
    vmem_param = pl.BlockSpec(memory_space=pltpu.MemorySpace.VMEM)

    out2d = pl.pallas_call(
        kernel,
        out_shape=jax.ShapeDtypeStruct((B * T, D), jnp.float32),
        grid=(G,),
        in_specs=[
            pl.BlockSpec((Bb * T, D), lambda b: (b, 0)),      # inputs (flattened)
            pl.BlockSpec((Bb, 1, T), lambda b: (b, 0, 0)),    # self key-pad bias
            pl.BlockSpec((Bb * Tm, D), lambda b: (b, 0)),     # memories (flattened)
            pl.BlockSpec((Bb, 1, Tm), lambda b: (b, 0, 0)),   # cross key-pad bias
        ] + [vmem_param] * 14,
        out_specs=pl.BlockSpec((Bb * T, D), lambda b: (b, 0)),
        compiler_params=pltpu.CompilerParams(
            dimension_semantics=("parallel",),
            vmem_limit_bytes=vmem_limit),
    )(x2d, self_pad, mem2d, cross_pad,
      ln_g, ln_b, swqkv, sbqkv, swo, sbo, cwqkv, cbqkv, cwo, cbo,
      fc_w1, fc_b1, fc_w2, fc_b2)

    return out2d.reshape(B, T, D)


def init_params(key, D, H):
    ks = jax.random.split(key, 8)
    return {
        # 6 layernorms used in forward:
        # [pre_self_norm, self_attn_norms[0], attn_norms[0..2], mlp_ffn_norm]
        "ln_g": jnp.ones((6, D), jnp.float32)
        + 0.01 * jax.random.normal(ks[0], (6, D), jnp.float32),
        "ln_b": 0.01 * jax.random.normal(ks[1], (6, D), jnp.float32),
        # 4 attention blocks (1 self + 3 enc-dec), each Wq/Wk/Wv/Wo + biases
        "attn_w": 0.1 * jax.random.normal(ks[2], (4, 4, D, D), jnp.float32),
        "attn_b": 0.02 * jax.random.normal(ks[3], (4, 4, D), jnp.float32),
        # FCNet (mlp_ffn): Linear(D,H) -> ReLU -> Linear(H, output_size=D)
        "fc_w1": 0.1 * jax.random.normal(ks[4], (D, H), jnp.float32),
        "fc_b1": 0.02 * jax.random.normal(ks[5], (1, H), jnp.float32),
        "fc_w2": 0.1 * jax.random.normal(ks[6], (H, D), jnp.float32),
        "fc_b2": 0.02 * jax.random.normal(ks[7], (1, D), jnp.float32),
    }


if __name__ == "__main__":
    B, T, Tm, D, H = 2, 8, 8, 32, 64
    key = jax.random.PRNGKey(0)
    k_in, k_mem, k_par = jax.random.split(key, 3)

    inputs = jax.random.normal(k_in, (B, T, D), jnp.float32)
    memories = jax.random.normal(k_mem, (B, Tm, D), jnp.float32)
    # True == padded (masked) position, as in the PyTorch module
    valid_in = jnp.array([[T], [T - 2]])
    valid_mem = jnp.array([[Tm], [Tm - 2]])
    input_mask = jnp.arange(T)[None, :] >= valid_in          # (B, T) bool
    memories_mask = jnp.arange(Tm)[None, :] >= valid_mem     # (B, Tm) bool

    params = init_params(k_par, D, H)

    out = decoder_forward(inputs, input_mask, memories, memories_mask, params,
                          n_self_heads=4, n_encdec_heads=4)
    out = jax.block_until_ready(out)
    assert out.shape == (B, T, D) and bool(jnp.all(jnp.isfinite(out)))
    # TODO(synk): MyMultiHeadAttention / FCNet were not provided in the source;
    # standard MHA and a 2-layer ReLU MLP are assumed.
    print("KERNEL_OK")
</pallas_src>

<mosaic_0001>
module attributes {stable_mosaic.version = 11 : i64} {
  func.func @kernel(%arg0: i32, %arg1: memref<8x32xf32, #tpu.memory_space<vmem>>, %arg2: memref<1x1x8xf32, #tpu.memory_space<vmem>>, %arg3: memref<8x32xf32, #tpu.memory_space<vmem>>, %arg4: memref<1x1x8xf32, #tpu.memory_space<vmem>>, %arg5: memref<6x32xf32, #tpu.memory_space<vmem>>, %arg6: memref<6x32xf32, #tpu.memory_space<vmem>>, %arg7: memref<12x32x8xbf16, #tpu.memory_space<vmem>>, %arg8: memref<12x1x8xf32, #tpu.memory_space<vmem>>, %arg9: memref<4x8x32xbf16, #tpu.memory_space<vmem>>, %arg10: memref<1x32xf32, #tpu.memory_space<vmem>>, %arg11: memref<36x32x8xbf16, #tpu.memory_space<vmem>>, %arg12: memref<36x1x8xf32, #tpu.memory_space<vmem>>, %arg13: memref<12x8x32xbf16, #tpu.memory_space<vmem>>, %arg14: memref<3x32xf32, #tpu.memory_space<vmem>>, %arg15: memref<32x64xbf16, #tpu.memory_space<vmem>>, %arg16: memref<1x64xf32, #tpu.memory_space<vmem>>, %arg17: memref<64x32xbf16, #tpu.memory_space<vmem>>, %arg18: memref<1x32xf32, #tpu.memory_space<vmem>>, %arg19: memref<8x32xf32, #tpu.memory_space<vmem>>) attributes {dimension_semantics = [#tpu.dimension_semantics<parallel>], iteration_bounds = array<i64: 2>, scalar_prefetch = 0 : i64, scratch_operands = 0 : i64, tpu.core_type = #tpu.core_type<tc>, window_params = [{transform_indices = @transform_0, window_bounds = array<i64: 8, 32>}, {transform_indices = @transform_1, window_bounds = array<i64: 1, 1, 8>}, {transform_indices = @transform_2, window_bounds = array<i64: 8, 32>}, {transform_indices = @transform_3, window_bounds = array<i64: 1, 1, 8>}, {pipeline_mode = #tpu.pipeline_mode<synchronous>, transform_indices = @transform_4, window_bounds = array<i64: 6, 32>}, {pipeline_mode = #tpu.pipeline_mode<synchronous>, transform_indices = @transform_5, window_bounds = array<i64: 6, 32>}, {pipeline_mode = #tpu.pipeline_mode<synchronous>, transform_indices = @transform_6, window_bounds = array<i64: 12, 32, 8>}, {pipeline_mode = #tpu.pipeline_mode<synchronous>, transform_indices = @transform_7, window_bounds = array<i64: 12, 1, 8>}, {pipeline_mode = #tpu.pipeline_mode<synchronous>, transform_indices = @transform_8, window_bounds = array<i64: 4, 8, 32>}, {pipeline_mode = #tpu.pipeline_mode<synchronous>, transform_indices = @transform_9, window_bounds = array<i64: 1, 32>}, {pipeline_mode = #tpu.pipeline_mode<synchronous>, transform_indices = @transform_10, window_bounds = array<i64: 36, 32, 8>}, {pipeline_mode = #tpu.pipeline_mode<synchronous>, transform_indices = @transform_11, window_bounds = array<i64: 36, 1, 8>}, {pipeline_mode = #tpu.pipeline_mode<synchronous>, transform_indices = @transform_12, window_bounds = array<i64: 12, 8, 32>}, {pipeline_mode = #tpu.pipeline_mode<synchronous>, transform_indices = @transform_13, window_bounds = array<i64: 3, 32>}, {pipeline_mode = #tpu.pipeline_mode<synchronous>, transform_indices = @transform_14, window_bounds = array<i64: 32, 64>}, {pipeline_mode = #tpu.pipeline_mode<synchronous>, transform_indices = @transform_15, window_bounds = array<i64: 1, 64>}, {pipeline_mode = #tpu.pipeline_mode<synchronous>, transform_indices = @transform_16, window_bounds = array<i64: 64, 32>}, {pipeline_mode = #tpu.pipeline_mode<synchronous>, transform_indices = @transform_17, window_bounds = array<i64: 1, 32>}, {transform_indices = @transform_18, window_bounds = array<i64: 8, 32>}]} {
    %c0 = arith.constant 0 : index
    %c0_0 = arith.constant 0 : index
    %0 = vector.load %arg1[%c0, %c0_0] : memref<8x32xf32, #tpu.memory_space<vmem>>, vector<8x32xf32>
    %c0_1 = arith.constant 0 : index
    %c0_2 = arith.constant 0 : index
    %1 = vector.load %arg3[%c0_1, %c0_2] : memref<8x32xf32, #tpu.memory_space<vmem>>, vector<8x32xf32>
    %2 = arith.truncf %1 : vector<8x32xf32> to vector<8x32xbf16>
    %3 = tpu.iota {dimensions = array<i32: 0>} : vector<8x8xi32>
    %4 = tpu.iota {dimensions = array<i32: 1>} : vector<8x8xi32>
    %5 = arith.cmpi sgt, %4, %3 : vector<8x8xi32>
    %cst = arith.constant -1.000000e+09 : f32
    %cst_3 = arith.constant 0.000000e+00 : f32
    %6 = vector.broadcast %cst : f32 to vector<8x8xf32>
    %7 = vector.broadcast %cst_3 : f32 to vector<8x8xf32>
    %8 = arith.select %5, %6, %7 : vector<8x8xi1>, vector<8x8xf32>
    %9 = vector.shape_cast %8 : vector<8x8xf32> to vector<1x8x8xf32>
    %c0_4 = arith.constant 0 : index
    %c0_5 = arith.constant 0 : index
    %c0_6 = arith.constant 0 : index
    %10 = vector.load %arg2[%c0_4, %c0_5, %c0_6] : memref<1x1x8xf32, #tpu.memory_space<vmem>>, vector<1x1x8xf32>
    %11 = vector.broadcast %10 : vector<1x1x8xf32> to vector<1x8x8xf32>
    %12 = arith.addf %9, %11 : vector<1x8x8xf32>
    %c0_7 = arith.constant 0 : index
    %c0_8 = arith.constant 0 : index
    %c0_9 = arith.constant 0 : index
    %13 = vector.load %arg4[%c0_7, %c0_8, %c0_9] : memref<1x1x8xf32, #tpu.memory_space<vmem>>, vector<1x1x8xf32>
    %c0_10 = arith.constant 0 : index
    %c0_11 = arith.constant 0 : index
    %14 = vector.load %arg5[%c0_10, %c0_11] : memref<6x32xf32, #tpu.memory_space<vmem>>, vector<1x32xf32>
    %15 = vector.shape_cast %14 : vector<1x32xf32> to vector<32xf32>
    %c0_12 = arith.constant 0 : index
    %c0_13 = arith.constant 0 : index
    %16 = vector.load %arg6[%c0_12, %c0_13] : memref<6x32xf32, #tpu.memory_space<vmem>>, vector<1x32xf32>
    %17 = vector.shape_cast %16 : vector<1x32xf32> to vector<32xf32>
    %cst_14 = arith.constant dense<0.000000e+00> : vector<8xf32>
    %18 = vector.multi_reduction <add>, %0, %cst_14 [1] : vector<8x32xf32> to vector<8xf32>
    %19 = vector.shape_cast %18 : vector<8xf32> to vector<8x1xf32>
    %cst_15 = arith.constant 3.200000e+01 : f32
    %20 = vector.broadcast %cst_15 : f32 to vector<8x1xf32>
    %21 = arith.divf %19, %20 : vector<8x1xf32>
    %22 = vector.broadcast %21 : vector<8x1xf32> to vector<8x32xf32>
    %23 = arith.subf %0, %22 : vector<8x32xf32>
    %24 = arith.mulf %23, %23 : vector<8x32xf32>
    %cst_16 = arith.constant dense<0.000000e+00> : vector<8xf32>
    %25 = vector.multi_reduction <add>, %24, %cst_16 [1] : vector<8x32xf32> to vector<8xf32>
    %26 = vector.shape_cast %25 : vector<8xf32> to vector<8x1xf32>
    %cst_17 = arith.constant 3.200000e+01 : f32
    %27 = vector.broadcast %cst_17 : f32 to vector<8x1xf32>
    %28 = arith.divf %26, %27 : vector<8x1xf32>
    %29 = vector.broadcast %21 : vector<8x1xf32> to vector<8x32xf32>
    %30 = arith.subf %0, %29 : vector<8x32xf32>
    %cst_18 = arith.constant 9.99999974E-6 : f32
    %31 = vector.broadcast %cst_18 : f32 to vector<8x1xf32>
    %32 = arith.addf %28, %31 : vector<8x1xf32>
    %33 = math.rsqrt %32 : vector<8x1xf32>
    %34 = vector.broadcast %33 : vector<8x1xf32> to vector<8x32xf32>
    %35 = arith.mulf %30, %34 : vector<8x32xf32>
    %36 = vector.shape_cast %15 : vector<32xf32> to vector<1x32xf32>
    %37 = vector.broadcast %36 : vector<1x32xf32> to vector<8x32xf32>
    %38 = arith.mulf %35, %37 : vector<8x32xf32>
    %39 = vector.shape_cast %17 : vector<32xf32> to vector<1x32xf32>
    %40 = vector.broadcast %39 : vector<1x32xf32> to vector<8x32xf32>
    %41 = arith.addf %38, %40 : vector<8x32xf32>
    %42 = arith.truncf %41 : vector<8x32xf32> to vector<8x32xbf16>
    %cst_19 = arith.constant 0.000000e+00 : f32
    %43 = vector.broadcast %cst_19 : f32 to vector<8x32xf32>
    %c0_20 = arith.constant 0 : index
    %c0_21 = arith.constant 0 : index
    %44 = vector.load %arg10[%c0_20, %c0_21] : memref<1x32xf32, #tpu.memory_space<vmem>>, vector<1x32xf32>
    %45 = vector.shape_cast %44 : vector<1x32xf32> to vector<32xf32>
    %46 = vector.shape_cast %45 : vector<32xf32> to vector<1x32xf32>
    %47 = vector.broadcast %46 : vector<1x32xf32> to vector<8x32xf32>
    %48 = arith.addf %43, %47 : vector<8x32xf32>
    %c0_22 = arith.constant 0 : index
    %c0_23 = arith.constant 0 : index
    %c0_24 = arith.constant 0 : index
    %49 = vector.load %arg7[%c0_22, %c0_23, %c0_24] : memref<12x32x8xbf16, #tpu.memory_space<vmem>>, vector<1x32x8xbf16>
    %50 = vector.shape_cast %49 : vector<1x32x8xbf16> to vector<32x8xbf16>
    %cst_25 = arith.constant dense<0.000000e+00> : vector<8x8xf32>
    %51 = tpu.matmul %42, %50, %cst_25 {dimension_numbers = #tpu.dot_dimension_numbers<[1], [0], [0], [1], [0, 0, 1, 1], [], []>} : vector<8x32xbf16>, vector<32x8xbf16>, vector<8x8xf32> -> vector<8x8xf32>
    %c0_26 = arith.constant 0 : index
    %c0_27 = arith.constant 0 : index
    %c0_28 = arith.constant 0 : index
    %52 = vector.load %arg8[%c0_26, %c0_27, %c0_28] : memref<12x1x8xf32, #tpu.memory_space<vmem>>, vector<1x1x8xf32>
    %53 = vector.shape_cast %52 : vector<1x1x8xf32> to vector<1x8xf32>
    %54 = vector.broadcast %53 : vector<1x8xf32> to vector<8x8xf32>
    %55 = arith.addf %51, %54 : vector<8x8xf32>
    %56 = arith.truncf %55 : vector<8x8xf32> to vector<8x8xbf16>
    %c4 = arith.constant 4 : index
    %c0_29 = arith.constant 0 : index
    %c0_30 = arith.constant 0 : index
    %57 = vector.load %arg7[%c4, %c0_29, %c0_30] : memref<12x32x8xbf16, #tpu.memory_space<vmem>>, vector<1x32x8xbf16>
    %58 = vector.shape_cast %57 : vector<1x32x8xbf16> to vector<32x8xbf16>
    %cst_31 = arith.constant dense<0.000000e+00> : vector<8x8xf32>
    %59 = tpu.matmul %42, %58, %cst_31 {dimension_numbers = #tpu.dot_dimension_numbers<[1], [0], [0], [1], [0, 0, 1, 1], [], []>} : vector<8x32xbf16>, vector<32x8xbf16>, vector<8x8xf32> -> vector<8x8xf32>
    %c4_32 = arith.constant 4 : index
    %c0_33 = arith.constant 0 : index
    %c0_34 = arith.constant 0 : index
    %60 = vector.load %arg8[%c4_32, %c0_33, %c0_34] : memref<12x1x8xf32, #tpu.memory_space<vmem>>, vector<1x1x8xf32>
    %61 = vector.shape_cast %60 : vector<1x1x8xf32> to vector<1x8xf32>
    %62 = vector.broadcast %61 : vector<1x8xf32> to vector<8x8xf32>
    %63 = arith.addf %59, %62 : vector<8x8xf32>
    %64 = arith.truncf %63 : vector<8x8xf32> to vector<8x8xbf16>
    %c8 = arith.constant 8 : index
    %c0_35 = arith.constant 0 : index
    %c0_36 = arith.constant 0 : index
    %65 = vector.load %arg7[%c8, %c0_35, %c0_36] : memref<12x32x8xbf16, #tpu.memory_space<vmem>>, vector<1x32x8xbf16>
    %66 = vector.shape_cast %65 : vector<1x32x8xbf16> to vector<32x8xbf16>
    %cst_37 = arith.constant dense<0.000000e+00> : vector<8x8xf32>
    %67 = tpu.matmul %42, %66, %cst_37 {dimension_numbers = #tpu.dot_dimension_numbers<[1], [0], [0], [1], [0, 0, 1, 1], [], []>} : vector<8x32xbf16>, vector<32x8xbf16>, vector<8x8xf32> -> vector<8x8xf32>
    %c8_38 = arith.constant 8 : index
    %c0_39 = arith.constant 0 : index
    %c0_40 = arith.constant 0 : index
    %68 = vector.load %arg8[%c8_38, %c0_39, %c0_40] : memref<12x1x8xf32, #tpu.memory_space<vmem>>, vector<1x1x8xf32>
    %69 = vector.shape_cast %68 : vector<1x1x8xf32> to vector<1x8xf32>
    %70 = vector.broadcast %69 : vector<1x8xf32> to vector<8x8xf32>
    %71 = arith.addf %67, %70 : vector<8x8xf32>
    %72 = arith.truncf %71 : vector<8x8xf32> to vector<8x8xbf16>
    %73 = vector.shape_cast %56 : vector<8x8xbf16> to vector<1x8x8xbf16>
    %74 = vector.shape_cast %64 : vector<8x8xbf16> to vector<1x8x8xbf16>
    "tpu.trace_start"() <{level = 10 : i32, message = "bqd,bkd->bqk"}> : () -> ()
    %cst_41 = arith.constant dense<0.000000e+00> : vector<1x8x8xf32>
    %75 = tpu.matmul %73, %74, %cst_41 {dimension_numbers = #tpu.dot_dimension_numbers<[2], [2], [1], [1], [0, 0, 0, 1, 1, 1], [0], [0]>} : vector<1x8x8xbf16>, vector<1x8x8xbf16>, vector<1x8x8xf32> -> vector<1x8x8xf32>
    "tpu.trace_stop"() : () -> ()
    %76 = arith.addf %75, %12 : vector<1x8x8xf32>
    %cst_42 = arith.constant dense<0xFF800000> : vector<1x8xf32>
    %77 = vector.multi_reduction <maximumf>, %76, %cst_42 [2] : vector<1x8x8xf32> to vector<1x8xf32>
    %78 = vector.shape_cast %77 : vector<1x8xf32> to vector<1x8x1xf32>
    %79 = vector.broadcast %78 : vector<1x8x1xf32> to vector<1x8x8xf32>
    %80 = arith.subf %76, %79 : vector<1x8x8xf32>
    %81 = math.exp %80 : vector<1x8x8xf32>
    %cst_43 = arith.constant dense<0.000000e+00> : vector<1x8xf32>
    %82 = vector.multi_reduction <add>, %81, %cst_43 [2] : vector<1x8x8xf32> to vector<1x8xf32>
    %83 = vector.shape_cast %82 : vector<1x8xf32> to vector<1x8x1xf32>
    %84 = tpu.reciprocal %83 {approx = true} : vector<1x8x1xf32> -> vector<1x8x1xf32>
    %85 = vector.broadcast %84 : vector<1x8x1xf32> to vector<1x8x8xf32>
    %86 = arith.mulf %81, %85 : vector<1x8x8xf32>
    %87 = arith.truncf %86 : vector<1x8x8xf32> to vector<1x8x8xbf16>
    %88 = vector.shape_cast %72 : vector<8x8xbf16> to vector<1x8x8xbf16>
    "tpu.trace_start"() <{level = 10 : i32, message = "bqk,bkd->bqd"}> : () -> ()
    %cst_44 = arith.constant dense<0.000000e+00> : vector<1x8x8xf32>
    %89 = tpu.matmul %87, %88, %cst_44 {dimension_numbers = #tpu.dot_dimension_numbers<[2], [1], [1], [2], [0, 0, 0, 1, 1, 2], [0], [0]>} : vector<1x8x8xbf16>, vector<1x8x8xbf16>, vector<1x8x8xf32> -> vector<1x8x8xf32>
    "tpu.trace_stop"() : () -> ()
    %90 = vector.shape_cast %89 : vector<1x8x8xf32> to vector<8x8xf32>
    %91 = arith.truncf %90 : vector<8x8xf32> to vector<8x8xbf16>
    %c0_45 = arith.constant 0 : index
    %c0_46 = arith.constant 0 : index
    %c0_47 = arith.constant 0 : index
    %92 = vector.load %arg9[%c0_45, %c0_46, %c0_47] : memref<4x8x32xbf16, #tpu.memory_space<vmem>>, vector<1x8x32xbf16>
    %93 = vector.shape_cast %92 : vector<1x8x32xbf16> to vector<8x32xbf16>
    %cst_48 = arith.constant dense<0.000000e+00> : vector<8x32xf32>
    %94 = tpu.matmul %91, %93, %cst_48 {dimension_numbers = #tpu.dot_dimension_numbers<[1], [0], [0], [1], [0, 0, 1, 1], [], []>} : vector<8x8xbf16>, vector<8x32xbf16>, vector<8x32xf32> -> vector<8x32xf32>
    %95 = arith.addf %48, %94 : vector<8x32xf32>
    %c1 = arith.constant 1 : index
    %c0_49 = arith.constant 0 : index
    %c0_50 = arith.constant 0 : index
    %96 = vector.load %arg7[%c1, %c0_49, %c0_50] : memref<12x32x8xbf16, #tpu.memory_space<vmem>>, vector<1x32x8xbf16>
    %97 = vector.shape_cast %96 : vector<1x32x8xbf16> to vector<32x8xbf16>
    %cst_51 = arith.constant dense<0.000000e+00> : vector<8x8xf32>
    %98 = tpu.matmul %42, %97, %cst_51 {dimension_numbers = #tpu.dot_dimension_numbers<[1], [0], [0], [1], [0, 0, 1, 1], [], []>} : vector<8x32xbf16>, vector<32x8xbf16>, vector<8x8xf32> -> vector<8x8xf32>
    %c1_52 = arith.constant 1 : index
    %c0_53 = arith.constant 0 : index
    %c0_54 = arith.constant 0 : index
    %99 = vector.load %arg8[%c1_52, %c0_53, %c0_54] : memref<12x1x8xf32, #tpu.memory_space<vmem>>, vector<1x1x8xf32>
    %100 = vector.shape_cast %99 : vector<1x1x8xf32> to vector<1x8xf32>
    %101 = vector.broadcast %100 : vector<1x8xf32> to vector<8x8xf32>
    %102 = arith.addf %98, %101 : vector<8x8xf32>
    %103 = arith.truncf %102 : vector<8x8xf32> to vector<8x8xbf16>
    %c5 = arith.constant 5 : index
    %c0_55 = arith.constant 0 : index
    %c0_56 = arith.constant 0 : index
    %104 = vector.load %arg7[%c5, %c0_55, %c0_56] : memref<12x32x8xbf16, #tpu.memory_space<vmem>>, vector<1x32x8xbf16>
    %105 = vector.shape_cast %104 : vector<1x32x8xbf16> to vector<32x8xbf16>
    %cst_57 = arith.constant dense<0.000000e+00> : vector<8x8xf32>
    %106 = tpu.matmul %42, %105, %cst_57 {dimension_numbers = #tpu.dot_dimension_numbers<[1], [0], [0], [1], [0, 0, 1, 1], [], []>} : vector<8x32xbf16>, vector<32x8xbf16>, vector<8x8xf32> -> vector<8x8xf32>
    %c5_58 = arith.constant 5 : index
    %c0_59 = arith.constant 0 : index
    %c0_60 = arith.constant 0 : index
    %107 = vector.load %arg8[%c5_58, %c0_59, %c0_60] : memref<12x1x8xf32, #tpu.memory_space<vmem>>, vector<1x1x8xf32>
    %108 = vector.shape_cast %107 : vector<1x1x8xf32> to vector<1x8xf32>
    %109 = vector.broadcast %108 : vector<1x8xf32> to vector<8x8xf32>
    %110 = arith.addf %106, %109 : vector<8x8xf32>
    %111 = arith.truncf %110 : vector<8x8xf32> to vector<8x8xbf16>
    %c9 = arith.constant 9 : index
    %c0_61 = arith.constant 0 : index
    %c0_62 = arith.constant 0 : index
    %112 = vector.load %arg7[%c9, %c0_61, %c0_62] : memref<12x32x8xbf16, #tpu.memory_space<vmem>>, vector<1x32x8xbf16>
    %113 = vector.shape_cast %112 : vector<1x32x8xbf16> to vector<32x8xbf16>
    %cst_63 = arith.constant dense<0.000000e+00> : vector<8x8xf32>
    %114 = tpu.matmul %42, %113, %cst_63 {dimension_numbers = #tpu.dot_dimension_numbers<[1], [0], [0], [1], [0, 0, 1, 1], [], []>} : vector<8x32xbf16>, vector<32x8xbf16>, vector<8x8xf32> -> vector<8x8xf32>
    %c9_64 = arith.constant 9 : index
    %c0_65 = arith.constant 0 : index
    %c0_66 = arith.constant 0 : index
    %115 = vector.load %arg8[%c9_64, %c0_65, %c0_66] : memref<12x1x8xf32, #tpu.memory_space<vmem>>, vector<1x1x8xf32>
    %116 = vector.shape_cast %115 : vector<1x1x8xf32> to vector<1x8xf32>
    %117 = vector.broadcast %116 : vector<1x8xf32> to vector<8x8xf32>
    %118 = arith.addf %114, %117 : vector<8x8xf32>
    %119 = arith.truncf %118 : vector<8x8xf32> to vector<8x8xbf16>
    %120 = vector.shape_cast %103 : vector<8x8xbf16> to vector<1x8x8xbf16>
    %121 = vector.shape_cast %111 : vector<8x8xbf16> to vector<1x8x8xbf16>
    "tpu.trace_start"() <{level = 10 : i32, message = "bqd,bkd->bqk"}> : () -> ()
    %cst_67 = arith.constant dense<0.000000e+00> : vector<1x8x8xf32>
    %122 = tpu.matmul %120, %121, %cst_67 {dimension_numbers = #tpu.dot_dimension_numbers<[2], [2], [1], [1], [0, 0, 0, 1, 1, 1], [0], [0]>} : vector<1x8x8xbf16>, vector<1x8x8xbf16>, vector<1x8x8xf32> -> vector<1x8x8xf32>
    "tpu.trace_stop"() : () -> ()
    %123 = arith.addf %122, %12 : vector<1x8x8xf32>
    %cst_68 = arith.constant dense<0xFF800000> : vector<1x8xf32>
    %124 = vector.multi_reduction <maximumf>, %123, %cst_68 [2] : vector<1x8x8xf32> to vector<1x8xf32>
    %125 = vector.shape_cast %124 : vector<1x8xf32> to vector<1x8x1xf32>
    %126 = vector.broadcast %125 : vector<1x8x1xf32> to vector<1x8x8xf32>
    %127 = arith.subf %123, %126 : vector<1x8x8xf32>
    %128 = math.exp %127 : vector<1x8x8xf32>
    %cst_69 = arith.constant dense<0.000000e+00> : vector<1x8xf32>
    %129 = vector.multi_reduction <add>, %128, %cst_69 [2] : vector<1x8x8xf32> to vector<1x8xf32>
    %130 = vector.shape_cast %129 : vector<1x8xf32> to vector<1x8x1xf32>
    %131 = tpu.reciprocal %130 {approx = true} : vector<1x8x1xf32> -> vector<1x8x1xf32>
    %132 = vector.broadcast %131 : vector<1x8x1xf32> to vector<1x8x8xf32>
    %133 = arith.mulf %128, %132 : vector<1x8x8xf32>
    %134 = arith.truncf %133 : vector<1x8x8xf32> to vector<1x8x8xbf16>
    %135 = vector.shape_cast %119 : vector<8x8xbf16> to vector<1x8x8xbf16>
    "tpu.trace_start"() <{level = 10 : i32, message = "bqk,bkd->bqd"}> : () -> ()
    %cst_70 = arith.constant dense<0.000000e+00> : vector<1x8x8xf32>
    %136 = tpu.matmul %134, %135, %cst_70 {dimension_numbers = #tpu.dot_dimension_numbers<[2], [1], [1], [2], [0, 0, 0, 1, 1, 2], [0], [0]>} : vector<1x8x8xbf16>, vector<1x8x8xbf16>, vector<1x8x8xf32> -> vector<1x8x8xf32>
    "tpu.trace_stop"() : () -> ()
    %137 = vector.shape_cast %136 : vector<1x8x8xf32> to vector<8x8xf32>
    %138 = arith.truncf %137 : vector<8x8xf32> to vector<8x8xbf16>
    %c1_71 = arith.constant 1 : index
    %c0_72 = arith.constant 0 : index
    %c0_73 = arith.constant 0 : index
    %139 = vector.load %arg9[%c1_71, %c0_72, %c0_73] : memref<4x8x32xbf16, #tpu.memory_space<vmem>>, vector<1x8x32xbf16>
    %140 = vector.shape_cast %139 : vector<1x8x32xbf16> to vector<8x32xbf16>
    %cst_74 = arith.constant dense<0.000000e+00> : vector<8x32xf32>
    %141 = tpu.matmul %138, %140, %cst_74 {dimension_numbers = #tpu.dot_dimension_numbers<[1], [0], [0], [1], [0, 0, 1, 1], [], []>} : vector<8x8xbf16>, vector<8x32xbf16>, vector<8x32xf32> -> vector<8x32xf32>
    %142 = arith.addf %95, %141 : vector<8x32xf32>
    %c2 = arith.constant 2 : index
    %c0_75 = arith.constant 0 : index
    %c0_76 = arith.constant 0 : index
    %143 = vector.load %arg7[%c2, %c0_75, %c0_76] : memref<12x32x8xbf16, #tpu.memory_space<vmem>>, vector<1x32x8xbf16>
    %144 = vector.shape_cast %143 : vector<1x32x8xbf16> to vector<32x8xbf16>
    %cst_77 = arith.constant dense<0.000000e+00> : vector<8x8xf32>
    %145 = tpu.matmul %42, %144, %cst_77 {dimension_numbers = #tpu.dot_dimension_numbers<[1], [0], [0], [1], [0, 0, 1, 1], [], []>} : vector<8x32xbf16>, vector<32x8xbf16>, vector<8x8xf32> -> vector<8x8xf32>
    %c2_78 = arith.constant 2 : index
    %c0_79 = arith.constant 0 : index
    %c0_80 = arith.constant 0 : index
    %146 = vector.load %arg8[%c2_78, %c0_79, %c0_80] : memref<12x1x8xf32, #tpu.memory_space<vmem>>, vector<1x1x8xf32>
    %147 = vector.shape_cast %146 : vector<1x1x8xf32> to vector<1x8xf32>
    %148 = vector.broadcast %147 : vector<1x8xf32> to vector<8x8xf32>
    %149 = arith.addf %145, %148 : vector<8x8xf32>
    %150 = arith.truncf %149 : vector<8x8xf32> to vector<8x8xbf16>
    %c6 = arith.constant 6 : index
    %c0_81 = arith.constant 0 : index
    %c0_82 = arith.constant 0 : index
    %151 = vector.load %arg7[%c6, %c0_81, %c0_82] : memref<12x32x8xbf16, #tpu.memory_space<vmem>>, vector<1x32x8xbf16>
    %152 = vector.shape_cast %151 : vector<1x32x8xbf16> to vector<32x8xbf16>
    %cst_83 = arith.constant dense<0.000000e+00> : vector<8x8xf32>
    %153 = tpu.matmul %42, %152, %cst_83 {dimension_numbers = #tpu.dot_dimension_numbers<[1], [0], [0], [1], [0, 0, 1, 1], [], []>} : vector<8x32xbf16>, vector<32x8xbf16>, vector<8x8xf32> -> vector<8x8xf32>
    %c6_84 = arith.constant 6 : index
    %c0_85 = arith.constant 0 : index
    %c0_86 = arith.constant 0 : index
    %154 = vector.load %arg8[%c6_84, %c0_85, %c0_86] : memref<12x1x8xf32, #tpu.memory_space<vmem>>, vector<1x1x8xf32>
    %155 = vector.shape_cast %154 : vector<1x1x8xf32> to vector<1x8xf32>
    %156 = vector.broadcast %155 : vector<1x8xf32> to vector<8x8xf32>
    %157 = arith.addf %153, %156 : vector<8x8xf32>
    %158 = arith.truncf %157 : vector<8x8xf32> to vector<8x8xbf16>
    %c10 = arith.constant 10 : index
    %c0_87 = arith.constant 0 : index
    %c0_88 = arith.constant 0 : index
    %159 = vector.load %arg7[%c10, %c0_87, %c0_88] : memref<12x32x8xbf16, #tpu.memory_space<vmem>>, vector<1x32x8xbf16>
    %160 = vector.shape_cast %159 : vector<1x32x8xbf16> to vector<32x8xbf16>
    %cst_89 = arith.constant dense<0.000000e+00> : vector<8x8xf32>
    %161 = tpu.matmul %42, %160, %cst_89 {dimension_numbers = #tpu.dot_dimension_numbers<[1], [0], [0], [1], [0, 0, 1, 1], [], []>} : vector<8x32xbf16>, vector<32x8xbf16>, vector<8x8xf32> -> vector<8x8xf32>
    %c10_90 = arith.constant 10 : index
    %c0_91 = arith.constant 0 : index
    %c0_92 = arith.constant 0 : index
    %162 = vector.load %arg8[%c10_90, %c0_91, %c0_92] : memref<12x1x8xf32, #tpu.memory_space<vmem>>, vector<1x1x8xf32>
    %163 = vector.shape_cast %162 : vector<1x1x8xf32> to vector<1x8xf32>
    %164 = vector.broadcast %163 : vector<1x8xf32> to vector<8x8xf32>
    %165 = arith.addf %161, %164 : vector<8x8xf32>
    %166 = arith.truncf %165 : vector<8x8xf32> to vector<8x8xbf16>
    %167 = vector.shape_cast %150 : vector<8x8xbf16> to vector<1x8x8xbf16>
    %168 = vector.shape_cast %158 : vector<8x8xbf16> to vector<1x8x8xbf16>
    "tpu.trace_start"() <{level = 10 : i32, message = "bqd,bkd->bqk"}> : () -> ()
    %cst_93 = arith.constant dense<0.000000e+00> : vector<1x8x8xf32>
    %169 = tpu.matmul %167, %168, %cst_93 {dimension_numbers = #tpu.dot_dimension_numbers<[2], [2], [1], [1], [0, 0, 0, 1, 1, 1], [0], [0]>} : vector<1x8x8xbf16>, vector<1x8x8xbf16>, vector<1x8x8xf32> -> vector<1x8x8xf32>
    "tpu.trace_stop"() : () -> ()
    %170 = arith.addf %169, %12 : vector<1x8x8xf32>
    %cst_94 = arith.constant dense<0xFF800000> : vector<1x8xf32>
    %171 = vector.multi_reduction <maximumf>, %170, %cst_94 [2] : vector<1x8x8xf32> to vector<1x8xf32>
    %172 = vector.shape_cast %171 : vector<1x8xf32> to vector<1x8x1xf32>
    %173 = vector.broadcast %172 : vector<1x8x1xf32> to vector<1x8x8xf32>
    %174 = arith.subf %170, %173 : vector<1x8x8xf32>
    %175 = math.exp %174 : vector<1x8x8xf32>
    %cst_95 = arith.constant dense<0.000000e+00> : vector<1x8xf32>
    %176 = vector.multi_reduction <add>, %175, %cst_95 [2] : vector<1x8x8xf32> to vector<1x8xf32>
    %177 = vector.shape_cast %176 : vector<1x8xf32> to vector<1x8x1xf32>
    %178 = tpu.reciprocal %177 {approx = true} : vector<1x8x1xf32> -> vector<1x8x1xf32>
    %179 = vector.broadcast %178 : vector<1x8x1xf32> to vector<1x8x8xf32>
    %180 = arith.mulf %175, %179 : vector<1x8x8xf32>
    %181 = arith.truncf %180 : vector<1x8x8xf32> to vector<1x8x8xbf16>
    %182 = vector.shape_cast %166 : vector<8x8xbf16> to vector<1x8x8xbf16>
    "tpu.trace_start"() <{level = 10 : i32, message = "bqk,bkd->bqd"}> : () -> ()
    %cst_96 = arith.constant dense<0.000000e+00> : vector<1x8x8xf32>
    %183 = tpu.matmul %181, %182, %cst_96 {dimension_numbers = #tpu.dot_dimension_numbers<[2], [1], [1], [2], [0, 0, 0, 1, 1, 2], [0], [0]>} : vector<1x8x8xbf16>, vector<1x8x8xbf16>, vector<1x8x8xf32> -> vector<1x8x8xf32>
    "tpu.trace_stop"() : () -> ()
    %184 = vector.shape_cast %183 : vector<1x8x8xf32> to vector<8x8xf32>
    %185 = arith.truncf %184 : vector<8x8xf32> to vector<8x8xbf16>
    %c2_97 = arith.constant 2 : index
    %c0_98 = arith.constant 0 : index
    %c0_99 = arith.constant 0 : index
    %186 = vector.load %arg9[%c2_97, %c0_98, %c0_99] : memref<4x8x32xbf16, #tpu.memory_space<vmem>>, vector<1x8x32xbf16>
    %187 = vector.shape_cast %186 : vector<1x8x32xbf16> to vector<8x32xbf16>
    %cst_100 = arith.constant dense<0.000000e+00> : vector<8x32xf32>
    %188 = tpu.matmul %185, %187, %cst_100 {dimension_numbers = #tpu.dot_dimension_numbers<[1], [0], [0], [1], [0, 0, 1, 1], [], []>} : vector<8x8xbf16>, vector<8x32xbf16>, vector<8x32xf32> -> vector<8x32xf32>
    %189 = arith.addf %142, %188 : vector<8x32xf32>
    %c3 = arith.constant 3 : index
    %c0_101 = arith.constant 0 : index
    %c0_102 = arith.constant 0 : index
    %190 = vector.load %arg7[%c3, %c0_101, %c0_102] : memref<12x32x8xbf16, #tpu.memory_space<vmem>>, vector<1x32x8xbf16>
    %191 = vector.shape_cast %190 : vector<1x32x8xbf16> to vector<32x8xbf16>
    %cst_103 = arith.constant dense<0.000000e+00> : vector<8x8xf32>
    %192 = tpu.matmul %42, %191, %cst_103 {dimension_numbers = #tpu.dot_dimension_numbers<[1], [0], [0], [1], [0, 0, 1, 1], [], []>} : vector<8x32xbf16>, vector<32x8xbf16>, vector<8x8xf32> -> vector<8x8xf32>
    %c3_104 = arith.constant 3 : index
    %c0_105 = arith.constant 0 : index
    %c0_106 = arith.constant 0 : index
    %193 = vector.load %arg8[%c3_104, %c0_105, %c0_106] : memref<12x1x8xf32, #tpu.memory_space<vmem>>, vector<1x1x8xf32>
    %194 = vector.shape_cast %193 : vector<1x1x8xf32> to vector<1x8xf32>
    %195 = vector.broadcast %194 : vector<1x8xf32> to vector<8x8xf32>
    %196 = arith.addf %192, %195 : vector<8x8xf32>
    %197 = arith.truncf %196 : vector<8x8xf32> to vector<8x8xbf16>
    %c7 = arith.constant 7 : index
    %c0_107 = arith.constant 0 : index
    %c0_108 = arith.constant 0 : index
    %198 = vector.load %arg7[%c7, %c0_107, %c0_108] : memref<12x32x8xbf16, #tpu.memory_space<vmem>>, vector<1x32x8xbf16>
    %199 = vector.shape_cast %198 : vector<1x32x8xbf16> to vector<32x8xbf16>
    %cst_109 = arith.constant dense<0.000000e+00> : vector<8x8xf32>
    %200 = tpu.matmul %42, %199, %cst_109 {dimension_numbers = #tpu.dot_dimension_numbers<[1], [0], [0], [1], [0, 0, 1, 1], [], []>} : vector<8x32xbf16>, vector<32x8xbf16>, vector<8x8xf32> -> vector<8x8xf32>
    %c7_110 = arith.constant 7 : index
    %c0_111 = arith.constant 0 : index
    %c0_112 = arith.constant 0 : index
    %201 = vector.load %arg8[%c7_110, %c0_111, %c0_112] : memref<12x1x8xf32, #tpu.memory_space<vmem>>, vector<1x1x8xf32>
    %202 = vector.shape_cast %201 : vector<1x1x8xf32> to vector<1x8xf32>
    %203 = vector.broadcast %202 : vector<1x8xf32> to vector<8x8xf32>
    %204 = arith.addf %200, %203 : vector<8x8xf32>
    %205 = arith.truncf %204 : vector<8x8xf32> to vector<8x8xbf16>
    %c11 = arith.constant 11 : index
    %c0_113 = arith.constant 0 : index
    %c0_114 = arith.constant 0 : index
    %206 = vector.load %arg7[%c11, %c0_113, %c0_114] : memref<12x32x8xbf16, #tpu.memory_space<vmem>>, vector<1x32x8xbf16>
    %207 = vector.shape_cast %206 : vector<1x32x8xbf16> to vector<32x8xbf16>
    %cst_115 = arith.constant dense<0.000000e+00> : vector<8x8xf32>
    %208 = tpu.matmul %42, %207, %cst_115 {dimension_numbers = #tpu.dot_dimension_numbers<[1], [0], [0], [1], [0, 0, 1, 1], [], []>} : vector<8x32xbf16>, vector<32x8xbf16>, vector<8x8xf32> -> vector<8x8xf32>
    %c11_116 = arith.constant 11 : index
    %c0_117 = arith.constant 0 : index
    %c0_118 = arith.constant 0 : index
    %209 = vector.load %arg8[%c11_116, %c0_117, %c0_118] : memref<12x1x8xf32, #tpu.memory_space<vmem>>, vector<1x1x8xf32>
    %210 = vector.shape_cast %209 : vector<1x1x8xf32> to vector<1x8xf32>
    %211 = vector.broadcast %210 : vector<1x8xf32> to vector<8x8xf32>
    %212 = arith.addf %208, %211 : vector<8x8xf32>
    %213 = arith.truncf %212 : vector<8x8xf32> to vector<8x8xbf16>
    %214 = vector.shape_cast %197 : vector<8x8xbf16> to vector<1x8x8xbf16>
    %215 = vector.shape_cast %205 : vector<8x8xbf16> to vector<1x8x8xbf16>
    "tpu.trace_start"() <{level = 10 : i32, message = "bqd,bkd->bqk"}> : () -> ()
    %cst_119 = arith.constant dense<0.000000e+00> : vector<1x8x8xf32>
    %216 = tpu.matmul %214, %215, %cst_119 {dimension_numbers = #tpu.dot_dimension_numbers<[2], [2], [1], [1], [0, 0, 0, 1, 1, 1], [0], [0]>} : vector<1x8x8xbf16>, vector<1x8x8xbf16>, vector<1x8x8xf32> -> vector<1x8x8xf32>
    "tpu.trace_stop"() : () -> ()
    %217 = arith.addf %216, %12 : vector<1x8x8xf32>
    %cst_120 = arith.constant dense<0xFF800000> : vector<1x8xf32>
    %218 = vector.multi_reduction <maximumf>, %217, %cst_120 [2] : vector<1x8x8xf32> to vector<1x8xf32>
    %219 = vector.shape_cast %218 : vector<1x8xf32> to vector<1x8x1xf32>
    %220 = vector.broadcast %219 : vector<1x8x1xf32> to vector<1x8x8xf32>
    %221 = arith.subf %217, %220 : vector<1x8x8xf32>
    %222 = math.exp %221 : vector<1x8x8xf32>
    %cst_121 = arith.constant dense<0.000000e+00> : vector<1x8xf32>
    %223 = vector.multi_reduction <add>, %222, %cst_121 [2] : vector<1x8x8xf32> to vector<1x8xf32>
    %224 = vector.shape_cast %223 : vector<1x8xf32> to vector<1x8x1xf32>
    %225 = tpu.reciprocal %224 {approx = true} : vector<1x8x1xf32> -> vector<1x8x1xf32>
    %226 = vector.broadcast %225 : vector<1x8x1xf32> to vector<1x8x8xf32>
    %227 = arith.mulf %222, %226 : vector<1x8x8xf32>
    %228 = arith.truncf %227 : vector<1x8x8xf32> to vector<1x8x8xbf16>
    %229 = vector.shape_cast %213 : vector<8x8xbf16> to vector<1x8x8xbf16>
    "tpu.trace_start"() <{level = 10 : i32, message = "bqk,bkd->bqd"}> : () -> ()
    %cst_122 = arith.constant dense<0.000000e+00> : vector<1x8x8xf32>
    %230 = tpu.matmul %228, %229, %cst_122 {dimension_numbers = #tpu.dot_dimension_numbers<[2], [1], [1], [2], [0, 0, 0, 1, 1, 2], [0], [0]>} : vector<1x8x8xbf16>, vector<1x8x8xbf16>, vector<1x8x8xf32> -> vector<1x8x8xf32>
    "tpu.trace_stop"() : () -> ()
    %231 = vector.shape_cast %230 : vector<1x8x8xf32> to vector<8x8xf32>
    %232 = arith.truncf %231 : vector<8x8xf32> to vector<8x8xbf16>
    %c3_123 = arith.constant 3 : index
    %c0_124 = arith.constant 0 : index
    %c0_125 = arith.constant 0 : index
    %233 = vector.load %arg9[%c3_123, %c0_124, %c0_125] : memref<4x8x32xbf16, #tpu.memory_space<vmem>>, vector<1x8x32xbf16>
    %234 = vector.shape_cast %233 : vector<1x8x32xbf16> to vector<8x32xbf16>
    %cst_126 = arith.constant dense<0.000000e+00> : vector<8x32xf32>
    %235 = tpu.matmul %232, %234, %cst_126 {dimension_numbers = #tpu.dot_dimension_numbers<[1], [0], [0], [1], [0, 0, 1, 1], [], []>} : vector<8x8xbf16>, vector<8x32xbf16>, vector<8x32xf32> -> vector<8x32xf32>
    %236 = arith.addf %189, %235 : vector<8x32xf32>
    %237 = arith.addf %41, %236 : vector<8x32xf32>
    %c1_127 = arith.constant 1 : index
    %c0_128 = arith.constant 0 : index
    %238 = vector.load %arg5[%c1_127, %c0_128] : memref<6x32xf32, #tpu.memory_space<vmem>>, vector<1x32xf32>
    %239 = vector.shape_cast %238 : vector<1x32xf32> to vector<32xf32>
    %c1_129 = arith.constant 1 : index
    %c0_130 = arith.constant 0 : index
    %240 = vector.load %arg6[%c1_129, %c0_130] : memref<6x32xf32, #tpu.memory_space<vmem>>, vector<1x32xf32>
    %241 = vector.shape_cast %240 : vector<1x32xf32> to vector<32xf32>
    %cst_131 = arith.constant dense<0.000000e+00> : vector<8xf32>
    %242 = vector.multi_reduction <add>, %237, %cst_131 [1] : vector<8x32xf32> to vector<8xf32>
    %243 = vector.shape_cast %242 : vector<8xf32> to vector<8x1xf32>
    %cst_132 = arith.constant 3.200000e+01 : f32
    %244 = vector.broadcast %cst_132 : f32 to vector<8x1xf32>
    %245 = arith.divf %243, %244 : vector<8x1xf32>
    %246 = vector.broadcast %245 : vector<8x1xf32> to vector<8x32xf32>
    %247 = arith.subf %237, %246 : vector<8x32xf32>
    %248 = arith.mulf %247, %247 : vector<8x32xf32>
    %cst_133 = arith.constant dense<0.000000e+00> : vector<8xf32>
    %249 = vector.multi_reduction <add>, %248, %cst_133 [1] : vector<8x32xf32> to vector<8xf32>
    %250 = vector.shape_cast %249 : vector<8xf32> to vector<8x1xf32>
    %cst_134 = arith.constant 3.200000e+01 : f32
    %251 = vector.broadcast %cst_134 : f32 to vector<8x1xf32>
    %252 = arith.divf %250, %251 : vector<8x1xf32>
    %253 = vector.broadcast %245 : vector<8x1xf32> to vector<8x32xf32>
    %254 = arith.subf %237, %253 : vector<8x32xf32>
    %cst_135 = arith.constant 9.99999974E-6 : f32
    %255 = vector.broadcast %cst_135 : f32 to vector<8x1xf32>
    %256 = arith.addf %252, %255 : vector<8x1xf32>
    %257 = math.rsqrt %256 : vector<8x1xf32>
    %258 = vector.broadcast %257 : vector<8x1xf32> to vector<8x32xf32>
    %259 = arith.mulf %254, %258 : vector<8x32xf32>
    %260 = vector.shape_cast %239 : vector<32xf32> to vector<1x32xf32>
    %261 = vector.broadcast %260 : vector<1x32xf32> to vector<8x32xf32>
    %262 = arith.mulf %259, %261 : vector<8x32xf32>
    %263 = vector.shape_cast %241 : vector<32xf32> to vector<1x32xf32>
    %264 = vector.broadcast %263 : vector<1x32xf32> to vector<8x32xf32>
    %265 = arith.addf %262, %264 : vector<8x32xf32>
    %266 = arith.truncf %265 : vector<8x32xf32> to vector<8x32xbf16>
    %cst_136 = arith.constant 0.000000e+00 : f32
    %267 = vector.broadcast %cst_136 : f32 to vector<8x32xf32>
    %c0_137 = arith.constant 0 : index
    %c0_138 = arith.constant 0 : index
    %268 = vector.load %arg14[%c0_137, %c0_138] : memref<3x32xf32, #tpu.memory_space<vmem>>, vector<1x32xf32>
    %269 = vector.shape_cast %268 : vector<1x32xf32> to vector<32xf32>
    %270 = vector.shape_cast %269 : vector<32xf32> to vector<1x32xf32>
    %271 = vector.broadcast %270 : vector<1x32xf32> to vector<8x32xf32>
    %272 = arith.addf %267, %271 : vector<8x32xf32>
    %c0_139 = arith.constant 0 : index
    %c0_140 = arith.constant 0 : index
    %c0_141 = arith.constant 0 : index
    %273 = vector.load %arg11[%c0_139, %c0_140, %c0_141] : memref<36x32x8xbf16, #tpu.memory_space<vmem>>, vector<1x32x8xbf16>
    %274 = vector.shape_cast %273 : vector<1x32x8xbf16> to vector<32x8xbf16>
    %cst_142 = arith.constant dense<0.000000e+00> : vector<8x8xf32>
    %275 = tpu.matmul %266, %274, %cst_142 {dimension_numbers = #tpu.dot_dimension_numbers<[1], [0], [0], [1], [0, 0, 1, 1], [], []>} : vector<8x32xbf16>, vector<32x8xbf16>, vector<8x8xf32> -> vector<8x8xf32>
    %c0_143 = arith.constant 0 : index
    %c0_144 = arith.constant 0 : index
    %c0_145 = arith.constant 0 : index
    %276 = vector.load %arg12[%c0_143, %c0_144, %c0_145] : memref<36x1x8xf32, #tpu.memory_space<vmem>>, vector<1x1x8xf32>
    %277 = vector.shape_cast %276 : vector<1x1x8xf32> to vector<1x8xf32>
    %278 = vector.broadcast %277 : vector<1x8xf32> to vector<8x8xf32>
    %279 = arith.addf %275, %278 : vector<8x8xf32>
    %280 = arith.truncf %279 : vector<8x8xf32> to vector<8x8xbf16>
    %c4_146 = arith.constant 4 : index
    %c0_147 = arith.constant 0 : index
    %c0_148 = arith.constant 0 : index
    %281 = vector.load %arg11[%c4_146, %c0_147, %c0_148] : memref<36x32x8xbf16, #tpu.memory_space<vmem>>, vector<1x32x8xbf16>
    %282 = vector.shape_cast %281 : vector<1x32x8xbf16> to vector<32x8xbf16>
    %cst_149 = arith.constant dense<0.000000e+00> : vector<8x8xf32>
    %283 = tpu.matmul %2, %282, %cst_149 {dimension_numbers = #tpu.dot_dimension_numbers<[1], [0], [0], [1], [0, 0, 1, 1], [], []>} : vector<8x32xbf16>, vector<32x8xbf16>, vector<8x8xf32> -> vector<8x8xf32>
    %c4_150 = arith.constant 4 : index
    %c0_151 = arith.constant 0 : index
    %c0_152 = arith.constant 0 : index
    %284 = vector.load %arg12[%c4_150, %c0_151, %c0_152] : memref<36x1x8xf32, #tpu.memory_space<vmem>>, vector<1x1x8xf32>
    %285 = vector.shape_cast %284 : vector<1x1x8xf32> to vector<1x8xf32>
    %286 = vector.broadcast %285 : vector<1x8xf32> to vector<8x8xf32>
    %287 = arith.addf %283, %286 : vector<8x8xf32>
    %288 = arith.truncf %287 : vector<8x8xf32> to vector<8x8xbf16>
    %c8_153 = arith.constant 8 : index
    %c0_154 = arith.constant 0 : index
    %c0_155 = arith.constant 0 : index
    %289 = vector.load %arg11[%c8_153, %c0_154, %c0_155] : memref<36x32x8xbf16, #tpu.memory_space<vmem>>, vector<1x32x8xbf16>
    %290 = vector.shape_cast %289 : vector<1x32x8xbf16> to vector<32x8xbf16>
    %cst_156 = arith.constant dense<0.000000e+00> : vector<8x8xf32>
    %291 = tpu.matmul %2, %290, %cst_156 {dimension_numbers = #tpu.dot_dimension_numbers<[1], [0], [0], [1], [0, 0, 1, 1], [], []>} : vector<8x32xbf16>, vector<32x8xbf16>, vector<8x8xf32> -> vector<8x8xf32>
    %c8_157 = arith.constant 8 : index
    %c0_158 = arith.constant 0 : index
    %c0_159 = arith.constant 0 : index
    %292 = vector.load %arg12[%c8_157, %c0_158, %c0_159] : memref<36x1x8xf32, #tpu.memory_space<vmem>>, vector<1x1x8xf32>
    %293 = vector.shape_cast %292 : vector<1x1x8xf32> to vector<1x8xf32>
    %294 = vector.broadcast %293 : vector<1x8xf32> to vector<8x8xf32>
    %295 = arith.addf %291, %294 : vector<8x8xf32>
    %296 = arith.truncf %295 : vector<8x8xf32> to vector<8x8xbf16>
    %297 = vector.shape_cast %280 : vector<8x8xbf16> to vector<1x8x8xbf16>
    %298 = vector.shape_cast %288 : vector<8x8xbf16> to vector<1x8x8xbf16>
    "tpu.trace_start"() <{level = 10 : i32, message = "bqd,bkd->bqk"}> : () -> ()
    %cst_160 = arith.constant dense<0.000000e+00> : vector<1x8x8xf32>
    %299 = tpu.matmul %297, %298, %cst_160 {dimension_numbers = #tpu.dot_dimension_numbers<[2], [2], [1], [1], [0, 0, 0, 1, 1, 1], [0], [0]>} : vector<1x8x8xbf16>, vector<1x8x8xbf16>, vector<1x8x8xf32> -> vector<1x8x8xf32>
    "tpu.trace_stop"() : () -> ()
    %300 = vector.broadcast %13 : vector<1x1x8xf32> to vector<1x8x8xf32>
    %301 = arith.addf %299, %300 : vector<1x8x8xf32>
    %cst_161 = arith.constant dense<0xFF800000> : vector<1x8xf32>
    %302 = vector.multi_reduction <maximumf>, %301, %cst_161 [2] : vector<1x8x8xf32> to vector<1x8xf32>
    %303 = vector.shape_cast %302 : vector<1x8xf32> to vector<1x8x1xf32>
    %304 = vector.broadcast %303 : vector<1x8x1xf32> to vector<1x8x8xf32>
    %305 = arith.subf %301, %304 : vector<1x8x8xf32>
    %306 = math.exp %305 : vector<1x8x8xf32>
    %cst_162 = arith.constant dense<0.000000e+00> : vector<1x8xf32>
    %307 = vector.multi_reduction <add>, %306, %cst_162 [2] : vector<1x8x8xf32> to vector<1x8xf32>
    %308 = vector.shape_cast %307 : vector<1x8xf32> to vector<1x8x1xf32>
    %309 = tpu.reciprocal %308 {approx = true} : vector<1x8x1xf32> -> vector<1x8x1xf32>
    %310 = vector.broadcast %309 : vector<1x8x1xf32> to vector<1x8x8xf32>
    %311 = arith.mulf %306, %310 : vector<1x8x8xf32>
    %312 = arith.truncf %311 : vector<1x8x8xf32> to vector<1x8x8xbf16>
    %313 = vector.shape_cast %296 : vector<8x8xbf16> to vector<1x8x8xbf16>
    "tpu.trace_start"() <{level = 10 : i32, message = "bqk,bkd->bqd"}> : () -> ()
    %cst_163 = arith.constant dense<0.000000e+00> : vector<1x8x8xf32>
    %314 = tpu.matmul %312, %313, %cst_163 {dimension_numbers = #tpu.dot_dimension_numbers<[2], [1], [1], [2], [0, 0, 0, 1, 1, 2], [0], [0]>} : vector<1x8x8xbf16>, vector<1x8x8xbf16>, vector<1x8x8xf32> -> vector<1x8x8xf32>
    "tpu.trace_stop"() : () -> ()
    %315 = vector.shape_cast %314 : vector<1x8x8xf32> to vector<8x8xf32>
    %316 = arith.truncf %315 : vector<8x8xf32> to vector<8x8xbf16>
    %c0_164 = arith.constant 0 : index
    %c0_165 = arith.constant 0 : index
    %c0_166 = arith.constant 0 : index
    %317 = vector.load %arg13[%c0_164, %c0_165, %c0_166] : memref<12x8x32xbf16, #tpu.memory_space<vmem>>, vector<1x8x32xbf16>
    %318 = vector.shape_cast %317 : vector<1x8x32xbf16> to vector<8x32xbf16>
    %cst_167 = arith.constant dense<0.000000e+00> : vector<8x32xf32>
    %319 = tpu.matmul %316, %318, %cst_167 {dimension_numbers = #tpu.dot_dimension_numbers<[1], [0], [0], [1], [0, 0, 1, 1], [], []>} : vector<8x8xbf16>, vector<8x32xbf16>, vector<8x32xf32> -> vector<8x32xf32>
    %320 = arith.addf %272, %319 : vector<8x32xf32>
    %c1_168 = arith.constant 1 : index
    %c0_169 = arith.constant 0 : index
    %c0_170 = arith.constant 0 : index
    %321 = vector.load %arg11[%c1_168, %c0_169, %c0_170] : memref<36x32x8xbf16, #tpu.memory_space<vmem>>, vector<1x32x8xbf16>
    %322 = vector.shape_cast %321 : vector<1x32x8xbf16> to vector<32x8xbf16>
    %cst_171 = arith.constant dense<0.000000e+00> : vector<8x8xf32>
    %323 = tpu.matmul %266, %322, %cst_171 {dimension_numbers = #tpu.dot_dimension_numbers<[1], [0], [0], [1], [0, 0, 1, 1], [], []>} : vector<8x32xbf16>, vector<32x8xbf16>, vector<8x8xf32> -> vector<8x8xf32>
    %c1_172 = arith.constant 1 : index
    %c0_173 = arith.constant 0 : index
    %c0_174 = arith.constant 0 : index
    %324 = vector.load %arg12[%c1_172, %c0_173, %c0_174] : memref<36x1x8xf32, #tpu.memory_space<vmem>>, vector<1x1x8xf32>
    %325 = vector.shape_cast %324 : vector<1x1x8xf32> to vector<1x8xf32>
    %326 = vector.broadcast %325 : vector<1x8xf32> to vector<8x8xf32>
    %327 = arith.addf %323, %326 : vector<8x8xf32>
    %328 = arith.truncf %327 : vector<8x8xf32> to vector<8x8xbf16>
    %c5_175 = arith.constant 5 : index
    %c0_176 = arith.constant 0 : index
    %c0_177 = arith.constant 0 : index
    %329 = vector.load %arg11[%c5_175, %c0_176, %c0_177] : memref<36x32x8xbf16, #tpu.memory_space<vmem>>, vector<1x32x8xbf16>
    %330 = vector.shape_cast %329 : vector<1x32x8xbf16> to vector<32x8xbf16>
    %cst_178 = arith.constant dense<0.000000e+00> : vector<8x8xf32>
    %331 = tpu.matmul %2, %330, %cst_178 {dimension_numbers = #tpu.dot_dimension_numbers<[1], [0], [0], [1], [0, 0, 1, 1], [], []>} : vector<8x32xbf16>, vector<32x8xbf16>, vector<8x8xf32> -> vector<8x8xf32>
    %c5_179 = arith.constant 5 : index
    %c0_180 = arith.constant 0 : index
    %c0_181 = arith.constant 0 : index
    %332 = vector.load %arg12[%c5_179, %c0_180, %c0_181] : memref<36x1x8xf32, #tpu.memory_space<vmem>>, vector<1x1x8xf32>
    %333 = vector.shape_cast %332 : vector<1x1x8xf32> to vector<1x8xf32>
    %334 = vector.broadcast %333 : vector<1x8xf32> to vector<8x8xf32>
    %335 = arith.addf %331, %334 : vector<8x8xf32>
    %336 = arith.truncf %335 : vector<8x8xf32> to vector<8x8xbf16>
    %c9_182 = arith.constant 9 : index
    %c0_183 = arith.constant 0 : index
    %c0_184 = arith.constant 0 : index
    %337 = vector.load %arg11[%c9_182, %c0_183, %c0_184] : memref<36x32x8xbf16, #tpu.memory_space<vmem>>, vector<1x32x8xbf16>
    %338 = vector.shape_cast %337 : vector<1x32x8xbf16> to vector<32x8xbf16>
    %cst_185 = arith.constant dense<0.000000e+00> : vector<8x8xf32>
    %339 = tpu.matmul %2, %338, %cst_185 {dimension_numbers = #tpu.dot_dimension_numbers<[1], [0], [0], [1], [0, 0, 1, 1], [], []>} : vector<8x32xbf16>, vector<32x8xbf16>, vector<8x8xf32> -> vector<8x8xf32>
    %c9_186 = arith.constant 9 : index
    %c0_187 = arith.constant 0 : index
    %c0_188 = arith.constant 0 : index
    %340 = vector.load %arg12[%c9_186, %c0_187, %c0_188] : memref<36x1x8xf32, #tpu.memory_space<vmem>>, vector<1x1x8xf32>
    %341 = vector.shape_cast %340 : vector<1x1x8xf32> to vector<1x8xf32>
    %342 = vector.broadcast %341 : vector<1x8xf32> to vector<8x8xf32>
    %343 = arith.addf %339, %342 : vector<8x8xf32>
    %344 = arith.truncf %343 : vector<8x8xf32> to vector<8x8xbf16>
    %345 = vector.shape_cast %328 : vector<8x8xbf16> to vector<1x8x8xbf16>
    %346 = vector.shape_cast %336 : vector<8x8xbf16> to vector<1x8x8xbf16>
    "tpu.trace_start"() <{level = 10 : i32, message = "bqd,bkd->bqk"}> : () -> ()
    %cst_189 = arith.constant dense<0.000000e+00> : vector<1x8x8xf32>
    %347 = tpu.matmul %345, %346, %cst_189 {dimension_numbers = #tpu.dot_dimension_numbers<[2], [2], [1], [1], [0, 0, 0, 1, 1, 1], [0], [0]>} : vector<1x8x8xbf16>, vector<1x8x8xbf16>, vector<1x8x8xf32> -> vector<1x8x8xf32>
    "tpu.trace_stop"() : () -> ()
    %348 = vector.broadcast %13 : vector<1x1x8xf32> to vector<1x8x8xf32>
    %349 = arith.addf %347, %348 : vector<1x8x8xf32>
    %cst_190 = arith.constant dense<0xFF800000> : vector<1x8xf32>
    %350 = vector.multi_reduction <maximumf>, %349, %cst_190 [2] : vector<1x8x8xf32> to vector<1x8xf32>
    %351 = vector.shape_cast %350 : vector<1x8xf32> to vector<1x8x1xf32>
    %352 = vector.broadcast %351 : vector<1x8x1xf32> to vector<1x8x8xf32>
    %353 = arith.subf %349, %352 : vector<1x8x8xf32>
    %354 = math.exp %353 : vector<1x8x8xf32>
    %cst_191 = arith.constant dense<0.000000e+00> : vector<1x8xf32>
    %355 = vector.multi_reduction <add>, %354, %cst_191 [2] : vector<1x8x8xf32> to vector<1x8xf32>
    %356 = vector.shape_cast %355 : vector<1x8xf32> to vector<1x8x1xf32>
    %357 = tpu.reciprocal %356 {approx = true} : vector<1x8x1xf32> -> vector<1x8x1xf32>
    %358 = vector.broadcast %357 : vector<1x8x1xf32> to vector<1x8x8xf32>
    %359 = arith.mulf %354, %358 : vector<1x8x8xf32>
    %360 = arith.truncf %359 : vector<1x8x8xf32> to vector<1x8x8xbf16>
    %361 = vector.shape_cast %344 : vector<8x8xbf16> to vector<1x8x8xbf16>
    "tpu.trace_start"() <{level = 10 : i32, message = "bqk,bkd->bqd"}> : () -> ()
    %cst_192 = arith.constant dense<0.000000e+00> : vector<1x8x8xf32>
    %362 = tpu.matmul %360, %361, %cst_192 {dimension_numbers = #tpu.dot_dimension_numbers<[2], [1], [1], [2], [0, 0, 0, 1, 1, 2], [0], [0]>} : vector<1x8x8xbf16>, vector<1x8x8xbf16>, vector<1x8x8xf32> -> vector<1x8x8xf32>
    "tpu.trace_stop"() : () -> ()
    %363 = vector.shape_cast %362 : vector<1x8x8xf32> to vector<8x8xf32>
    %364 = arith.truncf %363 : vector<8x8xf32> to vector<8x8xbf16>
    %c1_193 = arith.constant 1 : index
    %c0_194 = arith.constant 0 : index
    %c0_195 = arith.constant 0 : index
    %365 = vector.load %arg13[%c1_193, %c0_194, %c0_195] : memref<12x8x32xbf16, #tpu.memory_space<vmem>>, vector<1x8x32xbf16>
    %366 = vector.shape_cast %365 : vector<1x8x32xbf16> to vector<8x32xbf16>
    %cst_196 = arith.constant dense<0.000000e+00> : vector<8x32xf32>
    %367 = tpu.matmul %364, %366, %cst_196 {dimension_numbers = #tpu.dot_dimension_numbers<[1], [0], [0], [1], [0, 0, 1, 1], [], []>} : vector<8x8xbf16>, vector<8x32xbf16>, vector<8x32xf32> -> vector<8x32xf32>
    %368 = arith.addf %320, %367 : vector<8x32xf32>
    %c2_197 = arith.constant 2 : index
    %c0_198 = arith.constant 0 : index
    %c0_199 = arith.constant 0 : index
    %369 = vector.load %arg11[%c2_197, %c0_198, %c0_199] : memref<36x32x8xbf16, #tpu.memory_space<vmem>>, vector<1x32x8xbf16>
    %370 = vector.shape_cast %369 : vector<1x32x8xbf16> to vector<32x8xbf16>
    %cst_200 = arith.constant dense<0.000000e+00> : vector<8x8xf32>
    %371 = tpu.matmul %266, %370, %cst_200 {dimension_numbers = #tpu.dot_dimension_numbers<[1], [0], [0], [1], [0, 0, 1, 1], [], []>} : vector<8x32xbf16>, vector<32x8xbf16>, vector<8x8xf32> -> vector<8x8xf32>
    %c2_201 = arith.constant 2 : index
    %c0_202 = arith.constant 0 : index
    %c0_203 = arith.constant 0 : index
    %372 = vector.load %arg12[%c2_201, %c0_202, %c0_203] : memref<36x1x8xf32, #tpu.memory_space<vmem>>, vector<1x1x8xf32>
    %373 = vector.shape_cast %372 : vector<1x1x8xf32> to vector<1x8xf32>
    %374 = vector.broadcast %373 : vector<1x8xf32> to vector<8x8xf32>
    %375 = arith.addf %371, %374 : vector<8x8xf32>
    %376 = arith.truncf %375 : vector<8x8xf32> to vector<8x8xbf16>
    %c6_204 = arith.constant 6 : index
    %c0_205 = arith.constant 0 : index
    %c0_206 = arith.constant 0 : index
    %377 = vector.load %arg11[%c6_204, %c0_205, %c0_206] : memref<36x32x8xbf16, #tpu.memory_space<vmem>>, vector<1x32x8xbf16>
    %378 = vector.shape_cast %377 : vector<1x32x8xbf16> to vector<32x8xbf16>
    %cst_207 = arith.constant dense<0.000000e+00> : vector<8x8xf32>
    %379 = tpu.matmul %2, %378, %cst_207 {dimension_numbers = #tpu.dot_dimension_numbers<[1], [0], [0], [1], [0, 0, 1, 1], [], []>} : vector<8x32xbf16>, vector<32x8xbf16>, vector<8x8xf32> -> vector<8x8xf32>
    %c6_208 = arith.constant 6 : index
    %c0_209 = arith.constant 0 : index
    %c0_210 = arith.constant 0 : index
    %380 = vector.load %arg12[%c6_208, %c0_209, %c0_210] : memref<36x1x8xf32, #tpu.memory_space<vmem>>, vector<1x1x8xf32>
    %381 = vector.shape_cast %380 : vector<1x1x8xf32> to vector<1x8xf32>
    %382 = vector.broadcast %381 : vector<1x8xf32> to vector<8x8xf32>
    %383 = arith.addf %379, %382 : vector<8x8xf32>
    %384 = arith.truncf %383 : vector<8x8xf32> to vector<8x8xbf16>
    %c10_211 = arith.constant 10 : index
    %c0_212 = arith.constant 0 : index
    %c0_213 = arith.constant 0 : index
    %385 = vector.load %arg11[%c10_211, %c0_212, %c0_213] : memref<36x32x8xbf16, #tpu.memory_space<vmem>>, vector<1x32x8xbf16>
    %386 = vector.shape_cast %385 : vector<1x32x8xbf16> to vector<32x8xbf16>
    %cst_214 = arith.constant dense<0.000000e+00> : vector<8x8xf32>
    %387 = tpu.matmul %2, %386, %cst_214 {dimension_numbers = #tpu.dot_dimension_numbers<[1], [0], [0], [1], [0, 0, 1, 1], [], []>} : vector<8x32xbf16>, vector<32x8xbf16>, vector<8x8xf32> -> vector<8x8xf32>
    %c10_215 = arith.constant 10 : index
    %c0_216 = arith.constant 0 : index
    %c0_217 = arith.constant 0 : index
    %388 = vector.load %arg12[%c10_215, %c0_216, %c0_217] : memref<36x1x8xf32, #tpu.memory_space<vmem>>, vector<1x1x8xf32>
    %389 = vector.shape_cast %388 : vector<1x1x8xf32> to vector<1x8xf32>
    %390 = vector.broadcast %389 : vector<1x8xf32> to vector<8x8xf32>
    %391 = arith.addf %387, %390 : vector<8x8xf32>
    %392 = arith.truncf %391 : vector<8x8xf32> to vector<8x8xbf16>
    %393 = vector.shape_cast %376 : vector<8x8xbf16> to vector<1x8x8xbf16>
    %394 = vector.shape_cast %384 : vector<8x8xbf16> to vector<1x8x8xbf16>
    "tpu.trace_start"() <{level = 10 : i32, message = "bqd,bkd->bqk"}> : () -> ()
    %cst_218 = arith.constant dense<0.000000e+00> : vector<1x8x8xf32>
    %395 = tpu.matmul %393, %394, %cst_218 {dimension_numbers = #tpu.dot_dimension_numbers<[2], [2], [1], [1], [0, 0, 0, 1, 1, 1], [0], [0]>} : vector<1x8x8xbf16>, vector<1x8x8xbf16>, vector<1x8x8xf32> -> vector<1x8x8xf32>
    "tpu.trace_stop"() : () -> ()
    %396 = vector.broadcast %13 : vector<1x1x8xf32> to vector<1x8x8xf32>
    %397 = arith.addf %395, %396 : vector<1x8x8xf32>
    %cst_219 = arith.constant dense<0xFF800000> : vector<1x8xf32>
    %398 = vector.multi_reduction <maximumf>, %397, %cst_219 [2] : vector<1x8x8xf32> to vector<1x8xf32>
    %399 = vector.shape_cast %398 : vector<1x8xf32> to vector<1x8x1xf32>
    %400 = vector.broadcast %399 : vector<1x8x1xf32> to vector<1x8x8xf32>
    %401 = arith.subf %397, %400 : vector<1x8x8xf32>
    %402 = math.exp %401 : vector<1x8x8xf32>
    %cst_220 = arith.constant dense<0.000000e+00> : vector<1x8xf32>
    %403 = vector.multi_reduction <add>, %402, %cst_220 [2] : vector<1x8x8xf32> to vector<1x8xf32>
    %404 = vector.shape_cast %403 : vector<1x8xf32> to vector<1x8x1xf32>
    %405 = tpu.reciprocal %404 {approx = true} : vector<1x8x1xf32> -> vector<1x8x1xf32>
    %406 = vector.broadcast %405 : vector<1x8x1xf32> to vector<1x8x8xf32>
    %407 = arith.mulf %402, %406 : vector<1x8x8xf32>
    %408 = arith.truncf %407 : vector<1x8x8xf32> to vector<1x8x8xbf16>
    %409 = vector.shape_cast %392 : vector<8x8xbf16> to vector<1x8x8xbf16>
    "tpu.trace_start"() <{level = 10 : i32, message = "bqk,bkd->bqd"}> : () -> ()
    %cst_221 = arith.constant dense<0.000000e+00> : vector<1x8x8xf32>
    %410 = tpu.matmul %408, %409, %cst_221 {dimension_numbers = #tpu.dot_dimension_numbers<[2], [1], [1], [2], [0, 0, 0, 1, 1, 2], [0], [0]>} : vector<1x8x8xbf16>, vector<1x8x8xbf16>, vector<1x8x8xf32> -> vector<1x8x8xf32>
    "tpu.trace_stop"() : () -> ()
    %411 = vector.shape_cast %410 : vector<1x8x8xf32> to vector<8x8xf32>
    %412 = arith.truncf %411 : vector<8x8xf32> to vector<8x8xbf16>
    %c2_222 = arith.constant 2 : index
    %c0_223 = arith.constant 0 : index
    %c0_224 = arith.constant 0 : index
    %413 = vector.load %arg13[%c2_222, %c0_223, %c0_224] : memref<12x8x32xbf16, #tpu.memory_space<vmem>>, vector<1x8x32xbf16>
    %414 = vector.shape_cast %413 : vector<1x8x32xbf16> to vector<8x32xbf16>
    %cst_225 = arith.constant dense<0.000000e+00> : vector<8x32xf32>
    %415 = tpu.matmul %412, %414, %cst_225 {dimension_numbers = #tpu.dot_dimension_numbers<[1], [0], [0], [1], [0, 0, 1, 1], [], []>} : vector<8x8xbf16>, vector<8x32xbf16>, vector<8x32xf32> -> vector<8x32xf32>
    %416 = arith.addf %368, %415 : vector<8x32xf32>
    %c3_226 = arith.constant 3 : index
    %c0_227 = arith.constant 0 : index
    %c0_228 = arith.constant 0 : index
    %417 = vector.load %arg11[%c3_226, %c0_227, %c0_228] : memref<36x32x8xbf16, #tpu.memory_space<vmem>>, vector<1x32x8xbf16>
    %418 = vector.shape_cast %417 : vector<1x32x8xbf16> to vector<32x8xbf16>
    %cst_229 = arith.constant dense<0.000000e+00> : vector<8x8xf32>
    %419 = tpu.matmul %266, %418, %cst_229 {dimension_numbers = #tpu.dot_dimension_numbers<[1], [0], [0], [1], [0, 0, 1, 1], [], []>} : vector<8x32xbf16>, vector<32x8xbf16>, vector<8x8xf32> -> vector<8x8xf32>
    %c3_230 = arith.constant 3 : index
    %c0_231 = arith.constant 0 : index
    %c0_232 = arith.constant 0 : index
    %420 = vector.load %arg12[%c3_230, %c0_231, %c0_232] : memref<36x1x8xf32, #tpu.memory_space<vmem>>, vector<1x1x8xf32>
    %421 = vector.shape_cast %420 : vector<1x1x8xf32> to vector<1x8xf32>
    %422 = vector.broadcast %421 : vector<1x8xf32> to vector<8x8xf32>
    %423 = arith.addf %419, %422 : vector<8x8xf32>
    %424 = arith.truncf %423 : vector<8x8xf32> to vector<8x8xbf16>
    %c7_233 = arith.constant 7 : index
    %c0_234 = arith.constant 0 : index
    %c0_235 = arith.constant 0 : index
    %425 = vector.load %arg11[%c7_233, %c0_234, %c0_235] : memref<36x32x8xbf16, #tpu.memory_space<vmem>>, vector<1x32x8xbf16>
    %426 = vector.shape_cast %425 : vector<1x32x8xbf16> to vector<32x8xbf16>
    %cst_236 = arith.constant dense<0.000000e+00> : vector<8x8xf32>
    %427 = tpu.matmul %2, %426, %cst_236 {dimension_numbers = #tpu.dot_dimension_numbers<[1], [0], [0], [1], [0, 0, 1, 1], [], []>} : vector<8x32xbf16>, vector<32x8xbf16>, vector<8x8xf32> -> vector<8x8xf32>
    %c7_237 = arith.constant 7 : index
    %c0_238 = arith.constant 0 : index
    %c0_239 = arith.constant 0 : index
    %428 = vector.load %arg12[%c7_237, %c0_238, %c0_239] : memref<36x1x8xf32, #tpu.memory_space<vmem>>, vector<1x1x8xf32>
    %429 = vector.shape_cast %428 : vector<1x1x8xf32> to vector<1x8xf32>
    %430 = vector.broadcast %429 : vector<1x8xf32> to vector<8x8xf32>
    %431 = arith.addf %427, %430 : vector<8x8xf32>
    %432 = arith.truncf %431 : vector<8x8xf32> to vector<8x8xbf16>
    %c11_240 = arith.constant 11 : index
    %c0_241 = arith.constant 0 : index
    %c0_242 = arith.constant 0 : index
    %433 = vector.load %arg11[%c11_240, %c0_241, %c0_242] : memref<36x32x8xbf16, #tpu.memory_space<vmem>>, vector<1x32x8xbf16>
    %434 = vector.shape_cast %433 : vector<1x32x8xbf16> to vector<32x8xbf16>
    %cst_243 = arith.constant dense<0.000000e+00> : vector<8x8xf32>
    %435 = tpu.matmul %2, %434, %cst_243 {dimension_numbers = #tpu.dot_dimension_numbers<[1], [0], [0], [1], [0, 0, 1, 1], [], []>} : vector<8x32xbf16>, vector<32x8xbf16>, vector<8x8xf32> -> vector<8x8xf32>
    %c11_244 = arith.constant 11 : index
    %c0_245 = arith.constant 0 : index
    %c0_246 = arith.constant 0 : index
    %436 = vector.load %arg12[%c11_244, %c0_245, %c0_246] : memref<36x1x8xf32, #tpu.memory_space<vmem>>, vector<1x1x8xf32>
    %437 = vector.shape_cast %436 : vector<1x1x8xf32> to vector<1x8xf32>
    %438 = vector.broadcast %437 : vector<1x8xf32> to vector<8x8xf32>
    %439 = arith.addf %435, %438 : vector<8x8xf32>
    %440 = arith.truncf %439 : vector<8x8xf32> to vector<8x8xbf16>
    %441 = vector.shape_cast %424 : vector<8x8xbf16> to vector<1x8x8xbf16>
    %442 = vector.shape_cast %432 : vector<8x8xbf16> to vector<1x8x8xbf16>
    "tpu.trace_start"() <{level = 10 : i32, message = "bqd,bkd->bqk"}> : () -> ()
    %cst_247 = arith.constant dense<0.000000e+00> : vector<1x8x8xf32>
    %443 = tpu.matmul %441, %442, %cst_247 {dimension_numbers = #tpu.dot_dimension_numbers<[2], [2], [1], [1], [0, 0, 0, 1, 1, 1], [0], [0]>} : vector<1x8x8xbf16>, vector<1x8x8xbf16>, vector<1x8x8xf32> -> vector<1x8x8xf32>
    "tpu.trace_stop"() : () -> ()
    %444 = vector.broadcast %13 : vector<1x1x8xf32> to vector<1x8x8xf32>
    %445 = arith.addf %443, %444 : vector<1x8x8xf32>
    %cst_248 = arith.constant dense<0xFF800000> : vector<1x8xf32>
    %446 = vector.multi_reduction <maximumf>, %445, %cst_248 [2] : vector<1x8x8xf32> to vector<1x8xf32>
    %447 = vector.shape_cast %446 : vector<1x8xf32> to vector<1x8x1xf32>
    %448 = vector.broadcast %447 : vector<1x8x1xf32> to vector<1x8x8xf32>
    %449 = arith.subf %445, %448 : vector<1x8x8xf32>
    %450 = math.exp %449 : vector<1x8x8xf32>
    %cst_249 = arith.constant dense<0.000000e+00> : vector<1x8xf32>
    %451 = vector.multi_reduction <add>, %450, %cst_249 [2] : vector<1x8x8xf32> to vector<1x8xf32>
    %452 = vector.shape_cast %451 : vector<1x8xf32> to vector<1x8x1xf32>
    %453 = tpu.reciprocal %452 {approx = true} : vector<1x8x1xf32> -> vector<1x8x1xf32>
    %454 = vector.broadcast %453 : vector<1x8x1xf32> to vector<1x8x8xf32>
    %455 = arith.mulf %450, %454 : vector<1x8x8xf32>
    %456 = arith.truncf %455 : vector<1x8x8xf32> to vector<1x8x8xbf16>
    %457 = vector.shape_cast %440 : vector<8x8xbf16> to vector<1x8x8xbf16>
    "tpu.trace_start"() <{level = 10 : i32, message = "bqk,bkd->bqd"}> : () -> ()
    %cst_250 = arith.constant dense<0.000000e+00> : vector<1x8x8xf32>
    %458 = tpu.matmul %456, %457, %cst_250 {dimension_numbers = #tpu.dot_dimension_numbers<[2], [1], [1], [2], [0, 0, 0, 1, 1, 2], [0], [0]>} : vector<1x8x8xbf16>, vector<1x8x8xbf16>, vector<1x8x8xf32> -> vector<1x8x8xf32>
    "tpu.trace_stop"() : () -> ()
    %459 = vector.shape_cast %458 : vector<1x8x8xf32> to vector<8x8xf32>
    %460 = arith.truncf %459 : vector<8x8xf32> to vector<8x8xbf16>
    %c3_251 = arith.constant 3 : index
    %c0_252 = arith.constant 0 : index
    %c0_253 = arith.constant 0 : index
    %461 = vector.load %arg13[%c3_251, %c0_252, %c0_253] : memref<12x8x32xbf16, #tpu.memory_space<vmem>>, vector<1x8x32xbf16>
    %462 = vector.shape_cast %461 : vector<1x8x32xbf16> to vector<8x32xbf16>
    %cst_254 = arith.constant dense<0.000000e+00> : vector<8x32xf32>
    %463 = tpu.matmul %460, %462, %cst_254 {dimension_numbers = #tpu.dot_dimension_numbers<[1], [0], [0], [1], [0, 0, 1, 1], [], []>} : vector<8x8xbf16>, vector<8x32xbf16>, vector<8x32xf32> -> vector<8x32xf32>
    %464 = arith.addf %416, %463 : vector<8x32xf32>
    %c2_255 = arith.constant 2 : index
    %c0_256 = arith.constant 0 : index
    %465 = vector.load %arg5[%c2_255, %c0_256] : memref<6x32xf32, #tpu.memory_space<vmem>>, vector<1x32xf32>
    %466 = vector.shape_cast %465 : vector<1x32xf32> to vector<32xf32>
    %c2_257 = arith.constant 2 : index
    %c0_258 = arith.constant 0 : index
    %467 = vector.load %arg6[%c2_257, %c0_258] : memref<6x32xf32, #tpu.memory_space<vmem>>, vector<1x32xf32>
    %468 = vector.shape_cast %467 : vector<1x32xf32> to vector<32xf32>
    %cst_259 = arith.constant dense<0.000000e+00> : vector<8xf32>
    %469 = vector.multi_reduction <add>, %464, %cst_259 [1] : vector<8x32xf32> to vector<8xf32>
    %470 = vector.shape_cast %469 : vector<8xf32> to vector<8x1xf32>
    %cst_260 = arith.constant 3.200000e+01 : f32
    %471 = vector.broadcast %cst_260 : f32 to vector<8x1xf32>
    %472 = arith.divf %470, %471 : vector<8x1xf32>
    %473 = vector.broadcast %472 : vector<8x1xf32> to vector<8x32xf32>
    %474 = arith.subf %464, %473 : vector<8x32xf32>
    %475 = arith.mulf %474, %474 : vector<8x32xf32>
    %cst_261 = arith.constant dense<0.000000e+00> : vector<8xf32>
    %476 = vector.multi_reduction <add>, %475, %cst_261 [1] : vector<8x32xf32> to vector<8xf32>
    %477 = vector.shape_cast %476 : vector<8xf32> to vector<8x1xf32>
    %cst_262 = arith.constant 3.200000e+01 : f32
    %478 = vector.broadcast %cst_262 : f32 to vector<8x1xf32>
    %479 = arith.divf %477, %478 : vector<8x1xf32>
    %480 = vector.broadcast %472 : vector<8x1xf32> to vector<8x32xf32>
    %481 = arith.subf %464, %480 : vector<8x32xf32>
    %cst_263 = arith.constant 9.99999974E-6 : f32
    %482 = vector.broadcast %cst_263 : f32 to vector<8x1xf32>
    %483 = arith.addf %479, %482 : vector<8x1xf32>
    %484 = math.rsqrt %483 : vector<8x1xf32>
    %485 = vector.broadcast %484 : vector<8x1xf32> to vector<8x32xf32>
    %486 = arith.mulf %481, %485 : vector<8x32xf32>
    %487 = vector.shape_cast %466 : vector<32xf32> to vector<1x32xf32>
    %488 = vector.broadcast %487 : vector<1x32xf32> to vector<8x32xf32>
    %489 = arith.mulf %486, %488 : vector<8x32xf32>
    %490 = vector.shape_cast %468 : vector<32xf32> to vector<1x32xf32>
    %491 = vector.broadcast %490 : vector<1x32xf32> to vector<8x32xf32>
    %492 = arith.addf %489, %491 : vector<8x32xf32>
    %493 = arith.truncf %492 : vector<8x32xf32> to vector<8x32xbf16>
    %cst_264 = arith.constant 0.000000e+00 : f32
    %494 = vector.broadcast %cst_264 : f32 to vector<8x32xf32>
    %c1_265 = arith.constant 1 : index
    %c0_266 = arith.constant 0 : index
    %495 = vector.load %arg14[%c1_265, %c0_266] : memref<3x32xf32, #tpu.memory_space<vmem>>, vector<1x32xf32>
    %496 = vector.shape_cast %495 : vector<1x32xf32> to vector<32xf32>
    %497 = vector.shape_cast %496 : vector<32xf32> to vector<1x32xf32>
    %498 = vector.broadcast %497 : vector<1x32xf32> to vector<8x32xf32>
    %499 = arith.addf %494, %498 : vector<8x32xf32>
    %c12 = arith.constant 12 : index
    %c0_267 = arith.constant 0 : index
    %c0_268 = arith.constant 0 : index
    %500 = vector.load %arg11[%c12, %c0_267, %c0_268] : memref<36x32x8xbf16, #tpu.memory_space<vmem>>, vector<1x32x8xbf16>
    %501 = vector.shape_cast %500 : vector<1x32x8xbf16> to vector<32x8xbf16>
    %cst_269 = arith.constant dense<0.000000e+00> : vector<8x8xf32>
    %502 = tpu.matmul %493, %501, %cst_269 {dimension_numbers = #tpu.dot_dimension_numbers<[1], [0], [0], [1], [0, 0, 1, 1], [], []>} : vector<8x32xbf16>, vector<32x8xbf16>, vector<8x8xf32> -> vector<8x8xf32>
    %c12_270 = arith.constant 12 : index
    %c0_271 = arith.constant 0 : index
    %c0_272 = arith.constant 0 : index
    %503 = vector.load %arg12[%c12_270, %c0_271, %c0_272] : memref<36x1x8xf32, #tpu.memory_space<vmem>>, vector<1x1x8xf32>
    %504 = vector.shape_cast %503 : vector<1x1x8xf32> to vector<1x8xf32>
    %505 = vector.broadcast %504 : vector<1x8xf32> to vector<8x8xf32>
    %506 = arith.addf %502, %505 : vector<8x8xf32>
    %507 = arith.truncf %506 : vector<8x8xf32> to vector<8x8xbf16>
    %c16 = arith.constant 16 : index
    %c0_273 = arith.constant 0 : index
    %c0_274 = arith.constant 0 : index
    %508 = vector.load %arg11[%c16, %c0_273, %c0_274] : memref<36x32x8xbf16, #tpu.memory_space<vmem>>, vector<1x32x8xbf16>
    %509 = vector.shape_cast %508 : vector<1x32x8xbf16> to vector<32x8xbf16>
    %cst_275 = arith.constant dense<0.000000e+00> : vector<8x8xf32>
    %510 = tpu.matmul %2, %509, %cst_275 {dimension_numbers = #tpu.dot_dimension_numbers<[1], [0], [0], [1], [0, 0, 1, 1], [], []>} : vector<8x32xbf16>, vector<32x8xbf16>, vector<8x8xf32> -> vector<8x8xf32>
    %c16_276 = arith.constant 16 : index
    %c0_277 = arith.constant 0 : index
    %c0_278 = arith.constant 0 : index
    %511 = vector.load %arg12[%c16_276, %c0_277, %c0_278] : memref<36x1x8xf32, #tpu.memory_space<vmem>>, vector<1x1x8xf32>
    %512 = vector.shape_cast %511 : vector<1x1x8xf32> to vector<1x8xf32>
    %513 = vector.broadcast %512 : vector<1x8xf32> to vector<8x8xf32>
    %514 = arith.addf %510, %513 : vector<8x8xf32>
    %515 = arith.truncf %514 : vector<8x8xf32> to vector<8x8xbf16>
    %c20 = arith.constant 20 : index
    %c0_279 = arith.constant 0 : index
    %c0_280 = arith.constant 0 : index
    %516 = vector.load %arg11[%c20, %c0_279, %c0_280] : memref<36x32x8xbf16, #tpu.memory_space<vmem>>, vector<1x32x8xbf16>
    %517 = vector.shape_cast %516 : vector<1x32x8xbf16> to vector<32x8xbf16>
    %cst_281 = arith.constant dense<0.000000e+00> : vector<8x8xf32>
    %518 = tpu.matmul %2, %517, %cst_281 {dimension_numbers = #tpu.dot_dimension_numbers<[1], [0], [0], [1], [0, 0, 1, 1], [], []>} : vector<8x32xbf16>, vector<32x8xbf16>, vector<8x8xf32> -> vector<8x8xf32>
    %c20_282 = arith.constant 20 : index
    %c0_283 = arith.constant 0 : index
    %c0_284 = arith.constant 0 : index
    %519 = vector.load %arg12[%c20_282, %c0_283, %c0_284] : memref<36x1x8xf32, #tpu.memory_space<vmem>>, vector<1x1x8xf32>
    %520 = vector.shape_cast %519 : vector<1x1x8xf32> to vector<1x8xf32>
    %521 = vector.broadcast %520 : vector<1x8xf32> to vector<8x8xf32>
    %522 = arith.addf %518, %521 : vector<8x8xf32>
    %523 = arith.truncf %522 : vector<8x8xf32> to vector<8x8xbf16>
    %524 = vector.shape_cast %507 : vector<8x8xbf16> to vector<1x8x8xbf16>
    %525 = vector.shape_cast %515 : vector<8x8xbf16> to vector<1x8x8xbf16>
    "tpu.trace_start"() <{level = 10 : i32, message = "bqd,bkd->bqk"}> : () -> ()
    %cst_285 = arith.constant dense<0.000000e+00> : vector<1x8x8xf32>
    %526 = tpu.matmul %524, %525, %cst_285 {dimension_numbers = #tpu.dot_dimension_numbers<[2], [2], [1], [1], [0, 0, 0, 1, 1, 1], [0], [0]>} : vector<1x8x8xbf16>, vector<1x8x8xbf16>, vector<1x8x8xf32> -> vector<1x8x8xf32>
    "tpu.trace_stop"() : () -> ()
    %527 = vector.broadcast %13 : vector<1x1x8xf32> to vector<1x8x8xf32>
    %528 = arith.addf %526, %527 : vector<1x8x8xf32>
    %cst_286 = arith.constant dense<0xFF800000> : vector<1x8xf32>
    %529 = vector.multi_reduction <maximumf>, %528, %cst_286 [2] : vector<1x8x8xf32> to vector<1x8xf32>
    %530 = vector.shape_cast %529 : vector<1x8xf32> to vector<1x8x1xf32>
    %531 = vector.broadcast %530 : vector<1x8x1xf32> to vector<1x8x8xf32>
    %532 = arith.subf %528, %531 : vector<1x8x8xf32>
    %533 = math.exp %532 : vector<1x8x8xf32>
    %cst_287 = arith.constant dense<0.000000e+00> : vector<1x8xf32>
    %534 = vector.multi_reduction <add>, %533, %cst_287 [2] : vector<1x8x8xf32> to vector<1x8xf32>
    %535 = vector.shape_cast %534 : vector<1x8xf32> to vector<1x8x1xf32>
    %536 = tpu.reciprocal %535 {approx = true} : vector<1x8x1xf32> -> vector<1x8x1xf32>
    %537 = vector.broadcast %536 : vector<1x8x1xf32> to vector<1x8x8xf32>
    %538 = arith.mulf %533, %537 : vector<1x8x8xf32>
    %539 = arith.truncf %538 : vector<1x8x8xf32> to vector<1x8x8xbf16>
    %540 = vector.shape_cast %523 : vector<8x8xbf16> to vector<1x8x8xbf16>
    "tpu.trace_start"() <{level = 10 : i32, message = "bqk,bkd->bqd"}> : () -> ()
    %cst_288 = arith.constant dense<0.000000e+00> : vector<1x8x8xf32>
    %541 = tpu.matmul %539, %540, %cst_288 {dimension_numbers = #tpu.dot_dimension_numbers<[2], [1], [1], [2], [0, 0, 0, 1, 1, 2], [0], [0]>} : vector<1x8x8xbf16>, vector<1x8x8xbf16>, vector<1x8x8xf32> -> vector<1x8x8xf32>
    "tpu.trace_stop"() : () -> ()
    %542 = vector.shape_cast %541 : vector<1x8x8xf32> to vector<8x8xf32>
    %543 = arith.truncf %542 : vector<8x8xf32> to vector<8x8xbf16>
    %c4_289 = arith.constant 4 : index
    %c0_290 = arith.constant 0 : index
    %c0_291 = arith.constant 0 : index
    %544 = vector.load %arg13[%c4_289, %c0_290, %c0_291] : memref<12x8x32xbf16, #tpu.memory_space<vmem>>, vector<1x8x32xbf16>
    %545 = vector.shape_cast %544 : vector<1x8x32xbf16> to vector<8x32xbf16>
    %cst_292 = arith.constant dense<0.000000e+00> : vector<8x32xf32>
    %546 = tpu.matmul %543, %545, %cst_292 {dimension_numbers = #tpu.dot_dimension_numbers<[1], [0], [0], [1], [0, 0, 1, 1], [], []>} : vector<8x8xbf16>, vector<8x32xbf16>, vector<8x32xf32> -> vector<8x32xf32>
    %547 = arith.addf %499, %546 : vector<8x32xf32>
    %c13 = arith.constant 13 : index
    %c0_293 = arith.constant 0 : index
    %c0_294 = arith.constant 0 : index
    %548 = vector.load %arg11[%c13, %c0_293, %c0_294] : memref<36x32x8xbf16, #tpu.memory_space<vmem>>, vector<1x32x8xbf16>
    %549 = vector.shape_cast %548 : vector<1x32x8xbf16> to vector<32x8xbf16>
    %cst_295 = arith.constant dense<0.000000e+00> : vector<8x8xf32>
    %550 = tpu.matmul %493, %549, %cst_295 {dimension_numbers = #tpu.dot_dimension_numbers<[1], [0], [0], [1], [0, 0, 1, 1], [], []>} : vector<8x32xbf16>, vector<32x8xbf16>, vector<8x8xf32> -> vector<8x8xf32>
    %c13_296 = arith.constant 13 : index
    %c0_297 = arith.constant 0 : index
    %c0_298 = arith.constant 0 : index
    %551 = vector.load %arg12[%c13_296, %c0_297, %c0_298] : memref<36x1x8xf32, #tpu.memory_space<vmem>>, vector<1x1x8xf32>
    %552 = vector.shape_cast %551 : vector<1x1x8xf32> to vector<1x8xf32>
    %553 = vector.broadcast %552 : vector<1x8xf32> to vector<8x8xf32>
    %554 = arith.addf %550, %553 : vector<8x8xf32>
    %555 = arith.truncf %554 : vector<8x8xf32> to vector<8x8xbf16>
    %c17 = arith.constant 17 : index
    %c0_299 = arith.constant 0 : index
    %c0_300 = arith.constant 0 : index
    %556 = vector.load %arg11[%c17, %c0_299, %c0_300] : memref<36x32x8xbf16, #tpu.memory_space<vmem>>, vector<1x32x8xbf16>
    %557 = vector.shape_cast %556 : vector<1x32x8xbf16> to vector<32x8xbf16>
    %cst_301 = arith.constant dense<0.000000e+00> : vector<8x8xf32>
    %558 = tpu.matmul %2, %557, %cst_301 {dimension_numbers = #tpu.dot_dimension_numbers<[1], [0], [0], [1], [0, 0, 1, 1], [], []>} : vector<8x32xbf16>, vector<32x8xbf16>, vector<8x8xf32> -> vector<8x8xf32>
    %c17_302 = arith.constant 17 : index
    %c0_303 = arith.constant 0 : index
    %c0_304 = arith.constant 0 : index
    %559 = vector.load %arg12[%c17_302, %c0_303, %c0_304] : memref<36x1x8xf32, #tpu.memory_space<vmem>>, vector<1x1x8xf32>
    %560 = vector.shape_cast %559 : vector<1x1x8xf32> to vector<1x8xf32>
    %561 = vector.broadcast %560 : vector<1x8xf32> to vector<8x8xf32>
    %562 = arith.addf %558, %561 : vector<8x8xf32>
    %563 = arith.truncf %562 : vector<8x8xf32> to vector<8x8xbf16>
    %c21 = arith.constant 21 : index
    %c0_305 = arith.constant 0 : index
    %c0_306 = arith.constant 0 : index
    %564 = vector.load %arg11[%c21, %c0_305, %c0_306] : memref<36x32x8xbf16, #tpu.memory_space<vmem>>, vector<1x32x8xbf16>
    %565 = vector.shape_cast %564 : vector<1x32x8xbf16> to vector<32x8xbf16>
    %cst_307 = arith.constant dense<0.000000e+00> : vector<8x8xf32>
    %566 = tpu.matmul %2, %565, %cst_307 {dimension_numbers = #tpu.dot_dimension_numbers<[1], [0], [0], [1], [0, 0, 1, 1], [], []>} : vector<8x32xbf16>, vector<32x8xbf16>, vector<8x8xf32> -> vector<8x8xf32>
    %c21_308 = arith.constant 21 : index
    %c0_309 = arith.constant 0 : index
    %c0_310 = arith.constant 0 : index
    %567 = vector.load %arg12[%c21_308, %c0_309, %c0_310] : memref<36x1x8xf32, #tpu.memory_space<vmem>>, vector<1x1x8xf32>
    %568 = vector.shape_cast %567 : vector<1x1x8xf32> to vector<1x8xf32>
    %569 = vector.broadcast %568 : vector<1x8xf32> to vector<8x8xf32>
    %570 = arith.addf %566, %569 : vector<8x8xf32>
    %571 = arith.truncf %570 : vector<8x8xf32> to vector<8x8xbf16>
    %572 = vector.shape_cast %555 : vector<8x8xbf16> to vector<1x8x8xbf16>
    %573 = vector.shape_cast %563 : vector<8x8xbf16> to vector<1x8x8xbf16>
    "tpu.trace_start"() <{level = 10 : i32, message = "bqd,bkd->bqk"}> : () -> ()
    %cst_311 = arith.constant dense<0.000000e+00> : vector<1x8x8xf32>
    %574 = tpu.matmul %572, %573, %cst_311 {dimension_numbers = #tpu.dot_dimension_numbers<[2], [2], [1], [1], [0, 0, 0, 1, 1, 1], [0], [0]>} : vector<1x8x8xbf16>, vector<1x8x8xbf16>, vector<1x8x8xf32> -> vector<1x8x8xf32>
    "tpu.trace_stop"() : () -> ()
    %575 = vector.broadcast %13 : vector<1x1x8xf32> to vector<1x8x8xf32>
    %576 = arith.addf %574, %575 : vector<1x8x8xf32>
    %cst_312 = arith.constant dense<0xFF800000> : vector<1x8xf32>
    %577 = vector.multi_reduction <maximumf>, %576, %cst_312 [2] : vector<1x8x8xf32> to vector<1x8xf32>
    %578 = vector.shape_cast %577 : vector<1x8xf32> to vector<1x8x1xf32>
    %579 = vector.broadcast %578 : vector<1x8x1xf32> to vector<1x8x8xf32>
    %580 = arith.subf %576, %579 : vector<1x8x8xf32>
    %581 = math.exp %580 : vector<1x8x8xf32>
    %cst_313 = arith.constant dense<0.000000e+00> : vector<1x8xf32>
    %582 = vector.multi_reduction <add>, %581, %cst_313 [2] : vector<1x8x8xf32> to vector<1x8xf32>
    %583 = vector.shape_cast %582 : vector<1x8xf32> to vector<1x8x1xf32>
    %584 = tpu.reciprocal %583 {approx = true} : vector<1x8x1xf32> -> vector<1x8x1xf32>
    %585 = vector.broadcast %584 : vector<1x8x1xf32> to vector<1x8x8xf32>
    %586 = arith.mulf %581, %585 : vector<1x8x8xf32>
    %587 = arith.truncf %586 : vector<1x8x8xf32> to vector<1x8x8xbf16>
    %588 = vector.shape_cast %571 : vector<8x8xbf16> to vector<1x8x8xbf16>
    "tpu.trace_start"() <{level = 10 : i32, message = "bqk,bkd->bqd"}> : () -> ()
    %cst_314 = arith.constant dense<0.000000e+00> : vector<1x8x8xf32>
    %589 = tpu.matmul %587, %588, %cst_314 {dimension_numbers = #tpu.dot_dimension_numbers<[2], [1], [1], [2], [0, 0, 0, 1, 1, 2], [0], [0]>} : vector<1x8x8xbf16>, vector<1x8x8xbf16>, vector<1x8x8xf32> -> vector<1x8x8xf32>
    "tpu.trace_stop"() : () -> ()
    %590 = vector.shape_cast %589 : vector<1x8x8xf32> to vector<8x8xf32>
    %591 = arith.truncf %590 : vector<8x8xf32> to vector<8x8xbf16>
    %c5_315 = arith.constant 5 : index
    %c0_316 = arith.constant 0 : index
    %c0_317 = arith.constant 0 : index
    %592 = vector.load %arg13[%c5_315, %c0_316, %c0_317] : memref<12x8x32xbf16, #tpu.memory_space<vmem>>, vector<1x8x32xbf16>
    %593 = vector.shape_cast %592 : vector<1x8x32xbf16> to vector<8x32xbf16>
    %cst_318 = arith.constant dense<0.000000e+00> : vector<8x32xf32>
    %594 = tpu.matmul %591, %593, %cst_318 {dimension_numbers = #tpu.dot_dimension_numbers<[1], [0], [0], [1], [0, 0, 1, 1], [], []>} : vector<8x8xbf16>, vector<8x32xbf16>, vector<8x32xf32> -> vector<8x32xf32>
    %595 = arith.addf %547, %594 : vector<8x32xf32>
    %c14 = arith.constant 14 : index
    %c0_319 = arith.constant 0 : index
    %c0_320 = arith.constant 0 : index
    %596 = vector.load %arg11[%c14, %c0_319, %c0_320] : memref<36x32x8xbf16, #tpu.memory_space<vmem>>, vector<1x32x8xbf16>
    %597 = vector.shape_cast %596 : vector<1x32x8xbf16> to vector<32x8xbf16>
    %cst_321 = arith.constant dense<0.000000e+00> : vector<8x8xf32>
    %598 = tpu.matmul %493, %597, %cst_321 {dimension_numbers = #tpu.dot_dimension_numbers<[1], [0], [0], [1], [0, 0, 1, 1], [], []>} : vector<8x32xbf16>, vector<32x8xbf16>, vector<8x8xf32> -> vector<8x8xf32>
    %c14_322 = arith.constant 14 : index
    %c0_323 = arith.constant 0 : index
    %c0_324 = arith.constant 0 : index
    %599 = vector.load %arg12[%c14_322, %c0_323, %c0_324] : memref<36x1x8xf32, #tpu.memory_space<vmem>>, vector<1x1x8xf32>
    %600 = vector.shape_cast %599 : vector<1x1x8xf32> to vector<1x8xf32>
    %601 = vector.broadcast %600 : vector<1x8xf32> to vector<8x8xf32>
    %602 = arith.addf %598, %601 : vector<8x8xf32>
    %603 = arith.truncf %602 : vector<8x8xf32> to vector<8x8xbf16>
    %c18 = arith.constant 18 : index
    %c0_325 = arith.constant 0 : index
    %c0_326 = arith.constant 0 : index
    %604 = vector.load %arg11[%c18, %c0_325, %c0_326] : memref<36x32x8xbf16, #tpu.memory_space<vmem>>, vector<1x32x8xbf16>
    %605 = vector.shape_cast %604 : vector<1x32x8xbf16> to vector<32x8xbf16>
    %cst_327 = arith.constant dense<0.000000e+00> : vector<8x8xf32>
    %606 = tpu.matmul %2, %605, %cst_327 {dimension_numbers = #tpu.dot_dimension_numbers<[1], [0], [0], [1], [0, 0, 1, 1], [], []>} : vector<8x32xbf16>, vector<32x8xbf16>, vector<8x8xf32> -> vector<8x8xf32>
    %c18_328 = arith.constant 18 : index
    %c0_329 = arith.constant 0 : index
    %c0_330 = arith.constant 0 : index
    %607 = vector.load %arg12[%c18_328, %c0_329, %c0_330] : memref<36x1x8xf32, #tpu.memory_space<vmem>>, vector<1x1x8xf32>
    %608 = vector.shape_cast %607 : vector<1x1x8xf32> to vector<1x8xf32>
    %609 = vector.broadcast %608 : vector<1x8xf32> to vector<8x8xf32>
    %610 = arith.addf %606, %609 : vector<8x8xf32>
    %611 = arith.truncf %610 : vector<8x8xf32> to vector<8x8xbf16>
    %c22 = arith.constant 22 : index
    %c0_331 = arith.constant 0 : index
    %c0_332 = arith.constant 0 : index
    %612 = vector.load %arg11[%c22, %c0_331, %c0_332] : memref<36x32x8xbf16, #tpu.memory_space<vmem>>, vector<1x32x8xbf16>
    %613 = vector.shape_cast %612 : vector<1x32x8xbf16> to vector<32x8xbf16>
    %cst_333 = arith.constant dense<0.000000e+00> : vector<8x8xf32>
    %614 = tpu.matmul %2, %613, %cst_333 {dimension_numbers = #tpu.dot_dimension_numbers<[1], [0], [0], [1], [0, 0, 1, 1], [], []>} : vector<8x32xbf16>, vector<32x8xbf16>, vector<8x8xf32> -> vector<8x8xf32>
    %c22_334 = arith.constant 22 : index
    %c0_335 = arith.constant 0 : index
    %c0_336 = arith.constant 0 : index
    %615 = vector.load %arg12[%c22_334, %c0_335, %c0_336] : memref<36x1x8xf32, #tpu.memory_space<vmem>>, vector<1x1x8xf32>
    %616 = vector.shape_cast %615 : vector<1x1x8xf32> to vector<1x8xf32>
    %617 = vector.broadcast %616 : vector<1x8xf32> to vector<8x8xf32>
    %618 = arith.addf %614, %617 : vector<8x8xf32>
    %619 = arith.truncf %618 : vector<8x8xf32> to vector<8x8xbf16>
    %620 = vector.shape_cast %603 : vector<8x8xbf16> to vector<1x8x8xbf16>
    %621 = vector.shape_cast %611 : vector<8x8xbf16> to vector<1x8x8xbf16>
    "tpu.trace_start"() <{level = 10 : i32, message = "bqd,bkd->bqk"}> : () -> ()
    %cst_337 = arith.constant dense<0.000000e+00> : vector<1x8x8xf32>
    %622 = tpu.matmul %620, %621, %cst_337 {dimension_numbers = #tpu.dot_dimension_numbers<[2], [2], [1], [1], [0, 0, 0, 1, 1, 1], [0], [0]>} : vector<1x8x8xbf16>, vector<1x8x8xbf16>, vector<1x8x8xf32> -> vector<1x8x8xf32>
    "tpu.trace_stop"() : () -> ()
    %623 = vector.broadcast %13 : vector<1x1x8xf32> to vector<1x8x8xf32>
    %624 = arith.addf %622, %623 : vector<1x8x8xf32>
    %cst_338 = arith.constant dense<0xFF800000> : vector<1x8xf32>
    %625 = vector.multi_reduction <maximumf>, %624, %cst_338 [2] : vector<1x8x8xf32> to vector<1x8xf32>
    %626 = vector.shape_cast %625 : vector<1x8xf32> to vector<1x8x1xf32>
    %627 = vector.broadcast %626 : vector<1x8x1xf32> to vector<1x8x8xf32>
    %628 = arith.subf %624, %627 : vector<1x8x8xf32>
    %629 = math.exp %628 : vector<1x8x8xf32>
    %cst_339 = arith.constant dense<0.000000e+00> : vector<1x8xf32>
    %630 = vector.multi_reduction <add>, %629, %cst_339 [2] : vector<1x8x8xf32> to vector<1x8xf32>
    %631 = vector.shape_cast %630 : vector<1x8xf32> to vector<1x8x1xf32>
    %632 = tpu.reciprocal %631 {approx = true} : vector<1x8x1xf32> -> vector<1x8x1xf32>
    %633 = vector.broadcast %632 : vector<1x8x1xf32> to vector<1x8x8xf32>
    %634 = arith.mulf %629, %633 : vector<1x8x8xf32>
    %635 = arith.truncf %634 : vector<1x8x8xf32> to vector<1x8x8xbf16>
    %636 = vector.shape_cast %619 : vector<8x8xbf16> to vector<1x8x8xbf16>
    "tpu.trace_start"() <{level = 10 : i32, message = "bqk,bkd->bqd"}> : () -> ()
    %cst_340 = arith.constant dense<0.000000e+00> : vector<1x8x8xf32>
    %637 = tpu.matmul %635, %636, %cst_340 {dimension_numbers = #tpu.dot_dimension_numbers<[2], [1], [1], [2], [0, 0, 0, 1, 1, 2], [0], [0]>} : vector<1x8x8xbf16>, vector<1x8x8xbf16>, vector<1x8x8xf32> -> vector<1x8x8xf32>
    "tpu.trace_stop"() : () -> ()
    %638 = vector.shape_cast %637 : vector<1x8x8xf32> to vector<8x8xf32>
    %639 = arith.truncf %638 : vector<8x8xf32> to vector<8x8xbf16>
    %c6_341 = arith.constant 6 : index
    %c0_342 = arith.constant 0 : index
    %c0_343 = arith.constant 0 : index
    %640 = vector.load %arg13[%c6_341, %c0_342, %c0_343] : memref<12x8x32xbf16, #tpu.memory_space<vmem>>, vector<1x8x32xbf16>
    %641 = vector.shape_cast %640 : vector<1x8x32xbf16> to vector<8x32xbf16>
    %cst_344 = arith.constant dense<0.000000e+00> : vector<8x32xf32>
    %642 = tpu.matmul %639, %641, %cst_344 {dimension_numbers = #tpu.dot_dimension_numbers<[1], [0], [0], [1], [0, 0, 1, 1], [], []>} : vector<8x8xbf16>, vector<8x32xbf16>, vector<8x32xf32> -> vector<8x32xf32>
    %643 = arith.addf %595, %642 : vector<8x32xf32>
    %c15 = arith.constant 15 : index
    %c0_345 = arith.constant 0 : index
    %c0_346 = arith.constant 0 : index
    %644 = vector.load %arg11[%c15, %c0_345, %c0_346] : memref<36x32x8xbf16, #tpu.memory_space<vmem>>, vector<1x32x8xbf16>
    %645 = vector.shape_cast %644 : vector<1x32x8xbf16> to vector<32x8xbf16>
    %cst_347 = arith.constant dense<0.000000e+00> : vector<8x8xf32>
    %646 = tpu.matmul %493, %645, %cst_347 {dimension_numbers = #tpu.dot_dimension_numbers<[1], [0], [0], [1], [0, 0, 1, 1], [], []>} : vector<8x32xbf16>, vector<32x8xbf16>, vector<8x8xf32> -> vector<8x8xf32>
    %c15_348 = arith.constant 15 : index
    %c0_349 = arith.constant 0 : index
    %c0_350 = arith.constant 0 : index
    %647 = vector.load %arg12[%c15_348, %c0_349, %c0_350] : memref<36x1x8xf32, #tpu.memory_space<vmem>>, vector<1x1x8xf32>
    %648 = vector.shape_cast %647 : vector<1x1x8xf32> to vector<1x8xf32>
    %649 = vector.broadcast %648 : vector<1x8xf32> to vector<8x8xf32>
    %650 = arith.addf %646, %649 : vector<8x8xf32>
    %651 = arith.truncf %650 : vector<8x8xf32> to vector<8x8xbf16>
    %c19 = arith.constant 19 : index
    %c0_351 = arith.constant 0 : index
    %c0_352 = arith.constant 0 : index
    %652 = vector.load %arg11[%c19, %c0_351, %c0_352] : memref<36x32x8xbf16, #tpu.memory_space<vmem>>, vector<1x32x8xbf16>
    %653 = vector.shape_cast %652 : vector<1x32x8xbf16> to vector<32x8xbf16>
    %cst_353 = arith.constant dense<0.000000e+00> : vector<8x8xf32>
    %654 = tpu.matmul %2, %653, %cst_353 {dimension_numbers = #tpu.dot_dimension_numbers<[1], [0], [0], [1], [0, 0, 1, 1], [], []>} : vector<8x32xbf16>, vector<32x8xbf16>, vector<8x8xf32> -> vector<8x8xf32>
    %c19_354 = arith.constant 19 : index
    %c0_355 = arith.constant 0 : index
    %c0_356 = arith.constant 0 : index
    %655 = vector.load %arg12[%c19_354, %c0_355, %c0_356] : memref<36x1x8xf32, #tpu.memory_space<vmem>>, vector<1x1x8xf32>
    %656 = vector.shape_cast %655 : vector<1x1x8xf32> to vector<1x8xf32>
    %657 = vector.broadcast %656 : vector<1x8xf32> to vector<8x8xf32>
    %658 = arith.addf %654, %657 : vector<8x8xf32>
    %659 = arith.truncf %658 : vector<8x8xf32> to vector<8x8xbf16>
    %c23 = arith.constant 23 : index
    %c0_357 = arith.constant 0 : index
    %c0_358 = arith.constant 0 : index
    %660 = vector.load %arg11[%c23, %c0_357, %c0_358] : memref<36x32x8xbf16, #tpu.memory_space<vmem>>, vector<1x32x8xbf16>
    %661 = vector.shape_cast %660 : vector<1x32x8xbf16> to vector<32x8xbf16>
    %cst_359 = arith.constant dense<0.000000e+00> : vector<8x8xf32>
    %662 = tpu.matmul %2, %661, %cst_359 {dimension_numbers = #tpu.dot_dimension_numbers<[1], [0], [0], [1], [0, 0, 1, 1], [], []>} : vector<8x32xbf16>, vector<32x8xbf16>, vector<8x8xf32> -> vector<8x8xf32>
    %c23_360 = arith.constant 23 : index
    %c0_361 = arith.constant 0 : index
    %c0_362 = arith.constant 0 : index
    %663 = vector.load %arg12[%c23_360, %c0_361, %c0_362] : memref<36x1x8xf32, #tpu.memory_space<vmem>>, vector<1x1x8xf32>
    %664 = vector.shape_cast %663 : vector<1x1x8xf32> to vector<1x8xf32>
    %665 = vector.broadcast %664 : vector<1x8xf32> to vector<8x8xf32>
    %666 = arith.addf %662, %665 : vector<8x8xf32>
    %667 = arith.truncf %666 : vector<8x8xf32> to vector<8x8xbf16>
    %668 = vector.shape_cast %651 : vector<8x8xbf16> to vector<1x8x8xbf16>
    %669 = vector.shape_cast %659 : vector<8x8xbf16> to vector<1x8x8xbf16>
    "tpu.trace_start"() <{level = 10 : i32, message = "bqd,bkd->bqk"}> : () -> ()
    %cst_363 = arith.constant dense<0.000000e+00> : vector<1x8x8xf32>
    %670 = tpu.matmul %668, %669, %cst_363 {dimension_numbers = #tpu.dot_dimension_numbers<[2], [2], [1], [1], [0, 0, 0, 1, 1, 1], [0], [0]>} : vector<1x8x8xbf16>, vector<1x8x8xbf16>, vector<1x8x8xf32> -> vector<1x8x8xf32>
    "tpu.trace_stop"() : () -> ()
    %671 = vector.broadcast %13 : vector<1x1x8xf32> to vector<1x8x8xf32>
    %672 = arith.addf %670, %671 : vector<1x8x8xf32>
    %cst_364 = arith.constant dense<0xFF800000> : vector<1x8xf32>
    %673 = vector.multi_reduction <maximumf>, %672, %cst_364 [2] : vector<1x8x8xf32> to vector<1x8xf32>
    %674 = vector.shape_cast %673 : vector<1x8xf32> to vector<1x8x1xf32>
    %675 = vector.broadcast %674 : vector<1x8x1xf32> to vector<1x8x8xf32>
    %676 = arith.subf %672, %675 : vector<1x8x8xf32>
    %677 = math.exp %676 : vector<1x8x8xf32>
    %cst_365 = arith.constant dense<0.000000e+00> : vector<1x8xf32>
    %678 = vector.multi_reduction <add>, %677, %cst_365 [2] : vector<1x8x8xf32> to vector<1x8xf32>
    %679 = vector.shape_cast %678 : vector<1x8xf32> to vector<1x8x1xf32>
    %680 = tpu.reciprocal %679 {approx = true} : vector<1x8x1xf32> -> vector<1x8x1xf32>
    %681 = vector.broadcast %680 : vector<1x8x1xf32> to vector<1x8x8xf32>
    %682 = arith.mulf %677, %681 : vector<1x8x8xf32>
    %683 = arith.truncf %682 : vector<1x8x8xf32> to vector<1x8x8xbf16>
    %684 = vector.shape_cast %667 : vector<8x8xbf16> to vector<1x8x8xbf16>
    "tpu.trace_start"() <{level = 10 : i32, message = "bqk,bkd->bqd"}> : () -> ()
    %cst_366 = arith.constant dense<0.000000e+00> : vector<1x8x8xf32>
    %685 = tpu.matmul %683, %684, %cst_366 {dimension_numbers = #tpu.dot_dimension_numbers<[2], [1], [1], [2], [0, 0, 0, 1, 1, 2], [0], [0]>} : vector<1x8x8xbf16>, vector<1x8x8xbf16>, vector<1x8x8xf32> -> vector<1x8x8xf32>
    "tpu.trace_stop"() : () -> ()
    %686 = vector.shape_cast %685 : vector<1x8x8xf32> to vector<8x8xf32>
    %687 = arith.truncf %686 : vector<8x8xf32> to vector<8x8xbf16>
    %c7_367 = arith.constant 7 : index
    %c0_368 = arith.constant 0 : index
    %c0_369 = arith.constant 0 : index
    %688 = vector.load %arg13[%c7_367, %c0_368, %c0_369] : memref<12x8x32xbf16, #tpu.memory_space<vmem>>, vector<1x8x32xbf16>
    %689 = vector.shape_cast %688 : vector<1x8x32xbf16> to vector<8x32xbf16>
    %cst_370 = arith.constant dense<0.000000e+00> : vector<8x32xf32>
    %690 = tpu.matmul %687, %689, %cst_370 {dimension_numbers = #tpu.dot_dimension_numbers<[1], [0], [0], [1], [0, 0, 1, 1], [], []>} : vector<8x8xbf16>, vector<8x32xbf16>, vector<8x32xf32> -> vector<8x32xf32>
    %691 = arith.addf %643, %690 : vector<8x32xf32>
    %c3_371 = arith.constant 3 : index
    %c0_372 = arith.constant 0 : index
    %692 = vector.load %arg5[%c3_371, %c0_372] : memref<6x32xf32, #tpu.memory_space<vmem>>, vector<1x32xf32>
    %693 = vector.shape_cast %692 : vector<1x32xf32> to vector<32xf32>
    %c3_373 = arith.constant 3 : index
    %c0_374 = arith.constant 0 : index
    %694 = vector.load %arg6[%c3_373, %c0_374] : memref<6x32xf32, #tpu.memory_space<vmem>>, vector<1x32xf32>
    %695 = vector.shape_cast %694 : vector<1x32xf32> to vector<32xf32>
    %cst_375 = arith.constant dense<0.000000e+00> : vector<8xf32>
    %696 = vector.multi_reduction <add>, %691, %cst_375 [1] : vector<8x32xf32> to vector<8xf32>
    %697 = vector.shape_cast %696 : vector<8xf32> to vector<8x1xf32>
    %cst_376 = arith.constant 3.200000e+01 : f32
    %698 = vector.broadcast %cst_376 : f32 to vector<8x1xf32>
    %699 = arith.divf %697, %698 : vector<8x1xf32>
    %700 = vector.broadcast %699 : vector<8x1xf32> to vector<8x32xf32>
    %701 = arith.subf %691, %700 : vector<8x32xf32>
    %702 = arith.mulf %701, %701 : vector<8x32xf32>
    %cst_377 = arith.constant dense<0.000000e+00> : vector<8xf32>
    %703 = vector.multi_reduction <add>, %702, %cst_377 [1] : vector<8x32xf32> to vector<8xf32>
    %704 = vector.shape_cast %703 : vector<8xf32> to vector<8x1xf32>
    %cst_378 = arith.constant 3.200000e+01 : f32
    %705 = vector.broadcast %cst_378 : f32 to vector<8x1xf32>
    %706 = arith.divf %704, %705 : vector<8x1xf32>
    %707 = vector.broadcast %699 : vector<8x1xf32> to vector<8x32xf32>
    %708 = arith.subf %691, %707 : vector<8x32xf32>
    %cst_379 = arith.constant 9.99999974E-6 : f32
    %709 = vector.broadcast %cst_379 : f32 to vector<8x1xf32>
    %710 = arith.addf %706, %709 : vector<8x1xf32>
    %711 = math.rsqrt %710 : vector<8x1xf32>
    %712 = vector.broadcast %711 : vector<8x1xf32> to vector<8x32xf32>
    %713 = arith.mulf %708, %712 : vector<8x32xf32>
    %714 = vector.shape_cast %693 : vector<32xf32> to vector<1x32xf32>
    %715 = vector.broadcast %714 : vector<1x32xf32> to vector<8x32xf32>
    %716 = arith.mulf %713, %715 : vector<8x32xf32>
    %717 = vector.shape_cast %695 : vector<32xf32> to vector<1x32xf32>
    %718 = vector.broadcast %717 : vector<1x32xf32> to vector<8x32xf32>
    %719 = arith.addf %716, %718 : vector<8x32xf32>
    %720 = arith.truncf %719 : vector<8x32xf32> to vector<8x32xbf16>
    %cst_380 = arith.constant 0.000000e+00 : f32
    %721 = vector.broadcast %cst_380 : f32 to vector<8x32xf32>
    %c2_381 = arith.constant 2 : index
    %c0_382 = arith.constant 0 : index
    %722 = vector.load %arg14[%c2_381, %c0_382] : memref<3x32xf32, #tpu.memory_space<vmem>>, vector<1x32xf32>
    %723 = vector.shape_cast %722 : vector<1x32xf32> to vector<32xf32>
    %724 = vector.shape_cast %723 : vector<32xf32> to vector<1x32xf32>
    %725 = vector.broadcast %724 : vector<1x32xf32> to vector<8x32xf32>
    %726 = arith.addf %721, %725 : vector<8x32xf32>
    %c24 = arith.constant 24 : index
    %c0_383 = arith.constant 0 : index
    %c0_384 = arith.constant 0 : index
    %727 = vector.load %arg11[%c24, %c0_383, %c0_384] : memref<36x32x8xbf16, #tpu.memory_space<vmem>>, vector<1x32x8xbf16>
    %728 = vector.shape_cast %727 : vector<1x32x8xbf16> to vector<32x8xbf16>
    %cst_385 = arith.constant dense<0.000000e+00> : vector<8x8xf32>
    %729 = tpu.matmul %720, %728, %cst_385 {dimension_numbers = #tpu.dot_dimension_numbers<[1], [0], [0], [1], [0, 0, 1, 1], [], []>} : vector<8x32xbf16>, vector<32x8xbf16>, vector<8x8xf32> -> vector<8x8xf32>
    %c24_386 = arith.constant 24 : index
    %c0_387 = arith.constant 0 : index
    %c0_388 = arith.constant 0 : index
    %730 = vector.load %arg12[%c24_386, %c0_387, %c0_388] : memref<36x1x8xf32, #tpu.memory_space<vmem>>, vector<1x1x8xf32>
    %731 = vector.shape_cast %730 : vector<1x1x8xf32> to vector<1x8xf32>
    %732 = vector.broadcast %731 : vector<1x8xf32> to vector<8x8xf32>
    %733 = arith.addf %729, %732 : vector<8x8xf32>
    %734 = arith.truncf %733 : vector<8x8xf32> to vector<8x8xbf16>
    %c28 = arith.constant 28 : index
    %c0_389 = arith.constant 0 : index
    %c0_390 = arith.constant 0 : index
    %735 = vector.load %arg11[%c28, %c0_389, %c0_390] : memref<36x32x8xbf16, #tpu.memory_space<vmem>>, vector<1x32x8xbf16>
    %736 = vector.shape_cast %735 : vector<1x32x8xbf16> to vector<32x8xbf16>
    %cst_391 = arith.constant dense<0.000000e+00> : vector<8x8xf32>
    %737 = tpu.matmul %2, %736, %cst_391 {dimension_numbers = #tpu.dot_dimension_numbers<[1], [0], [0], [1], [0, 0, 1, 1], [], []>} : vector<8x32xbf16>, vector<32x8xbf16>, vector<8x8xf32> -> vector<8x8xf32>
    %c28_392 = arith.constant 28 : index
    %c0_393 = arith.constant 0 : index
    %c0_394 = arith.constant 0 : index
    %738 = vector.load %arg12[%c28_392, %c0_393, %c0_394] : memref<36x1x8xf32, #tpu.memory_space<vmem>>, vector<1x1x8xf32>
    %739 = vector.shape_cast %738 : vector<1x1x8xf32> to vector<1x8xf32>
    %740 = vector.broadcast %739 : vector<1x8xf32> to vector<8x8xf32>
    %741 = arith.addf %737, %740 : vector<8x8xf32>
    %742 = arith.truncf %741 : vector<8x8xf32> to vector<8x8xbf16>
    %c32 = arith.constant 32 : index
    %c0_395 = arith.constant 0 : index
    %c0_396 = arith.constant 0 : index
    %743 = vector.load %arg11[%c32, %c0_395, %c0_396] : memref<36x32x8xbf16, #tpu.memory_space<vmem>>, vector<1x32x8xbf16>
    %744 = vector.shape_cast %743 : vector<1x32x8xbf16> to vector<32x8xbf16>
    %cst_397 = arith.constant dense<0.000000e+00> : vector<8x8xf32>
    %745 = tpu.matmul %2, %744, %cst_397 {dimension_numbers = #tpu.dot_dimension_numbers<[1], [0], [0], [1], [0, 0, 1, 1], [], []>} : vector<8x32xbf16>, vector<32x8xbf16>, vector<8x8xf32> -> vector<8x8xf32>
    %c32_398 = arith.constant 32 : index
    %c0_399 = arith.constant 0 : index
    %c0_400 = arith.constant 0 : index
    %746 = vector.load %arg12[%c32_398, %c0_399, %c0_400] : memref<36x1x8xf32, #tpu.memory_space<vmem>>, vector<1x1x8xf32>
    %747 = vector.shape_cast %746 : vector<1x1x8xf32> to vector<1x8xf32>
    %748 = vector.broadcast %747 : vector<1x8xf32> to vector<8x8xf32>
    %749 = arith.addf %745, %748 : vector<8x8xf32>
    %750 = arith.truncf %749 : vector<8x8xf32> to vector<8x8xbf16>
    %751 = vector.shape_cast %734 : vector<8x8xbf16> to vector<1x8x8xbf16>
    %752 = vector.shape_cast %742 : vector<8x8xbf16> to vector<1x8x8xbf16>
    "tpu.trace_start"() <{level = 10 : i32, message = "bqd,bkd->bqk"}> : () -> ()
    %cst_401 = arith.constant dense<0.000000e+00> : vector<1x8x8xf32>
    %753 = tpu.matmul %751, %752, %cst_401 {dimension_numbers = #tpu.dot_dimension_numbers<[2], [2], [1], [1], [0, 0, 0, 1, 1, 1], [0], [0]>} : vector<1x8x8xbf16>, vector<1x8x8xbf16>, vector<1x8x8xf32> -> vector<1x8x8xf32>
    "tpu.trace_stop"() : () -> ()
    %754 = vector.broadcast %13 : vector<1x1x8xf32> to vector<1x8x8xf32>
    %755 = arith.addf %753, %754 : vector<1x8x8xf32>
    %cst_402 = arith.constant dense<0xFF800000> : vector<1x8xf32>
    %756 = vector.multi_reduction <maximumf>, %755, %cst_402 [2] : vector<1x8x8xf32> to vector<1x8xf32>
    %757 = vector.shape_cast %756 : vector<1x8xf32> to vector<1x8x1xf32>
    %758 = vector.broadcast %757 : vector<1x8x1xf32> to vector<1x8x8xf32>
    %759 = arith.subf %755, %758 : vector<1x8x8xf32>
    %760 = math.exp %759 : vector<1x8x8xf32>
    %cst_403 = arith.constant dense<0.000000e+00> : vector<1x8xf32>
    %761 = vector.multi_reduction <add>, %760, %cst_403 [2] : vector<1x8x8xf32> to vector<1x8xf32>
    %762 = vector.shape_cast %761 : vector<1x8xf32> to vector<1x8x1xf32>
    %763 = tpu.reciprocal %762 {approx = true} : vector<1x8x1xf32> -> vector<1x8x1xf32>
    %764 = vector.broadcast %763 : vector<1x8x1xf32> to vector<1x8x8xf32>
    %765 = arith.mulf %760, %764 : vector<1x8x8xf32>
    %766 = arith.truncf %765 : vector<1x8x8xf32> to vector<1x8x8xbf16>
    %767 = vector.shape_cast %750 : vector<8x8xbf16> to vector<1x8x8xbf16>
    "tpu.trace_start"() <{level = 10 : i32, message = "bqk,bkd->bqd"}> : () -> ()
    %cst_404 = arith.constant dense<0.000000e+00> : vector<1x8x8xf32>
    %768 = tpu.matmul %766, %767, %cst_404 {dimension_numbers = #tpu.dot_dimension_numbers<[2], [1], [1], [2], [0, 0, 0, 1, 1, 2], [0], [0]>} : vector<1x8x8xbf16>, vector<1x8x8xbf16>, vector<1x8x8xf32> -> vector<1x8x8xf32>
    "tpu.trace_stop"() : () -> ()
    %769 = vector.shape_cast %768 : vector<1x8x8xf32> to vector<8x8xf32>
    %770 = arith.truncf %769 : vector<8x8xf32> to vector<8x8xbf16>
    %c8_405 = arith.constant 8 : index
    %c0_406 = arith.constant 0 : index
    %c0_407 = arith.constant 0 : index
    %771 = vector.load %arg13[%c8_405, %c0_406, %c0_407] : memref<12x8x32xbf16, #tpu.memory_space<vmem>>, vector<1x8x32xbf16>
    %772 = vector.shape_cast %771 : vector<1x8x32xbf16> to vector<8x32xbf16>
    %cst_408 = arith.constant dense<0.000000e+00> : vector<8x32xf32>
    %773 = tpu.matmul %770, %772, %cst_408 {dimension_numbers = #tpu.dot_dimension_numbers<[1], [0], [0], [1], [0, 0, 1, 1], [], []>} : vector<8x8xbf16>, vector<8x32xbf16>, vector<8x32xf32> -> vector<8x32xf32>
    %774 = arith.addf %726, %773 : vector<8x32xf32>
    %c25 = arith.constant 25 : index
    %c0_409 = arith.constant 0 : index
    %c0_410 = arith.constant 0 : index
    %775 = vector.load %arg11[%c25, %c0_409, %c0_410] : memref<36x32x8xbf16, #tpu.memory_space<vmem>>, vector<1x32x8xbf16>
    %776 = vector.shape_cast %775 : vector<1x32x8xbf16> to vector<32x8xbf16>
    %cst_411 = arith.constant dense<0.000000e+00> : vector<8x8xf32>
    %777 = tpu.matmul %720, %776, %cst_411 {dimension_numbers = #tpu.dot_dimension_numbers<[1], [0], [0], [1], [0, 0, 1, 1], [], []>} : vector<8x32xbf16>, vector<32x8xbf16>, vector<8x8xf32> -> vector<8x8xf32>
    %c25_412 = arith.constant 25 : index
    %c0_413 = arith.constant 0 : index
    %c0_414 = arith.constant 0 : index
    %778 = vector.load %arg12[%c25_412, %c0_413, %c0_414] : memref<36x1x8xf32, #tpu.memory_space<vmem>>, vector<1x1x8xf32>
    %779 = vector.shape_cast %778 : vector<1x1x8xf32> to vector<1x8xf32>
    %780 = vector.broadcast %779 : vector<1x8xf32> to vector<8x8xf32>
    %781 = arith.addf %777, %780 : vector<8x8xf32>
    %782 = arith.truncf %781 : vector<8x8xf32> to vector<8x8xbf16>
    %c29 = arith.constant 29 : index
    %c0_415 = arith.constant 0 : index
    %c0_416 = arith.constant 0 : index
    %783 = vector.load %arg11[%c29, %c0_415, %c0_416] : memref<36x32x8xbf16, #tpu.memory_space<vmem>>, vector<1x32x8xbf16>
    %784 = vector.shape_cast %783 : vector<1x32x8xbf16> to vector<32x8xbf16>
    %cst_417 = arith.constant dense<0.000000e+00> : vector<8x8xf32>
    %785 = tpu.matmul %2, %784, %cst_417 {dimension_numbers = #tpu.dot_dimension_numbers<[1], [0], [0], [1], [0, 0, 1, 1], [], []>} : vector<8x32xbf16>, vector<32x8xbf16>, vector<8x8xf32> -> vector<8x8xf32>
    %c29_418 = arith.constant 29 : index
    %c0_419 = arith.constant 0 : index
    %c0_420 = arith.constant 0 : index
    %786 = vector.load %arg12[%c29_418, %c0_419, %c0_420] : memref<36x1x8xf32, #tpu.memory_space<vmem>>, vector<1x1x8xf32>
    %787 = vector.shape_cast %786 : vector<1x1x8xf32> to vector<1x8xf32>
    %788 = vector.broadcast %787 : vector<1x8xf32> to vector<8x8xf32>
    %789 = arith.addf %785, %788 : vector<8x8xf32>
    %790 = arith.truncf %789 : vector<8x8xf32> to vector<8x8xbf16>
    %c33 = arith.constant 33 : index
    %c0_421 = arith.constant 0 : index
    %c0_422 = arith.constant 0 : index
    %791 = vector.load %arg11[%c33, %c0_421, %c0_422] : memref<36x32x8xbf16, #tpu.memory_space<vmem>>, vector<1x32x8xbf16>
    %792 = vector.shape_cast %791 : vector<1x32x8xbf16> to vector<32x8xbf16>
    %cst_423 = arith.constant dense<0.000000e+00> : vector<8x8xf32>
    %793 = tpu.matmul %2, %792, %cst_423 {dimension_numbers = #tpu.dot_dimension_numbers<[1], [0], [0], [1], [0, 0, 1, 1], [], []>} : vector<8x32xbf16>, vector<32x8xbf16>, vector<8x8xf32> -> vector<8x8xf32>
    %c33_424 = arith.constant 33 : index
    %c0_425 = arith.constant 0 : index
    %c0_426 = arith.constant 0 : index
    %794 = vector.load %arg12[%c33_424, %c0_425, %c0_426] : memref<36x1x8xf32, #tpu.memory_space<vmem>>, vector<1x1x8xf32>
    %795 = vector.shape_cast %794 : vector<1x1x8xf32> to vector<1x8xf32>
    %796 = vector.broadcast %795 : vector<1x8xf32> to vector<8x8xf32>
    %797 = arith.addf %793, %796 : vector<8x8xf32>
    %798 = arith.truncf %797 : vector<8x8xf32> to vector<8x8xbf16>
    %799 = vector.shape_cast %782 : vector<8x8xbf16> to vector<1x8x8xbf16>
    %800 = vector.shape_cast %790 : vector<8x8xbf16> to vector<1x8x8xbf16>
    "tpu.trace_start"() <{level = 10 : i32, message = "bqd,bkd->bqk"}> : () -> ()
    %cst_427 = arith.constant dense<0.000000e+00> : vector<1x8x8xf32>
    %801 = tpu.matmul %799, %800, %cst_427 {dimension_numbers = #tpu.dot_dimension_numbers<[2], [2], [1], [1], [0, 0, 0, 1, 1, 1], [0], [0]>} : vector<1x8x8xbf16>, vector<1x8x8xbf16>, vector<1x8x8xf32> -> vector<1x8x8xf32>
    "tpu.trace_stop"() : () -> ()
    %802 = vector.broadcast %13 : vector<1x1x8xf32> to vector<1x8x8xf32>
    %803 = arith.addf %801, %802 : vector<1x8x8xf32>
    %cst_428 = arith.constant dense<0xFF800000> : vector<1x8xf32>
    %804 = vector.multi_reduction <maximumf>, %803, %cst_428 [2] : vector<1x8x8xf32> to vector<1x8xf32>
    %805 = vector.shape_cast %804 : vector<1x8xf32> to vector<1x8x1xf32>
    %806 = vector.broadcast %805 : vector<1x8x1xf32> to vector<1x8x8xf32>
    %807 = arith.subf %803, %806 : vector<1x8x8xf32>
    %808 = math.exp %807 : vector<1x8x8xf32>
    %cst_429 = arith.constant dense<0.000000e+00> : vector<1x8xf32>
    %809 = vector.multi_reduction <add>, %808, %cst_429 [2] : vector<1x8x8xf32> to vector<1x8xf32>
    %810 = vector.shape_cast %809 : vector<1x8xf32> to vector<1x8x1xf32>
    %811 = tpu.reciprocal %810 {approx = true} : vector<1x8x1xf32> -> vector<1x8x1xf32>
    %812 = vector.broadcast %811 : vector<1x8x1xf32> to vector<1x8x8xf32>
    %813 = arith.mulf %808, %812 : vector<1x8x8xf32>
    %814 = arith.truncf %813 : vector<1x8x8xf32> to vector<1x8x8xbf16>
    %815 = vector.shape_cast %798 : vector<8x8xbf16> to vector<1x8x8xbf16>
    "tpu.trace_start"() <{level = 10 : i32, message = "bqk,bkd->bqd"}> : () -> ()
    %cst_430 = arith.constant dense<0.000000e+00> : vector<1x8x8xf32>
    %816 = tpu.matmul %814, %815, %cst_430 {dimension_numbers = #tpu.dot_dimension_numbers<[2], [1], [1], [2], [0, 0, 0, 1, 1, 2], [0], [0]>} : vector<1x8x8xbf16>, vector<1x8x8xbf16>, vector<1x8x8xf32> -> vector<1x8x8xf32>
    "tpu.trace_stop"() : () -> ()
    %817 = vector.shape_cast %816 : vector<1x8x8xf32> to vector<8x8xf32>
    %818 = arith.truncf %817 : vector<8x8xf32> to vector<8x8xbf16>
    %c9_431 = arith.constant 9 : index
    %c0_432 = arith.constant 0 : index
    %c0_433 = arith.constant 0 : index
    %819 = vector.load %arg13[%c9_431, %c0_432, %c0_433] : memref<12x8x32xbf16, #tpu.memory_space<vmem>>, vector<1x8x32xbf16>
    %820 = vector.shape_cast %819 : vector<1x8x32xbf16> to vector<8x32xbf16>
    %cst_434 = arith.constant dense<0.000000e+00> : vector<8x32xf32>
    %821 = tpu.matmul %818, %820, %cst_434 {dimension_numbers = #tpu.dot_dimension_numbers<[1], [0], [0], [1], [0, 0, 1, 1], [], []>} : vector<8x8xbf16>, vector<8x32xbf16>, vector<8x32xf32> -> vector<8x32xf32>
    %822 = arith.addf %774, %821 : vector<8x32xf32>
    %c26 = arith.constant 26 : index
    %c0_435 = arith.constant 0 : index
    %c0_436 = arith.constant 0 : index
    %823 = vector.load %arg11[%c26, %c0_435, %c0_436] : memref<36x32x8xbf16, #tpu.memory_space<vmem>>, vector<1x32x8xbf16>
    %824 = vector.shape_cast %823 : vector<1x32x8xbf16> to vector<32x8xbf16>
    %cst_437 = arith.constant dense<0.000000e+00> : vector<8x8xf32>
    %825 = tpu.matmul %720, %824, %cst_437 {dimension_numbers = #tpu.dot_dimension_numbers<[1], [0], [0], [1], [0, 0, 1, 1], [], []>} : vector<8x32xbf16>, vector<32x8xbf16>, vector<8x8xf32> -> vector<8x8xf32>
    %c26_438 = arith.constant 26 : index
    %c0_439 = arith.constant 0 : index
    %c0_440 = arith.constant 0 : index
    %826 = vector.load %arg12[%c26_438, %c0_439, %c0_440] : memref<36x1x8xf32, #tpu.memory_space<vmem>>, vector<1x1x8xf32>
    %827 = vector.shape_cast %826 : vector<1x1x8xf32> to vector<1x8xf32>
    %828 = vector.broadcast %827 : vector<1x8xf32> to vector<8x8xf32>
    %829 = arith.addf %825, %828 : vector<8x8xf32>
    %830 = arith.truncf %829 : vector<8x8xf32> to vector<8x8xbf16>
    %c30 = arith.constant 30 : index
    %c0_441 = arith.constant 0 : index
    %c0_442 = arith.constant 0 : index
    %831 = vector.load %arg11[%c30, %c0_441, %c0_442] : memref<36x32x8xbf16, #tpu.memory_space<vmem>>, vector<1x32x8xbf16>
    %832 = vector.shape_cast %831 : vector<1x32x8xbf16> to vector<32x8xbf16>
    %cst_443 = arith.constant dense<0.000000e+00> : vector<8x8xf32>
    %833 = tpu.matmul %2, %832, %cst_443 {dimension_numbers = #tpu.dot_dimension_numbers<[1], [0], [0], [1], [0, 0, 1, 1], [], []>} : vector<8x32xbf16>, vector<32x8xbf16>, vector<8x8xf32> -> vector<8x8xf32>
    %c30_444 = arith.constant 30 : index
    %c0_445 = arith.constant 0 : index
    %c0_446 = arith.constant 0 : index
    %834 = vector.load %arg12[%c30_444, %c0_445, %c0_446] : memref<36x1x8xf32, #tpu.memory_space<vmem>>, vector<1x1x8xf32>
    %835 = vector.shape_cast %834 : vector<1x1x8xf32> to vector<1x8xf32>
    %836 = vector.broadcast %835 : vector<1x8xf32> to vector<8x8xf32>
    %837 = arith.addf %833, %836 : vector<8x8xf32>
    %838 = arith.truncf %837 : vector<8x8xf32> to vector<8x8xbf16>
    %c34 = arith.constant 34 : index
    %c0_447 = arith.constant 0 : index
    %c0_448 = arith.constant 0 : index
    %839 = vector.load %arg11[%c34, %c0_447, %c0_448] : memref<36x32x8xbf16, #tpu.memory_space<vmem>>, vector<1x32x8xbf16>
    %840 = vector.shape_cast %839 : vector<1x32x8xbf16> to vector<32x8xbf16>
    %cst_449 = arith.constant dense<0.000000e+00> : vector<8x8xf32>
    %841 = tpu.matmul %2, %840, %cst_449 {dimension_numbers = #tpu.dot_dimension_numbers<[1], [0], [0], [1], [0, 0, 1, 1], [], []>} : vector<8x32xbf16>, vector<32x8xbf16>, vector<8x8xf32> -> vector<8x8xf32>
    %c34_450 = arith.constant 34 : index
    %c0_451 = arith.constant 0 : index
    %c0_452 = arith.constant 0 : index
    %842 = vector.load %arg12[%c34_450, %c0_451, %c0_452] : memref<36x1x8xf32, #tpu.memory_space<vmem>>, vector<1x1x8xf32>
    %843 = vector.shape_cast %842 : vector<1x1x8xf32> to vector<1x8xf32>
    %844 = vector.broadcast %843 : vector<1x8xf32> to vector<8x8xf32>
    %845 = arith.addf %841, %844 : vector<8x8xf32>
    %846 = arith.truncf %845 : vector<8x8xf32> to vector<8x8xbf16>
    %847 = vector.shape_cast %830 : vector<8x8xbf16> to vector<1x8x8xbf16>
    %848 = vector.shape_cast %838 : vector<8x8xbf16> to vector<1x8x8xbf16>
    "tpu.trace_start"() <{level = 10 : i32, message = "bqd,bkd->bqk"}> : () -> ()
    %cst_453 = arith.constant dense<0.000000e+00> : vector<1x8x8xf32>
    %849 = tpu.matmul %847, %848, %cst_453 {dimension_numbers = #tpu.dot_dimension_numbers<[2], [2], [1], [1], [0, 0, 0, 1, 1, 1], [0], [0]>} : vector<1x8x8xbf16>, vector<1x8x8xbf16>, vector<1x8x8xf32> -> vector<1x8x8xf32>
    "tpu.trace_stop"() : () -> ()
    %850 = vector.broadcast %13 : vector<1x1x8xf32> to vector<1x8x8xf32>
    %851 = arith.addf %849, %850 : vector<1x8x8xf32>
    %cst_454 = arith.constant dense<0xFF800000> : vector<1x8xf32>
    %852 = vector.multi_reduction <maximumf>, %851, %cst_454 [2] : vector<1x8x8xf32> to vector<1x8xf32>
    %853 = vector.shape_cast %852 : vector<1x8xf32> to vector<1x8x1xf32>
    %854 = vector.broadcast %853 : vector<1x8x1xf32> to vector<1x8x8xf32>
    %855 = arith.subf %851, %854 : vector<1x8x8xf32>
    %856 = math.exp %855 : vector<1x8x8xf32>
    %cst_455 = arith.constant dense<0.000000e+00> : vector<1x8xf32>
    %857 = vector.multi_reduction <add>, %856, %cst_455 [2] : vector<1x8x8xf32> to vector<1x8xf32>
    %858 = vector.shape_cast %857 : vector<1x8xf32> to vector<1x8x1xf32>
    %859 = tpu.reciprocal %858 {approx = true} : vector<1x8x1xf32> -> vector<1x8x1xf32>
    %860 = vector.broadcast %859 : vector<1x8x1xf32> to vector<1x8x8xf32>
    %861 = arith.mulf %856, %860 : vector<1x8x8xf32>
    %862 = arith.truncf %861 : vector<1x8x8xf32> to vector<1x8x8xbf16>
    %863 = vector.shape_cast %846 : vector<8x8xbf16> to vector<1x8x8xbf16>
    "tpu.trace_start"() <{level = 10 : i32, message = "bqk,bkd->bqd"}> : () -> ()
    %cst_456 = arith.constant dense<0.000000e+00> : vector<1x8x8xf32>
    %864 = tpu.matmul %862, %863, %cst_456 {dimension_numbers = #tpu.dot_dimension_numbers<[2], [1], [1], [2], [0, 0, 0, 1, 1, 2], [0], [0]>} : vector<1x8x8xbf16>, vector<1x8x8xbf16>, vector<1x8x8xf32> -> vector<1x8x8xf32>
    "tpu.trace_stop"() : () -> ()
    %865 = vector.shape_cast %864 : vector<1x8x8xf32> to vector<8x8xf32>
    %866 = arith.truncf %865 : vector<8x8xf32> to vector<8x8xbf16>
    %c10_457 = arith.constant 10 : index
    %c0_458 = arith.constant 0 : index
    %c0_459 = arith.constant 0 : index
    %867 = vector.load %arg13[%c10_457, %c0_458, %c0_459] : memref<12x8x32xbf16, #tpu.memory_space<vmem>>, vector<1x8x32xbf16>
    %868 = vector.shape_cast %867 : vector<1x8x32xbf16> to vector<8x32xbf16>
    %cst_460 = arith.constant dense<0.000000e+00> : vector<8x32xf32>
    %869 = tpu.matmul %866, %868, %cst_460 {dimension_numbers = #tpu.dot_dimension_numbers<[1], [0], [0], [1], [0, 0, 1, 1], [], []>} : vector<8x8xbf16>, vector<8x32xbf16>, vector<8x32xf32> -> vector<8x32xf32>
    %870 = arith.addf %822, %869 : vector<8x32xf32>
    %c27 = arith.constant 27 : index
    %c0_461 = arith.constant 0 : index
    %c0_462 = arith.constant 0 : index
    %871 = vector.load %arg11[%c27, %c0_461, %c0_462] : memref<36x32x8xbf16, #tpu.memory_space<vmem>>, vector<1x32x8xbf16>
    %872 = vector.shape_cast %871 : vector<1x32x8xbf16> to vector<32x8xbf16>
    %cst_463 = arith.constant dense<0.000000e+00> : vector<8x8xf32>
    %873 = tpu.matmul %720, %872, %cst_463 {dimension_numbers = #tpu.dot_dimension_numbers<[1], [0], [0], [1], [0, 0, 1, 1], [], []>} : vector<8x32xbf16>, vector<32x8xbf16>, vector<8x8xf32> -> vector<8x8xf32>
    %c27_464 = arith.constant 27 : index
    %c0_465 = arith.constant 0 : index
    %c0_466 = arith.constant 0 : index
    %874 = vector.load %arg12[%c27_464, %c0_465, %c0_466] : memref<36x1x8xf32, #tpu.memory_space<vmem>>, vector<1x1x8xf32>
    %875 = vector.shape_cast %874 : vector<1x1x8xf32> to vector<1x8xf32>
    %876 = vector.broadcast %875 : vector<1x8xf32> to vector<8x8xf32>
    %877 = arith.addf %873, %876 : vector<8x8xf32>
    %878 = arith.truncf %877 : vector<8x8xf32> to vector<8x8xbf16>
    %c31 = arith.constant 31 : index
    %c0_467 = arith.constant 0 : index
    %c0_468 = arith.constant 0 : index
    %879 = vector.load %arg11[%c31, %c0_467, %c0_468] : memref<36x32x8xbf16, #tpu.memory_space<vmem>>, vector<1x32x8xbf16>
    %880 = vector.shape_cast %879 : vector<1x32x8xbf16> to vector<32x8xbf16>
    %cst_469 = arith.constant dense<0.000000e+00> : vector<8x8xf32>
    %881 = tpu.matmul %2, %880, %cst_469 {dimension_numbers = #tpu.dot_dimension_numbers<[1], [0], [0], [1], [0, 0, 1, 1], [], []>} : vector<8x32xbf16>, vector<32x8xbf16>, vector<8x8xf32> -> vector<8x8xf32>
    %c31_470 = arith.constant 31 : index
    %c0_471 = arith.constant 0 : index
    %c0_472 = arith.constant 0 : index
    %882 = vector.load %arg12[%c31_470, %c0_471, %c0_472] : memref<36x1x8xf32, #tpu.memory_space<vmem>>, vector<1x1x8xf32>
    %883 = vector.shape_cast %882 : vector<1x1x8xf32> to vector<1x8xf32>
    %884 = vector.broadcast %883 : vector<1x8xf32> to vector<8x8xf32>
    %885 = arith.addf %881, %884 : vector<8x8xf32>
    %886 = arith.truncf %885 : vector<8x8xf32> to vector<8x8xbf16>
    %c35 = arith.constant 35 : index
    %c0_473 = arith.constant 0 : index
    %c0_474 = arith.constant 0 : index
    %887 = vector.load %arg11[%c35, %c0_473, %c0_474] : memref<36x32x8xbf16, #tpu.memory_space<vmem>>, vector<1x32x8xbf16>
    %888 = vector.shape_cast %887 : vector<1x32x8xbf16> to vector<32x8xbf16>
    %cst_475 = arith.constant dense<0.000000e+00> : vector<8x8xf32>
    %889 = tpu.matmul %2, %888, %cst_475 {dimension_numbers = #tpu.dot_dimension_numbers<[1], [0], [0], [1], [0, 0, 1, 1], [], []>} : vector<8x32xbf16>, vector<32x8xbf16>, vector<8x8xf32> -> vector<8x8xf32>
    %c35_476 = arith.constant 35 : index
    %c0_477 = arith.constant 0 : index
    %c0_478 = arith.constant 0 : index
    %890 = vector.load %arg12[%c35_476, %c0_477, %c0_478] : memref<36x1x8xf32, #tpu.memory_space<vmem>>, vector<1x1x8xf32>
    %891 = vector.shape_cast %890 : vector<1x1x8xf32> to vector<1x8xf32>
    %892 = vector.broadcast %891 : vector<1x8xf32> to vector<8x8xf32>
    %893 = arith.addf %889, %892 : vector<8x8xf32>
    %894 = arith.truncf %893 : vector<8x8xf32> to vector<8x8xbf16>
    %895 = vector.shape_cast %878 : vector<8x8xbf16> to vector<1x8x8xbf16>
    %896 = vector.shape_cast %886 : vector<8x8xbf16> to vector<1x8x8xbf16>
    "tpu.trace_start"() <{level = 10 : i32, message = "bqd,bkd->bqk"}> : () -> ()
    %cst_479 = arith.constant dense<0.000000e+00> : vector<1x8x8xf32>
    %897 = tpu.matmul %895, %896, %cst_479 {dimension_numbers = #tpu.dot_dimension_numbers<[2], [2], [1], [1], [0, 0, 0, 1, 1, 1], [0], [0]>} : vector<1x8x8xbf16>, vector<1x8x8xbf16>, vector<1x8x8xf32> -> vector<1x8x8xf32>
    "tpu.trace_stop"() : () -> ()
    %898 = vector.broadcast %13 : vector<1x1x8xf32> to vector<1x8x8xf32>
    %899 = arith.addf %897, %898 : vector<1x8x8xf32>
    %cst_480 = arith.constant dense<0xFF800000> : vector<1x8xf32>
    %900 = vector.multi_reduction <maximumf>, %899, %cst_480 [2] : vector<1x8x8xf32> to vector<1x8xf32>
    %901 = vector.shape_cast %900 : vector<1x8xf32> to vector<1x8x1xf32>
    %902 = vector.broadcast %901 : vector<1x8x1xf32> to vector<1x8x8xf32>
    %903 = arith.subf %899, %902 : vector<1x8x8xf32>
    %904 = math.exp %903 : vector<1x8x8xf32>
    %cst_481 = arith.constant dense<0.000000e+00> : vector<1x8xf32>
    %905 = vector.multi_reduction <add>, %904, %cst_481 [2] : vector<1x8x8xf32> to vector<1x8xf32>
    %906 = vector.shape_cast %905 : vector<1x8xf32> to vector<1x8x1xf32>
    %907 = tpu.reciprocal %906 {approx = true} : vector<1x8x1xf32> -> vector<1x8x1xf32>
    %908 = vector.broadcast %907 : vector<1x8x1xf32> to vector<1x8x8xf32>
    %909 = arith.mulf %904, %908 : vector<1x8x8xf32>
    %910 = arith.truncf %909 : vector<1x8x8xf32> to vector<1x8x8xbf16>
    %911 = vector.shape_cast %894 : vector<8x8xbf16> to vector<1x8x8xbf16>
    "tpu.trace_start"() <{level = 10 : i32, message = "bqk,bkd->bqd"}> : () -> ()
    %cst_482 = arith.constant dense<0.000000e+00> : vector<1x8x8xf32>
    %912 = tpu.matmul %910, %911, %cst_482 {dimension_numbers = #tpu.dot_dimension_numbers<[2], [1], [1], [2], [0, 0, 0, 1, 1, 2], [0], [0]>} : vector<1x8x8xbf16>, vector<1x8x8xbf16>, vector<1x8x8xf32> -> vector<1x8x8xf32>
    "tpu.trace_stop"() : () -> ()
    %913 = vector.shape_cast %912 : vector<1x8x8xf32> to vector<8x8xf32>
    %914 = arith.truncf %913 : vector<8x8xf32> to vector<8x8xbf16>
    %c11_483 = arith.constant 11 : index
    %c0_484 = arith.constant 0 : index
    %c0_485 = arith.constant 0 : index
    %915 = vector.load %arg13[%c11_483, %c0_484, %c0_485] : memref<12x8x32xbf16, #tpu.memory_space<vmem>>, vector<1x8x32xbf16>
    %916 = vector.shape_cast %915 : vector<1x8x32xbf16> to vector<8x32xbf16>
    %cst_486 = arith.constant dense<0.000000e+00> : vector<8x32xf32>
    %917 = tpu.matmul %914, %916, %cst_486 {dimension_numbers = #tpu.dot_dimension_numbers<[1], [0], [0], [1], [0, 0, 1, 1], [], []>} : vector<8x8xbf16>, vector<8x32xbf16>, vector<8x32xf32> -> vector<8x32xf32>
    %918 = arith.addf %870, %917 : vector<8x32xf32>
    %919 = arith.addf %265, %918 : vector<8x32xf32>
    %c4_487 = arith.constant 4 : index
    %c0_488 = arith.constant 0 : index
    %920 = vector.load %arg5[%c4_487, %c0_488] : memref<6x32xf32, #tpu.memory_space<vmem>>, vector<1x32xf32>
    %921 = vector.shape_cast %920 : vector<1x32xf32> to vector<32xf32>
    %c4_489 = arith.constant 4 : index
    %c0_490 = arith.constant 0 : index
    %922 = vector.load %arg6[%c4_489, %c0_490] : memref<6x32xf32, #tpu.memory_space<vmem>>, vector<1x32xf32>
    %923 = vector.shape_cast %922 : vector<1x32xf32> to vector<32xf32>
    %cst_491 = arith.constant dense<0.000000e+00> : vector<8xf32>
    %924 = vector.multi_reduction <add>, %919, %cst_491 [1] : vector<8x32xf32> to vector<8xf32>
    %925 = vector.shape_cast %924 : vector<8xf32> to vector<8x1xf32>
    %cst_492 = arith.constant 3.200000e+01 : f32
    %926 = vector.broadcast %cst_492 : f32 to vector<8x1xf32>
    %927 = arith.divf %925, %926 : vector<8x1xf32>
    %928 = vector.broadcast %927 : vector<8x1xf32> to vector<8x32xf32>
    %929 = arith.subf %919, %928 : vector<8x32xf32>
    %930 = arith.mulf %929, %929 : vector<8x32xf32>
    %cst_493 = arith.constant dense<0.000000e+00> : vector<8xf32>
    %931 = vector.multi_reduction <add>, %930, %cst_493 [1] : vector<8x32xf32> to vector<8xf32>
    %932 = vector.shape_cast %931 : vector<8xf32> to vector<8x1xf32>
    %cst_494 = arith.constant 3.200000e+01 : f32
    %933 = vector.broadcast %cst_494 : f32 to vector<8x1xf32>
    %934 = arith.divf %932, %933 : vector<8x1xf32>
    %935 = vector.broadcast %927 : vector<8x1xf32> to vector<8x32xf32>
    %936 = arith.subf %919, %935 : vector<8x32xf32>
    %cst_495 = arith.constant 9.99999974E-6 : f32
    %937 = vector.broadcast %cst_495 : f32 to vector<8x1xf32>
    %938 = arith.addf %934, %937 : vector<8x1xf32>
    %939 = math.rsqrt %938 : vector<8x1xf32>
    %940 = vector.broadcast %939 : vector<8x1xf32> to vector<8x32xf32>
    %941 = arith.mulf %936, %940 : vector<8x32xf32>
    %942 = vector.shape_cast %921 : vector<32xf32> to vector<1x32xf32>
    %943 = vector.broadcast %942 : vector<1x32xf32> to vector<8x32xf32>
    %944 = arith.mulf %941, %943 : vector<8x32xf32>
    %945 = vector.shape_cast %923 : vector<32xf32> to vector<1x32xf32>
    %946 = vector.broadcast %945 : vector<1x32xf32> to vector<8x32xf32>
    %947 = arith.addf %944, %946 : vector<8x32xf32>
    %948 = arith.truncf %947 : vector<8x32xf32> to vector<8x32xbf16>
    %c0_496 = arith.constant 0 : index
    %c0_497 = arith.constant 0 : index
    %949 = vector.load %arg15[%c0_496, %c0_497] : memref<32x64xbf16, #tpu.memory_space<vmem>>, vector<32x64xbf16>
    %cst_498 = arith.constant dense<0.000000e+00> : vector<8x64xf32>
    %950 = tpu.matmul %948, %949, %cst_498 {dimension_numbers = #tpu.dot_dimension_numbers<[1], [0], [0], [1], [0, 0, 1, 1], [], []>} : vector<8x32xbf16>, vector<32x64xbf16>, vector<8x64xf32> -> vector<8x64xf32>
    %c0_499 = arith.constant 0 : index
    %c0_500 = arith.constant 0 : index
    %951 = vector.load %arg16[%c0_499, %c0_500] : memref<1x64xf32, #tpu.memory_space<vmem>>, vector<1x64xf32>
    %952 = vector.broadcast %951 : vector<1x64xf32> to vector<8x64xf32>
    %953 = arith.addf %950, %952 : vector<8x64xf32>
    %cst_501 = arith.constant 0.000000e+00 : f32
    %954 = vector.broadcast %cst_501 : f32 to vector<8x64xf32>
    %955 = arith.maximumf %953, %954 : vector<8x64xf32>
    %956 = arith.truncf %955 : vector<8x64xf32> to vector<8x64xbf16>
    %c0_502 = arith.constant 0 : index
    %c0_503 = arith.constant 0 : index
    %957 = vector.load %arg17[%c0_502, %c0_503] : memref<64x32xbf16, #tpu.memory_space<vmem>>, vector<64x32xbf16>
    %cst_504 = arith.constant dense<0.000000e+00> : vector<8x32xf32>
    %958 = tpu.matmul %956, %957, %cst_504 {dimension_numbers = #tpu.dot_dimension_numbers<[1], [0], [0], [1], [0, 0, 1, 1], [], []>} : vector<8x64xbf16>, vector<64x32xbf16>, vector<8x32xf32> -> vector<8x32xf32>
    %c0_505 = arith.constant 0 : index
    %c0_506 = arith.constant 0 : index
    %959 = vector.load %arg18[%c0_505, %c0_506] : memref<1x32xf32, #tpu.memory_space<vmem>>, vector<1x32xf32>
    %960 = vector.broadcast %959 : vector<1x32xf32> to vector<8x32xf32>
    %961 = arith.addf %958, %960 : vector<8x32xf32>
    %962 = arith.addf %961, %947 : vector<8x32xf32>
    %c5_507 = arith.constant 5 : index
    %c0_508 = arith.constant 0 : index
    %963 = vector.load %arg5[%c5_507, %c0_508] : memref<6x32xf32, #tpu.memory_space<vmem>>, vector<1x32xf32>
    %964 = vector.shape_cast %963 : vector<1x32xf32> to vector<32xf32>
    %c5_509 = arith.constant 5 : index
    %c0_510 = arith.constant 0 : index
    %965 = vector.load %arg6[%c5_509, %c0_510] : memref<6x32xf32, #tpu.memory_space<vmem>>, vector<1x32xf32>
    %966 = vector.shape_cast %965 : vector<1x32xf32> to vector<32xf32>
    %cst_511 = arith.constant dense<0.000000e+00> : vector<8xf32>
    %967 = vector.multi_reduction <add>, %962, %cst_511 [1] : vector<8x32xf32> to vector<8xf32>
    %968 = vector.shape_cast %967 : vector<8xf32> to vector<8x1xf32>
    %cst_512 = arith.constant 3.200000e+01 : f32
    %969 = vector.broadcast %cst_512 : f32 to vector<8x1xf32>
    %970 = arith.divf %968, %969 : vector<8x1xf32>
    %971 = vector.broadcast %970 : vector<8x1xf32> to vector<8x32xf32>
    %972 = arith.subf %962, %971 : vector<8x32xf32>
    %973 = arith.mulf %972, %972 : vector<8x32xf32>
    %cst_513 = arith.constant dense<0.000000e+00> : vector<8xf32>
    %974 = vector.multi_reduction <add>, %973, %cst_513 [1] : vector<8x32xf32> to vector<8xf32>
    %975 = vector.shape_cast %974 : vector<8xf32> to vector<8x1xf32>
    %cst_514 = arith.constant 3.200000e+01 : f32
    %976 = vector.broadcast %cst_514 : f32 to vector<8x1xf32>
    %977 = arith.divf %975, %976 : vector<8x1xf32>
    %978 = vector.broadcast %970 : vector<8x1xf32> to vector<8x32xf32>
    %979 = arith.subf %962, %978 : vector<8x32xf32>
    %cst_515 = arith.constant 9.99999974E-6 : f32
    %980 = vector.broadcast %cst_515 : f32 to vector<8x1xf32>
    %981 = arith.addf %977, %980 : vector<8x1xf32>
    %982 = math.rsqrt %981 : vector<8x1xf32>
    %983 = vector.broadcast %982 : vector<8x1xf32> to vector<8x32xf32>
    %984 = arith.mulf %979, %983 : vector<8x32xf32>
    %985 = vector.shape_cast %964 : vector<32xf32> to vector<1x32xf32>
    %986 = vector.broadcast %985 : vector<1x32xf32> to vector<8x32xf32>
    %987 = arith.mulf %984, %986 : vector<8x32xf32>
    %988 = vector.shape_cast %966 : vector<32xf32> to vector<1x32xf32>
    %989 = vector.broadcast %988 : vector<1x32xf32> to vector<8x32xf32>
    %990 = arith.addf %987, %989 : vector<8x32xf32>
    %c0_516 = arith.constant 0 : index
    %c0_517 = arith.constant 0 : index
    %991 = vector.load %arg19[%c0_516, %c0_517] : memref<8x32xf32, #tpu.memory_space<vmem>>, vector<8x32xf32>
    tpu.vector_store %arg19[%c0_516, %c0_517], %990 {strides = array<i32>} : memref<8x32xf32, #tpu.memory_space<vmem>>, vector<8x32xf32>,
    return
  }
  func.func @transform_0(%arg0: i32) -> (i32, i32) {
    %c0_i32 = arith.constant 0 : i32
    %c0_i32_0 = arith.constant 0 : i32
    return %arg0, %c0_i32 : i32, i32
  }
  func.func @transform_1(%arg0: i32) -> (i32, i32, i32) {
    %c0_i32 = arith.constant 0 : i32
    %c0_i32_0 = arith.constant 0 : i32
    %c0_i32_1 = arith.constant 0 : i32
    return %arg0, %c0_i32, %c0_i32_0 : i32, i32, i32
  }
  func.func @transform_2(%arg0: i32) -> (i32, i32) {
    %c0_i32 = arith.constant 0 : i32
    %c0_i32_0 = arith.constant 0 : i32
    return %arg0, %c0_i32 : i32, i32
  }
  func.func @transform_3(%arg0: i32) -> (i32, i32, i32) {
    %c0_i32 = arith.constant 0 : i32
    %c0_i32_0 = arith.constant 0 : i32
    %c0_i32_1 = arith.constant 0 : i32
    return %arg0, %c0_i32, %c0_i32_0 : i32, i32, i32
  }
  func.func @transform_4(%arg0: i32) -> (i32, i32) {
    %c0_i32 = arith.constant 0 : i32
    %c0_i32_0 = arith.constant 0 : i32
    %c0_i32_1 = arith.constant 0 : i32
    return %c0_i32, %c0_i32_0 : i32, i32
  }
  func.func @transform_5(%arg0: i32) -> (i32, i32) {
    %c0_i32 = arith.constant 0 : i32
    %c0_i32_0 = arith.constant 0 : i32
    %c0_i32_1 = arith.constant 0 : i32
    return %c0_i32, %c0_i32_0 : i32, i32
  }
  func.func @transform_6(%arg0: i32) -> (i32, i32, i32) {
    %c0_i32 = arith.constant 0 : i32
    %c0_i32_0 = arith.constant 0 : i32
    %c0_i32_1 = arith.constant 0 : i32
    %c0_i32_2 = arith.constant 0 : i32
    return %c0_i32, %c0_i32_0, %c0_i32_1 : i32, i32, i32
  }
  func.func @transform_7(%arg0: i32) -> (i32, i32, i32) {
    %c0_i32 = arith.constant 0 : i32
    %c0_i32_0 = arith.constant 0 : i32
    %c0_i32_1 = arith.constant 0 : i32
    %c0_i32_2 = arith.constant 0 : i32
    return %c0_i32, %c0_i32_0, %c0_i32_1 : i32, i32, i32
  }
  func.func @transform_8(%arg0: i32) -> (i32, i32, i32) {
    %c0_i32 = arith.constant 0 : i32
    %c0_i32_0 = arith.constant 0 : i32
    %c0_i32_1 = arith.constant 0 : i32
    %c0_i32_2 = arith.constant 0 : i32
    return %c0_i32, %c0_i32_0, %c0_i32_1 : i32, i32, i32
  }
  func.func @transform_9(%arg0: i32) -> (i32, i32) {
    %c0_i32 = arith.constant 0 : i32
    %c0_i32_0 = arith.constant 0 : i32
    %c0_i32_1 = arith.constant 0 : i32
    return %c0_i32, %c0_i32_0 : i32, i32
  }
  func.func @transform_10(%arg0: i32) -> (i32, i32, i32) {
    %c0_i32 = arith.constant 0 : i32
    %c0_i32_0 = arith.constant 0 : i32
    %c0_i32_1 = arith.constant 0 : i32
    %c0_i32_2 = arith.constant 0 : i32
    return %c0_i32, %c0_i32_0, %c0_i32_1 : i32, i32, i32
  }
  func.func @transform_11(%arg0: i32) -> (i32, i32, i32) {
    %c0_i32 = arith.constant 0 : i32
    %c0_i32_0 = arith.constant 0 : i32
    %c0_i32_1 = arith.constant 0 : i32
    %c0_i32_2 = arith.constant 0 : i32
    return %c0_i32, %c0_i32_0, %c0_i32_1 : i32, i32, i32
  }
  func.func @transform_12(%arg0: i32) -> (i32, i32, i32) {
    %c0_i32 = arith.constant 0 : i32
    %c0_i32_0 = arith.constant 0 : i32
    %c0_i32_1 = arith.constant 0 : i32
    %c0_i32_2 = arith.constant 0 : i32
    return %c0_i32, %c0_i32_0, %c0_i32_1 : i32, i32, i32
  }
  func.func @transform_13(%arg0: i32) -> (i32, i32) {
    %c0_i32 = arith.constant 0 : i32
    %c0_i32_0 = arith.constant 0 : i32
    %c0_i32_1 = arith.constant 0 : i32
    return %c0_i32, %c0_i32_0 : i32, i32
  }
  func.func @transform_14(%arg0: i32) -> (i32, i32) {
    %c0_i32 = arith.constant 0 : i32
    %c0_i32_0 = arith.constant 0 : i32
    %c0_i32_1 = arith.constant 0 : i32
    return %c0_i32, %c0_i32_0 : i32, i32
  }
  func.func @transform_15(%arg0: i32) -> (i32, i32) {
    %c0_i32 = arith.constant 0 : i32
    %c0_i32_0 = arith.constant 0 : i32
    %c0_i32_1 = arith.constant 0 : i32
    return %c0_i32, %c0_i32_0 : i32, i32
  }
  func.func @transform_16(%arg0: i32) -> (i32, i32) {
    %c0_i32 = arith.constant 0 : i32
    %c0_i32_0 = arith.constant 0 : i32
    %c0_i32_1 = arith.constant 0 : i32
    return %c0_i32, %c0_i32_0 : i32, i32
  }
  func.func @transform_17(%arg0: i32) -> (i32, i32) {
    %c0_i32 = arith.constant 0 : i32
    %c0_i32_0 = arith.constant 0 : i32
    %c0_i32_1 = arith.constant 0 : i32
    return %c0_i32, %c0_i32_0 : i32, i32
  }
  func.func @transform_18(%arg0: i32) -> (i32, i32) {
    %c0_i32 = arith.constant 0 : i32
    %c0_i32_0 = arith.constant 0 : i32
    return %arg0, %c0_i32 : i32, i32
  }
}

</mosaic_0001>

<bundles_post_ra>
// kernel: tpu_custom_call.1
= control target key start
LH: loop header
LB: loop body
LE: loop exit
PB: predicated region body
PF: predicated region fallthrough
CT: control target
= control target key end

     0   :  { %s6119_s0 = inlined_call_operand.vmem [shape: f32[16,32], index: 0, kind: input, shape index: {}]   ;;  %s6120_s1 = inlined_call_operand.vmem [shape: f32[2,1,8], index: 1, kind: input, shape index: {}]   ;;  %s6121_s2 = inlined_call_operand.vmem [shape: f32[16,32], index: 2, kind: input, shape index: {}]   ;;  %s6122_s3 = inlined_call_operand.vmem [shape: f32[2,1,8], index: 3, kind: input, shape index: {}]   ;;  %s6123_s4 = inlined_call_operand.vmem [shape: f32[6,32], index: 4, kind: input, shape index: {}]   ;;  %s6124_s5 = inlined_call_operand.vmem [shape: f32[6,32], index: 5, kind: input, shape index: {}]   ;;  %s6125_s6 = inlined_call_operand.vmem [shape: bf16[12,32,8], index: 6, kind: input, shape index: {}]   ;;  %s6126_s7 = inlined_call_operand.vmem [shape: f32[12,1,8], index: 7, kind: input, shape index: {}]   ;;  %s6127_s8 = inlined_call_operand.vmem [shape: bf16[4,8,32], index: 8, kind: input, shape index: {}]   ;;  %s6128_s9 = inlined_call_operand.vmem [shape: f32[1,32], index: 9, kind: input, shape index: {}]   ;;  %s6129_s10 = inlined_call_operand.vmem [shape: bf16[36,32,8], index: 10, kind: input, shape index: {}]   ;;  %s6130_s11 = inlined_call_operand.vmem [shape: f32[36,1,8], index: 11, kind: input, shape index: {}]   ;;  %s6131_s12 = inlined_call_operand.vmem [shape: bf16[12,8,32], index: 12, kind: input, shape index: {}]   ;;  %s6132_s13 = inlined_call_operand.vmem [shape: f32[3,32], index: 13, kind: input, shape index: {}]   ;;  %s6133_s14 = inlined_call_operand.vmem [shape: bf16[32,64], index: 14, kind: input, shape index: {}]   ;;  %s6134_s15 = inlined_call_operand.vmem [shape: f32[1,64], index: 15, kind: input, shape index: {}]   ;;  %s6135_s16 = inlined_call_operand.vmem [shape: bf16[64,32], index: 16, kind: input, shape index: {}]   ;;  %s6136_s17 = inlined_call_operand.vmem [shape: f32[1,32], index: 17, kind: input, shape index: {}]   ;;  %s6137_s18 = inlined_call_operand.hbm [shape: f32[16,32], index: 18, kind: output, shape index: {}]  }
   0x1   :  { %6146 = sst [smem:[#allocation11_spill]] %s6119_s0 }
   0x2   :  { %6147 = sst [smem:[#allocation12_spill]] %s6120_s1 }
   0x3   :  { %6148 = sst [smem:[#allocation13_spill]] %s6121_s2 }
   0x4   :  { %6149 = sst [smem:[#allocation14_spill]] %s6122_s3 }
   0x5   :  { %6150 = sst [smem:[#allocation15_spill]] %s6125_s6 }
   0x6   :  { %23 = vsyncpa [#allocation3], 0 }
   0x7   :  { %25 = vsyncpa [#allocation3 + $0x1], 0  ;;  %s5149_s27 = smov 0   ;;  %s5151_s28 = smov 0  }
   0x8   :  { %s5153_s29 = smov 0   ;;  %s5155_s30 = smov 0  }
   0x9 LB: > { %6151 = sst [smem:[#allocation5_spill]] %s5038_s27  ;;  %s5170_s0 = sadd.s32 4294967295, %s5050_s30   ;;  %s5050_s30 = sphi %s5155_s30, %s6168_s30   ;;  %s5046_s29 = sphi %s5153_s29, %s6170_s29   ;;  %s5042_s28 = sphi %s5151_s28, %s6172_s28   ;;  %s5038_s27 = sphi %s5149_s27, %s6171_s27  }
   0xa   : > { %6152 = sst [smem:[#allocation6_spill]] %s5046_s29  ;;  %s3937_s19 = sadd.s32 4294967294, %s5050_s30  }
   0xb   : > { %6153 = sst [smem:[#allocation7_spill]] %s5050_s30  ;;  %s5174_s1 = sadd.s32 1, %s5050_s30  }
   0xc   : > { %6154 = sst [smem:[#allocation8_spill]] %s5174_s1  ;;  %s436_s20 = sadd.s32 1, %s5046_s29 }
   0xd   : > { %s433_s21 = ssub.s32 %s5050_s30, %s5174_s1  ;;  %p446_p0 = scmp.ne.s32.totalorder %s5046_s29, %s5042_s28 }
   0xe   : > { %p434_p1 = scmp.eq.s32.totalorder %s433_s21, 0  ;;  %p447_p2 = scmp.eq.s32.totalorder %s5170_s0, 1 }
   0xf   : > { %p452_p3 = scmp.ne.s32.totalorder %s5042_s28, %s5038_s27  ;;  %p453_p4 = scmp.eq.s32.totalorder %s3937_s19, 1 }
  0x10   : > { %s5185_s22 = scalar_select %p434_p1, %s5046_s29, %s436_s20  }
  0x11   : > { %p5187_p5 = por %p447_p2, %p446_p0  ;;  %p5191_p6 = por %p453_p4, %p452_p3 }
  0x12   : > { %6155 = sst [smem:[#allocation9_spill]] %s5185_s22  ;;  %p3940_p7 = scmp.ge.s32.totalorder %s5050_s30, 1 }
  0x13   : > { %s6157_s23 = scalar_select %p5191_p6, 1, 0 }
  0x14   : > { %p539_p8 = scmp.lt.s32.totalorder %s5050_s30, 3 }
  0x15   : > { %6158 = sst [smem:[#allocation10_spill]] %s6157_s23 }
  0x16   : > { %p540_p9 = pnand %p3940_p7, %p539_p8 }
  0x17   : > { %p602_p10 = scmp.lt.s32.totalorder (!%p540_p9), %s5170_s0, 1  ;;  %s6159_s3 = sld [smem:[#allocation14_spill]] (!%p540_p9) }
  0x18   : > { %543 = sbr.rel (%p540_p9) target bundleno = 11465 (0x2cc9), region = 92  ;;  %s6160_s29 = sld [smem:[#allocation11_spill]] (!%p540_p9) }
  0x19   : > { %s6161_s6 = sld [smem:[#allocation15_spill]] (!%p540_p9) }
  0x1a   : > { %s6162_s22 = sld [smem:[#allocation12_spill]] (!%p540_p9) }
  0x1b   : > { %s6164_s23 = sld [smem:[#allocation13_spill]] (!%p540_p9) }
  0x1d   : > { %s5199_s24 = scalar_select %p602_p10, %s5170_s0, 1  ;;  %vm634_vm0 = vcmask 261120   ;;  %v5052_v2 = vmov 32.0   ;;  %v4842_v31 = vld [vmem:[%s6123_s4] ss:$0 sm:$0xff]  ;;  %vm783_vm5 = vcmask 64512   ;;  %v620_v59 = vlaneseq }
  0x1e   : > { %4909 = vrcp.f32 %v5052_v2  ;;  %v4843_v33 = vld [vmem:[%s6124_s5] ss:$0 sm:$0xff]  ;;  %v4845_v38 = vld [vmem:[%s6126_s7 + $0x4] ss:$0 sm:$0xff]  ;;  %v4846_v45 = vld [vmem:[%s6126_s7 + $0x8] ss:$0 sm:$0xff] }
  0x1f   : > { %s6142_s25 = sshll.u32 %s5199_s24, 3  ;;  %s5206_s20 = scalar_lea.vmem %s6159_s3, %s5199_s24  ;;  %v4699_v14 = vld [vmem:[%s6161_s6 + $0x8] sm:$0xff]  ;;  %v4698_v17 = vld [vmem:[%s6161_s6] sm:$0xff]  ;;  %v4705_v21 = vld [vmem:[%s6161_s6 + $0x18] sm:$0xff]  ;;  %vm818_vm6 = vcmask 1043456   ;;  %v621_v60 = vshrl.u32 %v620_v59, 7 }
  0x20   : > { %s605_s1 = scalar_lea.vmem %s6160_s29, %s6142_s25  ;;  %v4701_v15 = vld [vmem:[%s6161_s6 + $0x48] sm:$0xff]  ;;  %703 = vmatpush.bf16.msra.mxu0 %v4699_v14  ;;  %v4700_v18 = vld [vmem:[%s6161_s6 + $0x40] sm:$0xff]  ;;  %v4704_v23 = vld [vmem:[%s6161_s6 + $0x10] sm:$0xff]  ;;  %s608_s26 = scalar_lea.vmem %s6162_s22, %s5199_s24  ;;  %v623_v61 = vand.u32 127, %v620_v59 }
  0x21   : > { %v617_v0 = vld [vmem:[%s605_s1] sm:$0xff]  ;;  %v4703_v16 = vld [vmem:[%s6161_s6 + $0x88] sm:$0xff]  ;;  %739 = vmatpush.bf16.msra.mxu1 %v4701_v15  ;;  %v4707_v44 = vld [vmem:[%s6161_s6 + $0x58] sm:$0xff]  ;;  %s6163_s30 = sshll.u32 %s5199_s24, 3  ;;  %s599_s24 = sand.u32 1, %s5042_s28  }
  0x22   : > { %v635_v1 = vsel %vm634_vm0, %v617_v0, 0.0  ;;  %775 = vmatpush.bf16.msra.mxu2 %v4703_v16  ;;  %v4702_v19 = vld [vmem:[%s6161_s6 + $0x80] sm:$0xff]  ;;  %v4706_v49 = vld [vmem:[%s6161_s6 + $0x50] sm:$0xff]  ;;  %vm624_vm7 = vcmp.gt.s32.totalorder %v623_v61, %v621_v60  ;;  %s612_s19 = scalar_lea.vmem %s6164_s23, %s6163_s30  ;;  %s3941_s30 = sshll.u32 %s599_s24, 3 }
  0x23   : > { %636 = vadd.xlane.f32.xlu0 %v635_v1  ;;  %v4844_v42 = vld [vmem:[%s6126_s7] ss:$0 sm:$0xff]  ;;  %v5053_v1 = vmov 0.0   ;;  %s601_s29 = scalar_lea.vmem [#allocation2], %s3941_s30  ;;  %s3833_s3 = scalar_lea.sflag [#allocation3], %s599_s24 }
  0x24   : > { %v4910_v3 = vpop.eup %4909  ;;  %704 = vmatpush.bf16.msra.mxu0 %v4698_v17  ;;  %v836_v62 = vld [vmem:[%s6127_s8] sm:$0xf]  ;;  %v625_v2 = vsel %vm624_vm7, -1e+09, %v5053_v1  ;;  %v4715_v1 = vld [vmem:[%s6161_s6 + $0xa8] sm:$0xff]  ;;  %s5008_s30 = scalar_lea.hbm %s6137_s18, 16 }
  0x25   : > { %v639_v4 = vmul.f32 32.0, %v4910_v3  ;;  %vm643_vm1 = vweird.f32 %v4910_v3  ;;  %740 = vmatpush.bf16.msra.mxu1 %v4700_v18  ;;  %v841_v63 = vsel %vm818_vm6, %v836_v62, 0 }
  0x26   : > { %776 = vmatpush.bf16.msra.mxu2 %v4702_v19 }
  0x27   : > { %v640_v5 = vsub.f32 1.0, %v639_v4 }
  0x29   : > { %v641_v6 = vmul.f32 %v4910_v3, %v640_v5  ;;  %850 = vmatpush.bf16.msrb.mxu1 %v841_v63 }
  0x2a   : > { %885 = vmatpush.bf16.msrb.mxu2 %v4705_v21  ;;  %v4708_v21 = vld [vmem:[%s6161_s6 + $0x90] sm:$0xff] }
  0x2b   : > { %v642_v7 = vadd.f32 %v4910_v3, %v641_v6 }
  0x2d   : > { %v5214_v8 = vsel %vm643_vm1, %v4910_v3, %v642_v7 }
  0x2e   : > { %886 = vmatpush.bf16.msrb.mxu2 %v4704_v23 }
  0x96   : > { %v637_v9 = vpop.xlane.xlu0 %636 }
  0x97   : > { %v645_v10 = vmul.f32 %v5214_v8, %v637_v9  ;;  %v4849_v9 = vld [vmem:[%s6126_s7 + $0x5] ss:$0 sm:$0xff] }
  0x99   : > { %v646_v11 = vsub.f32 %v617_v0, %v645_v10  ;;  %v4848_v0 = vld [vmem:[%s608_s26] ss:$0 sm:$0xff] }
  0x9a   : > { %v5296_v3 = vadd.f32 %v4848_v0, %v625_v2  ;;  %v4714_v2 = vld [vmem:[%s6161_s6 + $0xa0] sm:$0xff] }
  0x9b   : > { %v647_v12 = vmul.f32 %v646_v11, %v646_v11 }
  0x9d   : > { %v648_v13 = vsel %vm634_vm0, %v647_v12, 0.0 }
  0x9e   : > { %649 = vadd.xlane.f32.xlu0 %v648_v13 }
 0x111   : > { %v650_v20 = vpop.xlane.xlu0 %649 }
 0x112   : > { %v651_v22 = vmul.f32 %v650_v20, %v5214_v8  ;;  %v4709_v20 = vld [vmem:[%s6161_s6 + $0x98] sm:$0xff] }
 0x114   : > { %v652_v24 = vadd.f32 1e-05, %v651_v22 }
 0x116   : > { %4911 = vrsqrt.f32 %v652_v24  ;;  %vm659_vm3 = vweird.f32 %v652_v24 }
 0x11c   : > { %v4912_v25 = vpop.eup %4911 }
 0x11d   : > { %v654_v26 = vmul.f32 %v4912_v25, %v652_v24  ;;  %vm660_vm2 = vweird.f32 %v4912_v25 }
 0x11e   : > { %vm661_vm4 = vmor %vm659_vm3, %vm660_vm2 }
 0x11f   : > { %v655_v27 = vmul.f32 %v4912_v25, %v654_v26 }
 0x121   : > { %v656_v28 = vmul.f32 0.5, %v655_v27  ;;  %v4710_v27 = vld [vmem:[%s6161_s6 + $0x20] sm:$0xff] }
 0x123   : > { %v657_v29 = vsub.f32 1.5, %v656_v28 }
 0x125   : > { %v658_v30 = vmul.f32 %v4912_v25, %v657_v29  ;;  %v4713_v29 = vld [vmem:[%s6161_s6 + $0x68] sm:$0xff] }
 0x127   : > { %v662_v32 = vsel %vm661_vm4, %v4912_v25, %v658_v30  ;;  %v4711_v25 = vld [vmem:[%s6161_s6 + $0x28] sm:$0xff] }
 0x128   : > { %v663_v34 = vmul.f32 %v662_v32, %v646_v11 }
 0x12a   : > { %v665_v35 = vmul.f32 %v4842_v31, %v663_v34  ;;  %v4712_v31 = vld [vmem:[%s6161_s6 + $0x60] sm:$0xff] }
 0x12c   : > { %v5249_v36 = vadd.f32 %v4843_v33, %v665_v35  ;;  %v4847_v33 = vld [vmem:[%s6126_s7 + $0x1] ss:$0 sm:$0xff]  ;;  %v4850_v35 = vld [vmem:[%s6126_s7 + $0x9] ss:$0 sm:$0xff] }
 0x12e   : > { %v5253_v37 = vpack.c.bf16 %v5249_v36, %v5249_v36 }
 0x130   : > { %3952 = vmatmul.msk.bf16.vlgmr.msra.gmra.mxu0 %vm634_vm0, %v5253_v37  ;;  %3966 = vmatmul.msk.bf16.vlgmr.msra.gmra.mxu1 %vm634_vm0, %v5253_v37 }
 0x131   : > { %3980 = vmatmul.msk.bf16.vlgmr.msra.gmra.mxu2 %vm634_vm0, %v5253_v37 }
 0x141   : > { %3997 = vmatmul.msk.bf16.vlgmr.msrb.gmra.mxu2 %vm634_vm0, %v5253_v37 }
 0x1ad   : > { %v706_v39 = vpop.f32.mrf.mxu0  ;;  %v742_v40 = vpop.f32.mrf.mxu1 }
 0x1ae   : > { %v743_v41 = vadd.f32 %v4845_v38, %v742_v40  ;;  %v707_v47 = vadd.f32 %v4844_v42, %v706_v39 }
 0x1b0   : > { %v746_v43 = vpack.c.bf16 %v743_v41, %v743_v41  ;;  %v710_v54 = vpack.c.bf16 %v707_v47, %v707_v47  ;;  %v4028_v47 = vld [vmem:[%s6127_s8 + $0x4] sm:$0xf] }
 0x1b2   : > { %v788_v46 = vsel %vm783_vm5, %v746_v43, 0 }
 0x1b3   : > { %797 = vmatpush.bf16.xpose.msra.mxu3 %v788_v46 }
 0x1b4   : > { %v778_v48 = vpop.f32.mrf.mxu2 }
 0x1b5   : > { %v779_v50 = vadd.f32 %v4846_v45, %v778_v48  ;;  %v708_v51 = vpop.f32.mrf.mxu0  ;;  %v744_v52 = vpop.f32.mrf.mxu1  ;;  %v1022_v48 = vsel %vm818_vm6, %v4028_v47, 0 }
 0x1b7   : > { %v782_v53 = vpack.c.bf16 %v779_v50, %v779_v50 }
 0x1b9   : > { %v820_v55 = vsel %vm818_vm6, %v782_v53, 0 }
 0x1ba   : > { %829 = vmatpush.bf16.msrb.mxu0 %v820_v55  ;;  %3981 = vmatmul.msk.bf16.vlgmr.msra.gmra.mxu3 %vm783_vm5, %v710_v54  ;;  %v4853_v54 = vld [vmem:[%s6126_s7 + $0x6] ss:$0 sm:$0xff] }
 0x1bb   : > { %921 = vmatpush.bf16.msrb.mxu3 %v4707_v44 }
 0x1bc   : > { %v780_v56 = vpop.f32.mrf.mxu2 }
 0x1be   : > { %957 = vmatpush.bf16.msra.mxu0 %v4709_v20 }
 0x1bf   : > { %922 = vmatpush.bf16.msrb.mxu3 %v4706_v49 }
 0x1c2   : > { %958 = vmatpush.bf16.msra.mxu0 %v4708_v21 }
 0x1c3   : > { %1031 = vmatpush.bf16.msra.mxu3 %v1022_v48 }
 0x1c4   : > { %v888_v57 = vpop.f32.mrf.mxu2 }
 0x1c5   : > { %v889_v34 = vadd.f32 %v4847_v33, %v888_v57 }
 0x1c7   : > { %v892_v39 = vpack.c.bf16 %v889_v34, %v889_v34 }
 0x1ca   : > { %4011 = vmatmul.msk.bf16.vlgmr.msrb.gmra.mxu3 %vm634_vm0, %v5253_v37 }
 0x1cc   : > { %v890_v58 = vpop.f32.mrf.mxu2 }
 0x23d   : > { %v799_v4 = vpop.f32.mrf.mxu3 }
 0x23e   : > { %v800_v5 = vadd.f32 %v799_v4, %v5296_v3 }
 0x240   : > { %v803_v6 = vsel %vm783_vm5, %v800_v5, -inf }
 0x241   : > { %804 = vmax.xlane.f32.xlu1 %v803_v6 }
 0x245   : > { %v801_v7 = vpop.f32.mrf.mxu3 }
 0x246   : > { %v4717_v7 = vld [vmem:[%s6161_s6 + $0x38] sm:$0xff] }
 0x24d   : > { %v924_v10 = vpop.f32.mrf.mxu3 }
 0x24e   : > { %v925_v11 = vadd.f32 %v4849_v9, %v924_v10  ;;  %v4716_v10 = vld [vmem:[%s6161_s6 + $0x30] sm:$0xff] }
 0x250   : > { %v928_v12 = vpack.c.bf16 %v925_v11, %v925_v11 }
 0x252   : > { %v969_v13 = vsel %vm783_vm5, %v928_v12, 0  ;;  %v4719_v12 = vld [vmem:[%s6161_s6 + $0x78] sm:$0xff] }
 0x253   : > { %978 = vmatpush.bf16.xpose.msra.mxu1 %v969_v13 }
 0x255   : > { %v926_v14 = vpop.f32.mrf.mxu3 }
 0x256   : > { %v4718_v14 = vld [vmem:[%s6161_s6 + $0x70] sm:$0xff] }
 0x2b4   : > { %v805_v15 = vpop.xlane.xlu1 %804 }
 0x2b5   : > { %v806_v16 = vsub.f32 %v800_v5, %v805_v15 }
 0x2b7   : > { %v807_v17 = vmul.f32 1.442695, %v806_v16  ;;  %v4851_v16 = vld [vmem:[%s6126_s7 + $0x2] ss:$0 sm:$0xff] }
 0x2b9   : > { %4913 = vpow2.f32 %v807_v17 }
 0x2bf   : > { %v4914_v18 = vpop.eup %4913 }
 0x2c0   : > { %v809_v19 = vsel %vm783_vm5, %v4914_v18, 0.0 }
 0x2c1   : > { %810 = vadd.xlane.f32.xlu1 %v809_v19 }
 0x334   : > { %v811_v22 = vpop.xlane.xlu1 %810 }
 0x335   : > { %4915 = vrcp.f32 %v811_v22 }
 0x33b   : > { %v4916_v23 = vpop.eup %4915 }
 0x33c   : > { %v813_v24 = vmul.f32 %v4916_v23, %v4914_v18  ;;  %v4854_v18 = vld [vmem:[%s6126_s7 + $0xa] ss:$0 sm:$0xff] }
 0x33e   : > { %v814_v26 = vpack.c.bf16 %v813_v24, %v813_v24 }
 0x340   : > { %3982 = vmatmul.msk.bf16.vlgmr.msrb.gmra.mxu0 %vm783_vm5, %v814_v26 }
 0x341   : > { %1066 = vmatpush.bf16.msrb.mxu0 %v4711_v25 }
 0x345   : > { %1067 = vmatpush.bf16.msrb.mxu0 %v4710_v27  ;;  %v4852_v27 = vld [vmem:[%s6128_s9] ss:$0 sm:$0xff] }
 0x350   : > { %4025 = vmatmul.msk.bf16.vlgmr.msra.gmra.mxu0 %vm634_vm0, %v5253_v37 }
 0x360   : > { %4043 = vmatmul.msk.bf16.vlgmr.msrb.gmra.mxu0 %vm634_vm0, %v5253_v37 }
 0x3bd   : > { %v831_v28 = vpop.f32.mrf.mxu0 }
 0x3be   : > { %v835_v30 = vpack.c.bf16 %v831_v28, %v831_v28 }
 0x3c0   : > { %3983 = vmatmul.msk.bf16.vlgmr.msrb.gmra.mxu1 %vm783_vm5, %v835_v30 }
 0x3c1   : > { %1102 = vmatpush.bf16.msrb.mxu1 %v4713_v29 }
 0x3c5   : > { %v833_v32 = vpop.f32.mrf.mxu0  ;;  %1103 = vmatpush.bf16.msrb.mxu1 %v4712_v31  ;;  %v4074_v31 = vld [vmem:[%s6127_s8 + $0x8] sm:$0xf] }
 0x3c6   : > { %v1203_v32 = vsel %vm818_vm6, %v4074_v31, 0  ;;  %v4725_v31 = vld [vmem:[%s6129_s10 + $0x48] sm:$0xff] }
 0x3cd   : > { %v960_v38 = vpop.f32.mrf.mxu0 }
 0x3ce   : > { %v961_v40 = vadd.f32 %v4850_v35, %v960_v38 }
 0x3d0   : > { %v964_v41 = vpack.c.bf16 %v961_v40, %v961_v40  ;;  %4026 = vmatmul.msk.bf16.vlgmr.msra.gmra.mxu1 %vm783_vm5, %v892_v39  ;;  %v4856_v40 = vld [vmem:[%s6126_s7 + $0x7] ss:$0 sm:$0xff] }
 0x3d1   : > { %1212 = vmatpush.bf16.msra.mxu1 %v1203_v32 }
 0x3d2   : > { %v1000_v42 = vsel %vm818_vm6, %v964_v41, 0 }
 0x3d3   : > { %1009 = vmatpush.bf16.msra.mxu2 %v1000_v42 }
 0x3d5   : > { %v962_v43 = vpop.f32.mrf.mxu0 }
 0x3d7   : > { %1138 = vmatpush.bf16.msrb.mxu2 %v4715_v1 }
 0x3db   : > { %1139 = vmatpush.bf16.msrb.mxu2 %v4714_v2 }
 0x3dd   : > { %v1069_v44 = vpop.f32.mrf.mxu0 }
 0x3de   : > { %v1070_v17 = vadd.f32 %v4851_v16, %v1069_v44 }
 0x3e0   : > { %4057 = vmatmul.msk.bf16.vlgmr.msrb.gmra.mxu1 %vm634_vm0, %v5253_v37  ;;  %v1073_v20 = vpack.c.bf16 %v1070_v17, %v1070_v17 }
 0x3e5   : > { %v1071_v45 = vpop.f32.mrf.mxu0 }
 0x43d   : > { %v5339_v46 = vpop.f32.mrf.mxu1 }
 0x43e   : > { %v856_v28 = vadd.f32 %v4852_v27, %v5339_v46 }
 0x445   : > { %v854_v49 = vpop.f32.mrf.mxu1 }
 0x44d   : > { %v980_v50 = vpop.f32.mrf.mxu1 }
 0x44e   : > { %v981_v51 = vadd.f32 %v980_v50, %v5296_v3 }
 0x450   : > { %v984_v52 = vsel %vm783_vm5, %v981_v51, -inf }
 0x451   : > { %985 = vmax.xlane.f32.xlu2 %v984_v52  ;;  %v4720_v52 = vld [vmem:[%s6161_s6 + $0xb0] sm:$0xff] }
 0x455   : > { %v982_v53 = vpop.f32.mrf.mxu1 }
 0x45d   : > { %v1105_v55 = vpop.f32.mrf.mxu1 }
 0x45e   : > { %v1106_v56 = vadd.f32 %v4853_v54, %v1105_v55 }
 0x460   : > { %v1109_v57 = vpack.c.bf16 %v1106_v56, %v1106_v56 }
 0x462   : > { %v1150_v58 = vsel %vm783_vm5, %v1109_v57, 0 }
 0x463   : > { %1159 = vmatpush.bf16.xpose.msrb.mxu3 %v1150_v58 }
 0x465   : > { %v1107_v59 = vpop.f32.mrf.mxu1 }
 0x4c4   : > { %v986_v60 = vpop.xlane.xlu2 %985 }
 0x4c5   : > { %v987_v61 = vsub.f32 %v981_v51, %v986_v60  ;;  %v4721_v51 = vld [vmem:[%s6161_s6 + $0xb8] sm:$0xff]  ;;  %v4855_v60 = vld [vmem:[%s6126_s7 + $0x3] ss:$0 sm:$0xff] }
 0x4c7   : > { %v988_v62 = vmul.f32 1.442695, %v987_v61 }
 0x4c9   : > { %4917 = vpow2.f32 %v988_v62  ;;  %v4857_v62 = vld [vmem:[%s6126_s7 + $0xb] ss:$0 sm:$0xff] }
 0x4cf   : > { %v4918_v63 = vpop.eup %4917 }
 0x4d0   : > { %v990_v0 = vsel %vm783_vm5, %v4918_v63, 0.0 }
 0x4d1   : > { %991 = vadd.xlane.f32.xlu2 %v990_v0 }
 0x544   : > { %v992_v4 = vpop.xlane.xlu2 %991 }
 0x545   : > { %4919 = vrcp.f32 %v992_v4 }
 0x54b   : > { %v4920_v5 = vpop.eup %4919 }
 0x54c   : > { %v994_v6 = vmul.f32 %v4920_v5, %v4918_v63 }
 0x54e   : > { %v995_v9 = vpack.c.bf16 %v994_v6, %v994_v6 }
 0x550   : > { %4027 = vmatmul.msk.bf16.vlgmr.msra.gmra.mxu2 %vm783_vm5, %v995_v9 }
 0x551   : > { %1247 = vmatpush.bf16.msra.mxu2 %v4717_v7 }
 0x555   : > { %1248 = vmatpush.bf16.msra.mxu2 %v4716_v10 }
 0x560   : > { %4071 = vmatmul.msk.bf16.vlgmr.msrb.gmra.mxu2 %vm634_vm0, %v5253_v37 }
 0x570   : > { %4089 = vmatmul.msk.bf16.vlgmr.msra.gmra.mxu2 %vm634_vm0, %v5253_v37 }
 0x5d3   : > { %v1011_v11 = vpop.f32.mrf.mxu2 }
 0x5d4   : > { %v1015_v13 = vpack.c.bf16 %v1011_v11, %v1011_v11 }
 0x5d6   : > { %4029 = vmatmul.msk.bf16.vlgmr.msra.gmra.mxu3 %vm783_vm5, %v1015_v13 }
 0x5d7   : > { %1283 = vmatpush.bf16.msra.mxu3 %v4719_v12 }
 0x5db   : > { %v1013_v15 = vpop.f32.mrf.mxu2  ;;  %1284 = vmatpush.bf16.msra.mxu3 %v4718_v14 }
 0x5e3   : > { %v1141_v19 = vpop.f32.mrf.mxu2 }
 0x5e4   : > { %v1142_v21 = vadd.f32 %v4854_v18, %v1141_v19  ;;  %v4120_v18 = vld [vmem:[%s6127_s8 + $0xc] sm:$0xf] }
 0x5e5   : > { %v1384_v19 = vsel %vm818_vm6, %v4120_v18, 0 }
 0x5e6   : > { %v1145_v22 = vpack.c.bf16 %v1142_v21, %v1142_v21  ;;  %4072 = vmatmul.msk.bf16.vlgmr.msrb.gmra.mxu3 %vm783_vm5, %v1073_v20 }
 0x5e7   : > { %1393 = vmatpush.bf16.msrb.mxu3 %v1384_v19  ;;  %v5497_v19 = vld [vmem:[%s5206_s20] ss:$0 sm:$0xff] }
 0x5e8   : > { %v1181_v23 = vsel %vm818_vm6, %v1145_v22, 0 }
 0x5e9   : > { %1190 = vmatpush.bf16.msra.mxu0 %v1181_v23 }
 0x5eb   : > { %v1143_v24 = vpop.f32.mrf.mxu2 }
 0x5ed   : > { %1319 = vmatpush.bf16.msrb.mxu0 %v4721_v51 }
 0x5f1   : > { %1320 = vmatpush.bf16.msrb.mxu0 %v4720_v52 }
 0x5f3   : > { %v1250_v25 = vpop.f32.mrf.mxu2 }
 0x5f4   : > { %v1251_v61 = vadd.f32 %v4855_v60, %v1250_v25 }
 0x5f6   : > { %4103 = vmatmul.msk.bf16.vlgmr.msra.gmra.mxu3 %vm634_vm0, %v5253_v37  ;;  %v1254_v0 = vpack.c.bf16 %v1251_v61, %v1251_v61 }
 0x5fb   : > { %v1252_v26 = vpop.f32.mrf.mxu2 }
 0x659   : > { %v1033_v29 = vpop.f32.mrf.mxu3 }
 0x65a   : > { %v1037_v30 = vadd.f32 %v1033_v29, %v856_v28 }
 0x661   : > { %v1035_v33 = vpop.f32.mrf.mxu3 }
 0x669   : > { %v1161_v34 = vpop.f32.mrf.mxu3 }
 0x66a   : > { %v1162_v35 = vadd.f32 %v1161_v34, %v5296_v3 }
 0x66c   : > { %v1165_v38 = vsel %vm783_vm5, %v1162_v35, -inf }
 0x66d   : > { %1166 = vmax.xlane.f32.xlu0 %v1165_v38 }
 0x671   : > { %v1163_v39 = vpop.f32.mrf.mxu3 }
 0x672   : > { %v618_v39 = vld [vmem:[%s612_s19] sm:$0xff] }
 0x679   : > { %v1286_v41 = vpop.f32.mrf.mxu3 }
 0x67a   : > { %v1287_v42 = vadd.f32 %v4856_v40, %v1286_v41  ;;  %v4724_v40 = vld [vmem:[%s6129_s10 + $0x40] sm:$0xff] }
 0x67b   : > { %v4726_v41 = vld [vmem:[%s6129_s10 + $0x80] sm:$0xff] }
 0x67c   : > { %v1290_v43 = vpack.c.bf16 %v1287_v42, %v1287_v42  ;;  %v5449_v42 = vpack.c.bf16 %v618_v39, %v618_v39  ;;  %v4864_v39 = vld [vmem:[%s6130_s11 + $0x5] ss:$0 sm:$0xff] }
 0x67e   : > { %v1331_v44 = vsel %vm783_vm5, %v1290_v43, 0  ;;  %v4723_v43 = vld [vmem:[%s6129_s10 + $0x8] sm:$0xff] }
 0x67f   : > { %1340 = vmatpush.bf16.xpose.msrb.mxu1 %v1331_v44  ;;  %v4729_v44 = vld [vmem:[%s6129_s10 + $0x18] sm:$0xff] }
 0x681   : > { %v1288_v45 = vpop.f32.mrf.mxu3 }
 0x682   : > { %v4722_v45 = vld [vmem:[%s6129_s10] sm:$0xff] }
 0x6e0   : > { %v1167_v46 = vpop.xlane.xlu0 %1166 }
 0x6e1   : > { %v1168_v47 = vsub.f32 %v1162_v35, %v1167_v46  ;;  %v4728_v46 = vld [vmem:[%s6129_s10 + $0x10] sm:$0xff] }
 0x6e3   : > { %v1169_v48 = vmul.f32 1.442695, %v1168_v47 }
 0x6e5   : > { %4921 = vpow2.f32 %v1169_v48 }
 0x6eb   : > { %v4922_v49 = vpop.eup %4921 }
 0x6ec   : > { %v1171_v50 = vsel %vm783_vm5, %v4922_v49, 0.0 }
 0x6ed   : > { %1172 = vadd.xlane.f32.xlu1 %v1171_v50 }
 0x760   : > { %v1173_v53 = vpop.xlane.xlu1 %1172 }
 0x761   : > { %4923 = vrcp.f32 %v1173_v53 }
 0x767   : > { %v4924_v54 = vpop.eup %4923 }
 0x768   : > { %v1175_v55 = vmul.f32 %v4924_v54, %v4922_v49 }
 0x76a   : > { %v1176_v56 = vpack.c.bf16 %v1175_v55, %v1175_v55 }
 0x76c   : > { %4073 = vmatmul.msk.bf16.vlgmr.msra.gmra.mxu0 %vm783_vm5, %v1176_v56  ;;  %v4858_v56 = vld [vmem:[%s6123_s4 + $0x1] ss:$0 sm:$0xff] }
 0x76d   : > { %1462 = vmatpush.bf16.msra.mxu0 %v4723_v43 }
 0x771   : > { %1463 = vmatpush.bf16.msra.mxu0 %v4722_v45 }
 0x77c   : > { %4117 = vmatmul.msk.bf16.vlgmr.msrb.gmra.mxu0 %vm634_vm0, %v5253_v37 }
 0x7e9   : > { %v1192_v57 = vpop.f32.mrf.mxu0 }
 0x7ea   : > { %v1196_v58 = vpack.c.bf16 %v1192_v57, %v1192_v57 }
 0x7ec   : > { %4075 = vmatmul.msk.bf16.vlgmr.msra.gmra.mxu1 %vm783_vm5, %v1196_v58  ;;  %v4859_v58 = vld [vmem:[%s6124_s5 + $0x1] ss:$0 sm:$0xff] }
 0x7ed   : > { %1501 = vmatpush.bf16.msra.mxu1 %v4725_v31  ;;  %v4732_v31 = vld [vmem:[%s6129_s10 + $0x90] sm:$0xff] }
 0x7f1   : > { %v1194_v59 = vpop.f32.mrf.mxu0  ;;  %1502 = vmatpush.bf16.msra.mxu1 %v4724_v40 }
 0x7f9   : > { %v1322_v63 = vpop.f32.mrf.mxu0 }
 0x7fa   : > { %v1323_v1 = vadd.f32 %v4857_v62, %v1322_v63  ;;  %v4860_v63 = vld [vmem:[%s6130_s11 + $0x4] ss:$0 sm:$0xff] }
 0x7fc   : > { %v1326_v2 = vpack.c.bf16 %v1323_v1, %v1323_v1  ;;  %4118 = vmatmul.msk.bf16.vlgmr.msrb.gmra.mxu1 %vm783_vm5, %v1254_v0 }
 0x7fe   : > { %v1362_v37 = vsel %vm818_vm6, %v1326_v2, 0 }
 0x7ff   : > { %1371 = vmatpush.bf16.msrb.mxu2 %v1362_v37  ;;  %v4861_v37 = vld [vmem:[%s6130_s11 + $0x8] ss:$0 sm:$0xff] }
 0x801   : > { %v1324_v4 = vpop.f32.mrf.mxu0 }
 0x80c   : > { %4144 = vmatmul.msk.bf16.vlgmr.msra.gmra.mxu1 %vm634_vm0, %v5449_v42 }
 0x869   : > { %v1214_v5 = vpop.f32.mrf.mxu1 }
 0x86a   : > { %v1218_v6 = vadd.f32 %v1214_v5, %v1037_v30 }
 0x871   : > { %v1216_v7 = vpop.f32.mrf.mxu1 }
 0x879   : > { %v1342_v9 = vpop.f32.mrf.mxu1 }
 0x87a   : > { %v1343_v10 = vadd.f32 %v1342_v9, %v5296_v3 }
 0x87c   : > { %v1346_v11 = vsel %vm783_vm5, %v1343_v10, -inf }
 0x87d   : > { %1347 = vmax.xlane.f32.xlu2 %v1346_v11 }
 0x881   : > { %v1344_v12 = vpop.f32.mrf.mxu1 }
 0x882   : > { %v4862_v12 = vld [vmem:[%s6130_s11] ss:$0 sm:$0xff] }
 0x889   : > { %v1504_v0 = vpop.f32.mrf.mxu1 }
 0x88a   : > { %v1505_v1 = vadd.f32 %v4860_v63, %v1504_v0 }
 0x88c   : > { %v1508_v2 = vpack.c.bf16 %v1505_v1, %v1505_v1 }
 0x88e   : > { %v1552_v4 = vsel %vm783_vm5, %v1508_v2, 0 }
 0x88f   : > { %1561 = vmatpush.bf16.xpose.msra.mxu3 %v1552_v4 }
 0x891   : > { %v1506_v7 = vpop.f32.mrf.mxu1 }
 0x8f0   : > { %v1348_v13 = vpop.xlane.xlu2 %1347 }
 0x8f1   : > { %v1349_v14 = vsub.f32 %v1343_v10, %v1348_v13 }
 0x8f3   : > { %v1350_v15 = vmul.f32 1.442695, %v1349_v14 }
 0x8f5   : > { %4925 = vpow2.f32 %v1350_v15 }
 0x8fb   : > { %v4926_v16 = vpop.eup %4925 }
 0x8fc   : > { %v1352_v17 = vsel %vm783_vm5, %v4926_v16, 0.0 }
 0x8fd   : > { %1353 = vadd.xlane.f32.xlu0 %v1352_v17 }
 0x970   : > { %v1354_v3 = vpop.xlane.xlu0 %1353 }
 0x971   : > { %4927 = vrcp.f32 %v1354_v3 }
 0x977   : > { %v4928_v20 = vpop.eup %4927 }
 0x978   : > { %v1356_v21 = vmul.f32 %v4928_v20, %v4926_v16 }
 0x97a   : > { %v1357_v22 = vpack.c.bf16 %v1356_v21, %v1356_v21 }
 0x97c   : > { %4119 = vmatmul.msk.bf16.vlgmr.msrb.gmra.mxu2 %vm783_vm5, %v1357_v22 }
 0x9ff   : > { %v1373_v23 = vpop.f32.mrf.mxu2 }
 0xa00   : > { %v1377_v24 = vpack.c.bf16 %v1373_v23, %v1373_v23  ;;  %v4731_v23 = vld [vmem:[%s6129_s10 + $0x58] sm:$0xff] }
 0xa02   : > { %4121 = vmatmul.msk.bf16.vlgmr.msrb.gmra.mxu3 %vm783_vm5, %v1377_v24  ;;  %v4730_v24 = vld [vmem:[%s6129_s10 + $0x50] sm:$0xff] }
 0xa03   : > { %1684 = vmatpush.bf16.msrb.mxu3 %v4731_v23 }
 0xa07   : > { %v1375_v25 = vpop.f32.mrf.mxu2  ;;  %1685 = vmatpush.bf16.msrb.mxu3 %v4730_v24  ;;  %v4868_v24 = vld [vmem:[%s6130_s11 + $0x6] ss:$0 sm:$0xff] }
 0xa85   : > { %v1395_v26 = vpop.f32.mrf.mxu3 }
 0xa86   : > { %v1399_v27 = vadd.f32 %v1395_v26, %v1218_v6 }
 0xa88   : > { %v1400_v28 = vadd.f32 %v1399_v27, %v5249_v36  ;;  %v4727_v36 = vld [vmem:[%s6129_s10 + $0x88] sm:$0xff] }
 0xa89   : > { %1537 = vmatpush.bf16.msra.mxu2 %v4727_v36  ;;  %v1599_v36 = vld [vmem:[%s6131_s12] sm:$0xf] }
 0xa8a   : > { %v1403_v29 = vsel %vm634_vm0, %v1400_v28, 0.0  ;;  %v1604_v43 = vsel %vm818_vm6, %v1599_v36, 0 }
 0xa8b   : > { %1404 = vadd.xlane.f32.xlu1 %v1403_v29  ;;  %1613 = vmatpush.bf16.msrb.mxu1 %v1604_v43 }
 0xa8d   : > { %v1397_v30 = vpop.f32.mrf.mxu3  ;;  %1538 = vmatpush.bf16.msra.mxu2 %v4726_v41  ;;  %v4734_v41 = vld [vmem:[%s6129_s10 + $0x20] sm:$0xff] }
 0xa8e   : > { %v4733_v30 = vld [vmem:[%s6129_s10 + $0x98] sm:$0xff] }
 0xa90   : > { %4158 = vmatmul.msk.bf16.vlgmr.msra.gmra.mxu2 %vm634_vm0, %v5449_v42 }
 0xa91   : > { %1648 = vmatpush.bf16.msrb.mxu2 %v4729_v44 }
 0xa95   : > { %1649 = vmatpush.bf16.msrb.mxu2 %v4728_v46 }
 0xafe   : > { %v1405_v32 = vpop.xlane.xlu1 %1404 }
 0xaff   : > { %v1406_v33 = vmul.f32 %v1405_v32, %v5214_v8 }
 0xb01   : > { %v1407_v34 = vsub.f32 %v1400_v28, %v1406_v33 }
 0xb03   : > { %v1408_v35 = vmul.f32 %v1407_v34, %v1407_v34 }
 0xb05   : > { %v1409_v38 = vsel %vm634_vm0, %v1408_v35, 0.0  ;;  %v4735_v35 = vld [vmem:[%s6129_s10 + $0x28] sm:$0xff] }
 0xb06   : > { %1410 = vadd.xlane.f32.xlu2 %v1409_v38 }
 0xb13   : > { %v1540_v5 = vpop.f32.mrf.mxu2 }
 0xb14   : > { %v1541_v6 = vadd.f32 %v4861_v37, %v1540_v5 }
 0xb16   : > { %v1544_v9 = vpack.c.bf16 %v1541_v6, %v1541_v6  ;;  %v4737_v6 = vld [vmem:[%s6129_s10 + $0x68] sm:$0xff] }
 0xb18   : > { %v1583_v10 = vsel %vm818_vm6, %v1544_v9, 0 }
 0xb19   : > { %1592 = vmatpush.bf16.msrb.mxu0 %v1583_v10 }
 0xb1b   : > { %v1542_v11 = vpop.f32.mrf.mxu2 }
 0xb79   : > { %v1411_v47 = vpop.xlane.xlu2 %1410 }
 0xb7a   : > { %v1412_v48 = vmul.f32 %v1411_v47, %v5214_v8 }
 0xb7c   : > { %v1413_v49 = vadd.f32 1e-05, %v1412_v48 }
 0xb7e   : > { %4929 = vrsqrt.f32 %v1413_v49  ;;  %vm1420_vm9 = vweird.f32 %v1413_v49 }
 0xb84   : > { %v4930_v50 = vpop.eup %4929 }
 0xb85   : > { %v1415_v51 = vmul.f32 %v4930_v50, %v1413_v49  ;;  %vm1421_vm8 = vweird.f32 %v4930_v50 }
 0xb86   : > { %vm1422_vm10 = vmor %vm1420_vm9, %vm1421_vm8 }
 0xb87   : > { %v1416_v52 = vmul.f32 %v4930_v50, %v1415_v51  ;;  %v4863_v51 = vld [vmem:[%s6130_s11 + $0x1] ss:$0 sm:$0xff] }
 0xb89   : > { %v1417_v53 = vmul.f32 0.5, %v1416_v52 }
 0xb8b   : > { %v1418_v54 = vsub.f32 1.5, %v1417_v53  ;;  %v4865_v53 = vld [vmem:[%s6130_s11 + $0x9] ss:$0 sm:$0xff] }
 0xb8d   : > { %v1419_v55 = vmul.f32 %v4930_v50, %v1418_v54 }
 0xb8f   : > { %v1423_v57 = vsel %vm1422_vm10, %v4930_v50, %v1419_v55 }
 0xb90   : > { %v1424_v59 = vmul.f32 %v1423_v57, %v1407_v34 }
 0xb92   : > { %v1426_v60 = vmul.f32 %v4858_v56, %v1424_v59 }
 0xb94   : > { %v5474_v61 = vadd.f32 %v4859_v58, %v1426_v60 }
 0xb96   : > { %v5478_v62 = vpack.c.bf16 %v5474_v61, %v5474_v61 }
 0xb98   : > { %4130 = vmatmul.msk.bf16.vlgmr.msra.gmra.mxu0 %vm634_vm0, %v5478_v62  ;;  %4175 = vmatmul.msk.bf16.vlgmr.msrb.gmra.mxu2 %vm634_vm0, %v5478_v62 }
 0xb99   : > { %1720 = vmatpush.bf16.msra.mxu0 %v4733_v30 }
 0xb9d   : > { %1721 = vmatpush.bf16.msra.mxu0 %v4732_v31 }
 0xc15   : > { %v1465_v13 = vpop.f32.mrf.mxu0 }
 0xc16   : > { %v1466_v14 = vadd.f32 %v4862_v12, %v1465_v13  ;;  %v4736_v13 = vld [vmem:[%s6129_s10 + $0x60] sm:$0xff] }
 0xc18   : > { %v1469_v15 = vpack.c.bf16 %v1466_v14, %v1466_v14  ;;  %v4739_v14 = vld [vmem:[%s6129_s10 + $0xa8] sm:$0xff] }
 0xc1a   : > { %4159 = vmatmul.msk.bf16.vlgmr.msra.gmra.mxu3 %vm783_vm5, %v1469_v15  ;;  %v4738_v15 = vld [vmem:[%s6129_s10 + $0xa0] sm:$0xff] }
 0xc1b   : > { %v1651_v16 = vpop.f32.mrf.mxu2 }
 0xc1c   : > { %v1652_v52 = vadd.f32 %v4863_v51, %v1651_v16 }
 0xc1d   : > { %v1467_v17 = vpop.f32.mrf.mxu0 }
 0xc1e   : > { %v1655_v55 = vpack.c.bf16 %v1652_v52, %v1652_v52 }
 0xc23   : > { %v1653_v18 = vpop.f32.mrf.mxu2 }
 0xc2a   : > { %4189 = vmatmul.msk.bf16.vlgmr.msrb.gmra.mxu3 %vm634_vm0, %v5449_v42 }
 0xc9d   : > { %v1563_v3 = vpop.f32.mrf.mxu3 }
 0xc9e   : > { %v1564_v20 = vadd.f32 %v5497_v19, %v1563_v3  ;;  %v4741_v3 = vld [vmem:[%s6129_s10 + $0x38] sm:$0xff] }
 0xca0   : > { %v1567_v21 = vsel %vm783_vm5, %v1564_v20, -inf }
 0xca1   : > { %1568 = vmax.xlane.f32.xlu0 %v1567_v21  ;;  %v4206_v21 = vld [vmem:[%s6131_s12 + $0x4] sm:$0xf] }
 0xca2   : > { %v1785_v23 = vsel %vm818_vm6, %v4206_v21, 0 }
 0xca3   : > { %1794 = vmatpush.bf16.msra.mxu3 %v1785_v23 }
 0xca5   : > { %v1565_v22 = vpop.f32.mrf.mxu3 }
 0xca6   : > { %v4740_v22 = vld [vmem:[%s6129_s10 + $0x30] sm:$0xff] }
 0xcad   : > { %v1687_v40 = vpop.f32.mrf.mxu3 }
 0xcae   : > { %v1688_v44 = vadd.f32 %v4864_v39, %v1687_v40 }
 0xcb0   : > { %v1691_v45 = vpack.c.bf16 %v1688_v44, %v1688_v44 }
 0xcb2   : > { %v1732_v46 = vsel %vm783_vm5, %v1691_v45, 0  ;;  %v4867_v45 = vld [vmem:[%s6132_s13] ss:$0 sm:$0xff] }
 0xcb3   : > { %1741 = vmatpush.bf16.xpose.msra.mxu1 %v1732_v46 }
 0xcb5   : > { %v1689_v47 = vpop.f32.mrf.mxu3 }
 0xd14   : > { %v1569_v25 = vpop.xlane.xlu0 %1568 }
 0xd15   : > { %v1570_v26 = vsub.f32 %v1564_v20, %v1569_v25 }
 0xd17   : > { %v1571_v27 = vmul.f32 1.442695, %v1570_v26 }
 0xd19   : > { %4931 = vpow2.f32 %v1571_v27 }
 0xd1f   : > { %v4932_v28 = vpop.eup %4931 }
 0xd20   : > { %v1573_v29 = vsel %vm783_vm5, %v4932_v28, 0.0 }
 0xd21   : > { %1574 = vadd.xlane.f32.xlu1 %v1573_v29 }
 0xd94   : > { %v1575_v32 = vpop.xlane.xlu1 %1574 }
 0xd95   : > { %4933 = vrcp.f32 %v1575_v32 }
 0xd9b   : > { %v4934_v33 = vpop.eup %4933 }
 0xd9c   : > { %v1577_v34 = vmul.f32 %v4934_v33, %v4932_v28 }
 0xd9e   : > { %v1578_v38 = vpack.c.bf16 %v1577_v34, %v1577_v34  ;;  %v4869_v34 = vld [vmem:[%s6130_s11 + $0xa] ss:$0 sm:$0xff] }
 0xda0   : > { %4160 = vmatmul.msk.bf16.vlgmr.msrb.gmra.mxu0 %vm783_vm5, %v1578_v38 }
 0xda1   : > { %1829 = vmatpush.bf16.msrb.mxu0 %v4735_v35 }
 0xda5   : > { %1830 = vmatpush.bf16.msrb.mxu0 %v4734_v41 }
 0xdb0   : > { %4203 = vmatmul.msk.bf16.vlgmr.msra.gmra.mxu0 %vm634_vm0, %v5449_v42 }
 0xdc0   : > { %4221 = vmatmul.msk.bf16.vlgmr.msrb.gmra.mxu0 %vm634_vm0, %v5478_v62 }
 0xe1d   : > { %v1594_v48 = vpop.f32.mrf.mxu0 }
 0xe1e   : > { %v1598_v49 = vpack.c.bf16 %v1594_v48, %v1594_v48 }
 0xe20   : > { %4161 = vmatmul.msk.bf16.vlgmr.msrb.gmra.mxu1 %vm783_vm5, %v1598_v49 }
 0xe21   : > { %1865 = vmatpush.bf16.msrb.mxu1 %v4737_v6 }
 0xe25   : > { %v1596_v50 = vpop.f32.mrf.mxu0  ;;  %1866 = vmatpush.bf16.msrb.mxu1 %v4736_v13 }
 0xe2d   : > { %v1723_v54 = vpop.f32.mrf.mxu0 }
 0xe2e   : > { %v1724_v56 = vadd.f32 %v4865_v53, %v1723_v54  ;;  %v4743_v54 = vld [vmem:[%s6129_s10 + $0x78] sm:$0xff] }
 0xe30   : > { %v1727_v57 = vpack.c.bf16 %v1724_v56, %v1724_v56  ;;  %4204 = vmatmul.msk.bf16.vlgmr.msra.gmra.mxu1 %vm783_vm5, %v1655_v55  ;;  %v4742_v55 = vld [vmem:[%s6129_s10 + $0x70] sm:$0xff] }
 0xe32   : > { %v1763_v58 = vsel %vm818_vm6, %v1727_v57, 0 }
 0xe33   : > { %1772 = vmatpush.bf16.msra.mxu2 %v1763_v58 }
 0xe35   : > { %v1725_v59 = vpop.f32.mrf.mxu0 }
 0xe37   : > { %1901 = vmatpush.bf16.msrb.mxu2 %v4739_v14 }
 0xe3b   : > { %1902 = vmatpush.bf16.msrb.mxu2 %v4738_v15  ;;  %v4870_v15 = vld [vmem:[%s6130_s11 + $0x3] ss:$0 sm:$0xff] }
 0xe3d   : > { %v1832_v60 = vpop.f32.mrf.mxu0 }
 0xe40   : > { %4235 = vmatmul.msk.bf16.vlgmr.msrb.gmra.mxu1 %vm634_vm0, %v5449_v42 }
 0xe45   : > { %v1834_v63 = vpop.f32.mrf.mxu0 }
 0xe46   : > { %v4252_v63 = vld [vmem:[%s6131_s12 + $0x8] sm:$0xf] }
 0xe9d   : > { %v5544_v0 = vpop.f32.mrf.mxu1 }
 0xe9e   : > { %v1619_v46 = vadd.f32 %v4867_v45, %v5544_v0  ;;  %v1966_v0 = vsel %vm818_vm6, %v4252_v63, 0  ;;  %v4747_v63 = vld [vmem:[%s6129_s10 + $0xc8] sm:$0xff] }
 0xe9f   : > { %1975 = vmatpush.bf16.msra.mxu1 %v1966_v0  ;;  %v4753_v0 = vld [vmem:[%s6129_s10 + $0xd8] sm:$0xff] }
 0xea5   : > { %v1617_v1 = vpop.f32.mrf.mxu1 }
 0xea6   : > { %v4871_v1 = vld [vmem:[%s6130_s11 + $0x7] ss:$0 sm:$0xff] }
 0xead   : > { %v1743_v2 = vpop.f32.mrf.mxu1 }
 0xeae   : > { %v1744_v37 = vadd.f32 %v5497_v19, %v1743_v2 }
 0xeb0   : > { %v1747_v4 = vsel %vm783_vm5, %v1744_v37, -inf }
 0xeb1   : > { %1748 = vmax.xlane.f32.xlu2 %v1747_v4 }
 0xeb5   : > { %v1745_v5 = vpop.f32.mrf.mxu1 }
 0xebd   : > { %v1868_v25 = vpop.f32.mrf.mxu1 }
 0xebe   : > { %v1869_v26 = vadd.f32 %v4868_v24, %v1868_v25 }
 0xec0   : > { %v1872_v27 = vpack.c.bf16 %v1869_v26, %v1869_v26 }
 0xec2   : > { %v1913_v28 = vsel %vm783_vm5, %v1872_v27, 0  ;;  %v4872_v27 = vld [vmem:[%s6130_s11 + $0xb] ss:$0 sm:$0xff] }
 0xec3   : > { %1922 = vmatpush.bf16.xpose.msrb.mxu3 %v1913_v28 }
 0xec5   : > { %v1870_v29 = vpop.f32.mrf.mxu1 }
 0xf24   : > { %v1749_v7 = vpop.xlane.xlu2 %1748 }
 0xf25   : > { %v1750_v9 = vsub.f32 %v1744_v37, %v1749_v7 }
 0xf27   : > { %v1751_v10 = vmul.f32 1.442695, %v1750_v9 }
 0xf29   : > { %4935 = vpow2.f32 %v1751_v10 }
 0xf2f   : > { %v4936_v11 = vpop.eup %4935 }
 0xf30   : > { %v1753_v12 = vsel %vm783_vm5, %v4936_v11, 0.0 }
 0xf31   : > { %1754 = vadd.xlane.f32.xlu0 %v1753_v12 }
 0xfa4   : > { %v1755_v16 = vpop.xlane.xlu0 %1754 }
 0xfa5   : > { %4937 = vrcp.f32 %v1755_v16 }
 0xfab   : > { %v4938_v17 = vpop.eup %4937 }
 0xfac   : > { %v1757_v18 = vmul.f32 %v4938_v17, %v4936_v11 }
 0xfae   : > { %v1758_v20 = vpack.c.bf16 %v1757_v18, %v1757_v18  ;;  %v4745_v18 = vld [vmem:[%s6129_s10 + $0xb8] sm:$0xff] }
 0xfb0   : > { %4205 = vmatmul.msk.bf16.vlgmr.msra.gmra.mxu2 %vm783_vm5, %v1758_v20 }
 0xfb1   : > { %2010 = vmatpush.bf16.msra.mxu2 %v4741_v3  ;;  %v4744_v3 = vld [vmem:[%s6129_s10 + $0xb0] sm:$0xff] }
 0xfb5   : > { %2011 = vmatpush.bf16.msra.mxu2 %v4740_v22 }
 0xfc0   : > { %4249 = vmatmul.msk.bf16.vlgmr.msrb.gmra.mxu2 %vm634_vm0, %v5449_v42 }
 0xfd0   : > { %4267 = vmatmul.msk.bf16.vlgmr.msra.gmra.mxu2 %vm634_vm0, %v5478_v62  ;;  %v4866_v62 = vld [vmem:[%s6130_s11 + $0x2] ss:$0 sm:$0xff] }
 0xfd1   : > { %v1833_v33 = vadd.f32 %v4866_v62, %v1832_v60 }
 0xfd3   : > { %v1836_v38 = vpack.c.bf16 %v1833_v33, %v1833_v33 }
0x1033   : > { %v1774_v30 = vpop.f32.mrf.mxu2 }
0x1034   : > { %v1778_v31 = vpack.c.bf16 %v1774_v30, %v1774_v30 }
0x1036   : > { %4207 = vmatmul.msk.bf16.vlgmr.msra.gmra.mxu3 %vm783_vm5, %v1778_v31 }
0x1037   : > { %2046 = vmatpush.bf16.msra.mxu3 %v4743_v54 }
0x103b   : > { %v1776_v32 = vpop.f32.mrf.mxu2  ;;  %2047 = vmatpush.bf16.msra.mxu3 %v4742_v55 }
0x1043   : > { %v1904_v35 = vpop.f32.mrf.mxu2 }
0x1044   : > { %v1905_v36 = vadd.f32 %v4869_v34, %v1904_v35 }
0x1046   : > { %v1908_v39 = vpack.c.bf16 %v1905_v36, %v1905_v36  ;;  %4250 = vmatmul.msk.bf16.vlgmr.msrb.gmra.mxu3 %vm783_vm5, %v1836_v38  ;;  %v4298_v36 = vld [vmem:[%s6131_s12 + $0xc] sm:$0xf] }
0x1048   : > { %v1944_v40 = vsel %vm818_vm6, %v1908_v39, 0  ;;  %v2147_v39 = vsel %vm818_vm6, %v4298_v36, 0 }
0x1049   : > { %1953 = vmatpush.bf16.msra.mxu0 %v1944_v40  ;;  %2156 = vmatpush.bf16.msrb.mxu3 %v2147_v39 }
0x104b   : > { %v1906_v41 = vpop.f32.mrf.mxu2 }
0x104d   : > { %2082 = vmatpush.bf16.msrb.mxu0 %v4745_v18 }
0x1051   : > { %2083 = vmatpush.bf16.msrb.mxu0 %v4744_v3 }
0x1053   : > { %v2013_v43 = vpop.f32.mrf.mxu2 }
0x1054   : > { %v2014_v16 = vadd.f32 %v4870_v15, %v2013_v43  ;;  %v4874_v15 = vld [vmem:[%s6124_s5 + $0x2] ss:$0 sm:$0xff] }
0x1056   : > { %4281 = vmatmul.msk.bf16.vlgmr.msra.gmra.mxu3 %vm634_vm0, %v5449_v42  ;;  %v2017_v17 = vpack.c.bf16 %v2014_v16, %v2014_v16 }
0x105b   : > { %v2015_v44 = vpop.f32.mrf.mxu2 }
0x10b9   : > { %v1796_v47 = vpop.f32.mrf.mxu3 }
0x10ba   : > { %v1800_v48 = vadd.f32 %v1796_v47, %v1619_v46 }
0x10c1   : > { %v1798_v49 = vpop.f32.mrf.mxu3 }
0x10c9   : > { %v1924_v50 = vpop.f32.mrf.mxu3 }
0x10ca   : > { %v1925_v51 = vadd.f32 %v5497_v19, %v1924_v50 }
0x10cc   : > { %v1928_v52 = vsel %vm783_vm5, %v1925_v51, -inf }
0x10cd   : > { %1929 = vmax.xlane.f32.xlu1 %v1928_v52  ;;  %v4749_v52 = vld [vmem:[%s6129_s10 + $0x108] sm:$0xff] }
0x10d1   : > { %v1926_v53 = vpop.f32.mrf.mxu3 }
0x10d9   : > { %v2049_v2 = vpop.f32.mrf.mxu3 }
0x10da   : > { %v2050_v37 = vadd.f32 %v4871_v1, %v2049_v2  ;;  %v4746_v1 = vld [vmem:[%s6129_s10 + $0xc0] sm:$0xff]  ;;  %v4752_v2 = vld [vmem:[%s6129_s10 + $0xd0] sm:$0xff] }
0x10dc   : > { %v2053_v4 = vpack.c.bf16 %v2050_v37, %v2050_v37 }
0x10de   : > { %v2094_v5 = vsel %vm783_vm5, %v2053_v4, 0 }
0x10df   : > { %2103 = vmatpush.bf16.xpose.msrb.mxu1 %v2094_v5 }
0x10e1   : > { %v2051_v7 = vpop.f32.mrf.mxu3 }
0x1140   : > { %v1930_v56 = vpop.xlane.xlu1 %1929 }
0x1141   : > { %v1931_v57 = vsub.f32 %v1925_v51, %v1930_v56 }
0x1143   : > { %v1932_v58 = vmul.f32 1.442695, %v1931_v57 }
0x1145   : > { %4939 = vpow2.f32 %v1932_v58  ;;  %v4751_v58 = vld [vmem:[%s6129_s10 + $0x148] sm:$0xff] }
0x114b   : > { %v4940_v59 = vpop.eup %4939 }
0x114c   : > { %v1934_v60 = vsel %vm783_vm5, %v4940_v59, 0.0 }
0x114d   : > { %1935 = vadd.xlane.f32.xlu2 %v1934_v60  ;;  %v4750_v60 = vld [vmem:[%s6129_s10 + $0x140] sm:$0xff] }
0x11c0   : > { %v1936_v6 = vpop.xlane.xlu2 %1935 }
0x11c1   : > { %4941 = vrcp.f32 %v1936_v6 }
0x11c7   : > { %v4942_v9 = vpop.eup %4941 }
0x11c8   : > { %v1938_v10 = vmul.f32 %v4942_v9, %v4940_v59  ;;  %v4748_v59 = vld [vmem:[%s6129_s10 + $0x100] sm:$0xff] }
0x11ca   : > { %v1939_v11 = vpack.c.bf16 %v1938_v10, %v1938_v10 }
0x11cc   : > { %4251 = vmatmul.msk.bf16.vlgmr.msra.gmra.mxu0 %vm783_vm5, %v1939_v11 }
0x11cd   : > { %2226 = vmatpush.bf16.msra.mxu0 %v4747_v63  ;;  %v4758_v63 = vld [vmem:[%s6129_s10 + $0xe0] sm:$0xff] }
0x11d1   : > { %2227 = vmatpush.bf16.msra.mxu0 %v4746_v1 }
0x11dc   : > { %4295 = vmatmul.msk.bf16.vlgmr.msrb.gmra.mxu0 %vm634_vm0, %v5449_v42 }
0x1249   : > { %v1955_v12 = vpop.f32.mrf.mxu0 }
0x124a   : > { %v1959_v13 = vpack.c.bf16 %v1955_v12, %v1955_v12 }
0x124c   : > { %4253 = vmatmul.msk.bf16.vlgmr.msra.gmra.mxu1 %vm783_vm5, %v1959_v13  ;;  %v4873_v13 = vld [vmem:[%s6123_s4 + $0x2] ss:$0 sm:$0xff] }
0x124d   : > { %2262 = vmatpush.bf16.msra.mxu1 %v4749_v52  ;;  %v4756_v52 = vld [vmem:[%s6129_s10 + $0x150] sm:$0xff] }
0x1251   : > { %v1957_v14 = vpop.f32.mrf.mxu0  ;;  %2263 = vmatpush.bf16.msra.mxu1 %v4748_v59  ;;  %v4879_v59 = vld [vmem:[%s6130_s11 + $0x11] ss:$0 sm:$0xff] }
0x1259   : > { %v2085_v28 = vpop.f32.mrf.mxu0 }
0x125a   : > { %v2086_v29 = vadd.f32 %v4872_v27, %v2085_v28 }
0x125c   : > { %4296 = vmatmul.msk.bf16.vlgmr.msrb.gmra.mxu1 %vm783_vm5, %v2017_v17  ;;  %v2089_v30 = vpack.c.bf16 %v2086_v29, %v2086_v29 }
0x125e   : > { %v2125_v31 = vsel %vm818_vm6, %v2089_v30, 0 }
0x125f   : > { %2134 = vmatpush.bf16.msrb.mxu2 %v2125_v31 }
0x1261   : > { %v2087_v32 = vpop.f32.mrf.mxu0 }
0x1262   : > { %v4877_v32 = vld [vmem:[%s6130_s11 + $0xc] ss:$0 sm:$0xff] }
0x1263   : > { %2298 = vmatpush.bf16.msra.mxu2 %v4751_v58  ;;  %v4344_v58 = vld [vmem:[%s6131_s12 + $0x10] sm:$0xf] }
0x1267   : > { %2299 = vmatpush.bf16.msra.mxu2 %v4750_v60 }
0x126c   : > { %4327 = vmatmul.msk.bf16.vlgmr.msra.gmra.mxu1 %vm634_vm0, %v5449_v42 }
0x12c9   : > { %v1977_v20 = vpop.f32.mrf.mxu1 }
0x12ca   : > { %v1981_v21 = vadd.f32 %v1977_v20, %v1800_v48  ;;  %v4875_v20 = vld [vmem:[%s6130_s11 + $0x10] ss:$0 sm:$0xff] }
0x12d1   : > { %v1979_v22 = vpop.f32.mrf.mxu1 }
0x12d9   : > { %v2105_v23 = vpop.f32.mrf.mxu1 }
0x12da   : > { %v2106_v24 = vadd.f32 %v5497_v19, %v2105_v23 }
0x12dc   : > { %v2109_v25 = vsel %vm783_vm5, %v2106_v24, -inf }
0x12dd   : > { %2110 = vmax.xlane.f32.xlu0 %v2109_v25 }
0x12e1   : > { %v2107_v26 = vpop.f32.mrf.mxu1 }
0x1350   : > { %v2111_v62 = vpop.xlane.xlu0 %2110 }
0x1351   : > { %v2112_v33 = vsub.f32 %v2106_v24, %v2111_v62  ;;  %v4876_v24 = vld [vmem:[%s6130_s11 + $0x14] ss:$0 sm:$0xff] }
0x1353   : > { %v2113_v34 = vmul.f32 1.442695, %v2112_v33 }
0x1355   : > { %4943 = vpow2.f32 %v2113_v34 }
0x135b   : > { %v4944_v35 = vpop.eup %4943 }
0x135c   : > { %v2115_v38 = vsel %vm783_vm5, %v4944_v35, 0.0 }
0x135d   : > { %2116 = vadd.xlane.f32.xlu1 %v2115_v38 }
0x13d0   : > { %v2117_v40 = vpop.xlane.xlu1 %2116 }
0x13d1   : > { %4945 = vrcp.f32 %v2117_v40 }
0x13d7   : > { %v4946_v41 = vpop.eup %4945 }
0x13d8   : > { %v2119_v43 = vmul.f32 %v4946_v41, %v4944_v35 }
0x13da   : > { %v2120_v44 = vpack.c.bf16 %v2119_v43, %v2119_v43 }
0x13dc   : > { %4297 = vmatmul.msk.bf16.vlgmr.msrb.gmra.mxu2 %vm783_vm5, %v2120_v44  ;;  %v4755_v44 = vld [vmem:[%s6129_s10 + $0x118] sm:$0xff] }
0x13dd   : > { %2407 = vmatpush.bf16.msrb.mxu2 %v4753_v0  ;;  %v2363_v0 = vsel %vm818_vm6, %v4344_v58, 0 }
0x13de   : > { %2372 = vmatpush.bf16.msrb.mxu1 %v2363_v0 }
0x13e1   : > { %2408 = vmatpush.bf16.msrb.mxu2 %v4752_v2 }
0x13ec   : > { %4341 = vmatmul.msk.bf16.vlgmr.msra.gmra.mxu2 %vm634_vm0, %v5449_v42 }
0x145f   : > { %v2136_v45 = vpop.f32.mrf.mxu2 }
0x1460   : > { %v2140_v46 = vpack.c.bf16 %v2136_v45, %v2136_v45  ;;  %v4754_v45 = vld [vmem:[%s6129_s10 + $0x110] sm:$0xff] }
0x1462   : > { %4299 = vmatmul.msk.bf16.vlgmr.msrb.gmra.mxu3 %vm783_vm5, %v2140_v46 }
0x1467   : > { %v2138_v47 = vpop.f32.mrf.mxu2 }
0x146f   : > { %v2301_v26 = vpop.f32.mrf.mxu2 }
0x1470   : > { %v2302_v27 = vadd.f32 %v4876_v24, %v2301_v26 }
0x1472   : > { %v2305_v29 = vpack.c.bf16 %v2302_v27, %v2302_v27  ;;  %v4761_v27 = vld [vmem:[%s6129_s10 + $0x128] sm:$0xff] }
0x1474   : > { %v2341_v30 = vsel %vm818_vm6, %v2305_v29, 0 }
0x1475   : > { %2350 = vmatpush.bf16.msrb.mxu0 %v2341_v30 }
0x1477   : > { %v2303_v31 = vpop.f32.mrf.mxu2 }
0x14e5   : > { %v2158_v48 = vpop.f32.mrf.mxu3 }
0x14e6   : > { %v2162_v49 = vadd.f32 %v2158_v48, %v1981_v21  ;;  %v2265_v21 = vpop.f32.mrf.mxu1 }
0x14e7   : > { %v2266_v22 = vadd.f32 %v4875_v20, %v2265_v21 }
0x14e8   : > { %v2165_v50 = vsel %vm634_vm0, %v2162_v49, 0.0 }
0x14e9   : > { %2166 = vadd.xlane.f32.xlu2 %v2165_v50  ;;  %v2269_v23 = vpack.c.bf16 %v2266_v22, %v2266_v22 }
0x14eb   : > { %v2310_v25 = vsel %vm783_vm5, %v2269_v23, 0 }
0x14ec   : > { %2319 = vmatpush.bf16.xpose.msra.mxu3 %v2310_v25 }
0x14ed   : > { %v2160_v51 = vpop.f32.mrf.mxu3 }
0x14ee   : > { %v2267_v28 = vpop.f32.mrf.mxu1  ;;  %v4757_v51 = vld [vmem:[%s6129_s10 + $0x158] sm:$0xff] }
0x14f4   : > { %2443 = vmatpush.bf16.msrb.mxu3 %v4755_v44 }
0x14f8   : > { %2444 = vmatpush.bf16.msrb.mxu3 %v4754_v45  ;;  %v4883_v45 = vld [vmem:[%s6130_s11 + $0x12] ss:$0 sm:$0xff] }
0x155c   : > { %v2167_v53 = vpop.xlane.xlu2 %2166 }
0x155d   : > { %v2168_v54 = vmul.f32 %v2167_v53, %v5214_v8 }
0x155f   : > { %v2169_v55 = vsub.f32 %v2162_v49, %v2168_v54 }
0x1561   : > { %v2170_v56 = vmul.f32 %v2169_v55, %v2169_v55 }
0x1563   : > { %v2171_v57 = vsel %vm634_vm0, %v2170_v56, 0.0  ;;  %v4759_v56 = vld [vmem:[%s6129_s10 + $0xe8] sm:$0xff] }
0x1564   : > { %2172 = vadd.xlane.f32.xlu0 %v2171_v57 }
0x15d7   : > { %v2173_v37 = vpop.xlane.xlu0 %2172 }
0x15d8   : > { %v2174_v4 = vmul.f32 %v2173_v37, %v5214_v8 }
0x15da   : > { %v2175_v5 = vadd.f32 1e-05, %v2174_v4 }
0x15dc   : > { %4947 = vrsqrt.f32 %v2175_v5  ;;  %vm2182_vm12 = vweird.f32 %v2175_v5 }
0x15e2   : > { %v4948_v6 = vpop.eup %4947 }
0x15e3   : > { %v2177_v7 = vmul.f32 %v4948_v6, %v2175_v5  ;;  %vm2183_vm11 = vweird.f32 %v4948_v6 }
0x15e4   : > { %vm2184_vm13 = vmor %vm2182_vm12, %vm2183_vm11 }
0x15e5   : > { %v2178_v9 = vmul.f32 %v4948_v6, %v2177_v7 }
0x15e7   : > { %v2179_v10 = vmul.f32 0.5, %v2178_v9  ;;  %v4878_v9 = vld [vmem:[%s6130_s11 + $0xd] ss:$0 sm:$0xff] }
0x15e9   : > { %v2180_v11 = vsub.f32 1.5, %v2179_v10 }
0x15eb   : > { %v2181_v12 = vmul.f32 %v4948_v6, %v2180_v11  ;;  %v4880_v11 = vld [vmem:[%s6130_s11 + $0x15] ss:$0 sm:$0xff] }
0x15ed   : > { %v2185_v14 = vsel %vm2184_vm13, %v4948_v6, %v2181_v12 }
0x15ee   : > { %v2186_v16 = vmul.f32 %v2185_v14, %v2169_v55 }
0x15f0   : > { %v2188_v17 = vmul.f32 %v4873_v13, %v2186_v16 }
0x15f2   : > { %v2190_v18 = vadd.f32 %v4874_v15, %v2188_v17 }
0x15f4   : > { %v5679_v3 = vpack.c.bf16 %v2190_v18, %v2190_v18 }
0x15f6   : > { %4313 = vmatmul.msk.bf16.vlgmr.msra.gmra.mxu0 %vm634_vm0, %v5679_v3  ;;  %4359 = vmatmul.msk.bf16.vlgmr.msrb.gmra.mxu2 %vm634_vm0, %v5679_v3 }
0x15f7   : > { %2479 = vmatpush.bf16.msra.mxu0 %v4757_v51 }
0x15fb   : > { %2480 = vmatpush.bf16.msra.mxu0 %v4756_v52 }
0x1673   : > { %v2229_v62 = vpop.f32.mrf.mxu0 }
0x1674   : > { %v2230_v33 = vadd.f32 %v4877_v32, %v2229_v62  ;;  %v4760_v62 = vld [vmem:[%s6129_s10 + $0x120] sm:$0xff] }
0x1676   : > { %v2233_v34 = vpack.c.bf16 %v2230_v33, %v2230_v33  ;;  %v4763_v33 = vld [vmem:[%s6129_s10 + $0x168] sm:$0xff] }
0x1678   : > { %4342 = vmatmul.msk.bf16.vlgmr.msra.gmra.mxu3 %vm783_vm5, %v2233_v34  ;;  %v4762_v34 = vld [vmem:[%s6129_s10 + $0x160] sm:$0xff] }
0x1679   : > { %v2410_v35 = vpop.f32.mrf.mxu2 }
0x167a   : > { %v2411_v10 = vadd.f32 %v4878_v9, %v2410_v35 }
0x167b   : > { %v2231_v38 = vpop.f32.mrf.mxu0 }
0x167c   : > { %v2414_v13 = vpack.c.bf16 %v2411_v10, %v2411_v10 }
0x1681   : > { %v2412_v36 = vpop.f32.mrf.mxu2 }
0x1688   : > { %4373 = vmatmul.msk.bf16.vlgmr.msrb.gmra.mxu3 %vm634_vm0, %v5449_v42 }
0x16fb   : > { %v2321_v39 = vpop.f32.mrf.mxu3 }
0x16fc   : > { %v2322_v40 = vadd.f32 %v5497_v19, %v2321_v39  ;;  %v4765_v39 = vld [vmem:[%s6129_s10 + $0xf8] sm:$0xff] }
0x16fe   : > { %v2325_v41 = vsel %vm783_vm5, %v2322_v40, -inf }
0x16ff   : > { %2326 = vmax.xlane.f32.xlu1 %v2325_v41  ;;  %v4390_v41 = vld [vmem:[%s6131_s12 + $0x14] sm:$0xf] }
0x1700   : > { %v2544_v44 = vsel %vm818_vm6, %v4390_v41, 0 }
0x1701   : > { %2553 = vmatpush.bf16.msra.mxu3 %v2544_v44 }
0x1703   : > { %v2323_v43 = vpop.f32.mrf.mxu3 }
0x1704   : > { %v4764_v43 = vld [vmem:[%s6129_s10 + $0xf0] sm:$0xff] }
0x170b   : > { %v2446_v60 = vpop.f32.mrf.mxu3 }
0x170c   : > { %v2447_v1 = vadd.f32 %v4879_v59, %v2446_v60 }
0x170e   : > { %v2450_v2 = vpack.c.bf16 %v2447_v1, %v2447_v1 }
0x1710   : > { %v2491_v37 = vsel %vm783_vm5, %v2450_v2, 0  ;;  %v4882_v2 = vld [vmem:[%s6132_s13 + $0x1] ss:$0 sm:$0xff] }
0x1711   : > { %2500 = vmatpush.bf16.xpose.msra.mxu1 %v2491_v37 }
0x1713   : > { %v2448_v4 = vpop.f32.mrf.mxu3 }
0x1772   : > { %v2327_v46 = vpop.xlane.xlu1 %2326 }
0x1773   : > { %v2328_v47 = vsub.f32 %v2322_v40, %v2327_v46 }
0x1775   : > { %v2329_v48 = vmul.f32 1.442695, %v2328_v47 }
0x1777   : > { %4949 = vpow2.f32 %v2329_v48 }
0x177d   : > { %v4950_v49 = vpop.eup %4949 }
0x177e   : > { %v2331_v50 = vsel %vm783_vm5, %v4950_v49, 0.0 }
0x177f   : > { %2332 = vadd.xlane.f32.xlu2 %v2331_v50 }
0x17f2   : > { %v2333_v53 = vpop.xlane.xlu2 %2332 }
0x17f3   : > { %4951 = vrcp.f32 %v2333_v53 }
0x17f9   : > { %v4952_v54 = vpop.eup %4951 }
0x17fa   : > { %v2335_v55 = vmul.f32 %v4952_v54, %v4950_v49 }
0x17fc   : > { %v2336_v57 = vpack.c.bf16 %v2335_v55, %v2335_v55  ;;  %v4884_v55 = vld [vmem:[%s6130_s11 + $0x16] ss:$0 sm:$0xff] }
0x17fe   : > { %4343 = vmatmul.msk.bf16.vlgmr.msrb.gmra.mxu0 %vm783_vm5, %v2336_v57 }
0x17ff   : > { %2588 = vmatpush.bf16.msrb.mxu0 %v4759_v56 }
0x1803   : > { %2589 = vmatpush.bf16.msrb.mxu0 %v4758_v63 }
0x180e   : > { %4387 = vmatmul.msk.bf16.vlgmr.msra.gmra.mxu0 %vm634_vm0, %v5449_v42 }
0x181e   : > { %4405 = vmatmul.msk.bf16.vlgmr.msrb.gmra.mxu0 %vm634_vm0, %v5679_v3 }
0x187b   : > { %v2352_v5 = vpop.f32.mrf.mxu0 }
0x187c   : > { %v2356_v6 = vpack.c.bf16 %v2352_v5, %v2352_v5 }
0x187e   : > { %4345 = vmatmul.msk.bf16.vlgmr.msrb.gmra.mxu1 %vm783_vm5, %v2356_v6 }
0x187f   : > { %2624 = vmatpush.bf16.msrb.mxu1 %v4761_v27 }
0x1883   : > { %v2354_v7 = vpop.f32.mrf.mxu0  ;;  %2625 = vmatpush.bf16.msrb.mxu1 %v4760_v62 }
0x188b   : > { %v2482_v12 = vpop.f32.mrf.mxu0 }
0x188c   : > { %v2483_v14 = vadd.f32 %v4880_v11, %v2482_v12  ;;  %v4767_v12 = vld [vmem:[%s6129_s10 + $0x138] sm:$0xff] }
0x188e   : > { %v2486_v15 = vpack.c.bf16 %v2483_v14, %v2483_v14  ;;  %4388 = vmatmul.msk.bf16.vlgmr.msra.gmra.mxu1 %vm783_vm5, %v2414_v13  ;;  %v4766_v13 = vld [vmem:[%s6129_s10 + $0x130] sm:$0xff] }
0x1890   : > { %v2522_v16 = vsel %vm818_vm6, %v2486_v15, 0 }
0x1891   : > { %2531 = vmatpush.bf16.msra.mxu2 %v2522_v16 }
0x1893   : > { %v2484_v17 = vpop.f32.mrf.mxu0 }
0x1895   : > { %2660 = vmatpush.bf16.msrb.mxu2 %v4763_v33 }
0x1899   : > { %2661 = vmatpush.bf16.msrb.mxu2 %v4762_v34  ;;  %v4885_v34 = vld [vmem:[%s6130_s11 + $0xf] ss:$0 sm:$0xff] }
0x189b   : > { %v2591_v18 = vpop.f32.mrf.mxu0 }
0x189e   : > { %4419 = vmatmul.msk.bf16.vlgmr.msrb.gmra.mxu1 %vm634_vm0, %v5449_v42 }
0x18a3   : > { %v2593_v20 = vpop.f32.mrf.mxu0 }
0x18a4   : > { %v4436_v20 = vld [vmem:[%s6131_s12 + $0x18] sm:$0xf] }
0x18fb   : > { %v5742_v21 = vpop.f32.mrf.mxu1 }
0x18fc   : > { %v2378_v37 = vadd.f32 %v4882_v2, %v5742_v21  ;;  %v2725_v21 = vsel %vm818_vm6, %v4436_v20, 0  ;;  %v4777_v20 = vld [vmem:[%s6129_s10 + $0x198] sm:$0xff] }
0x18fd   : > { %2734 = vmatpush.bf16.msra.mxu1 %v2725_v21  ;;  %v4770_v21 = vld [vmem:[%s6129_s10 + $0x180] sm:$0xff] }
0x1903   : > { %v2376_v22 = vpop.f32.mrf.mxu1 }
0x1904   : > { %v4886_v22 = vld [vmem:[%s6130_s11 + $0x13] ss:$0 sm:$0xff] }
0x190b   : > { %v2502_v23 = vpop.f32.mrf.mxu1 }
0x190c   : > { %v2503_v24 = vadd.f32 %v5497_v19, %v2502_v23 }
0x190e   : > { %v2506_v25 = vsel %vm783_vm5, %v2503_v24, -inf }
0x190f   : > { %2507 = vmax.xlane.f32.xlu0 %v2506_v25 }
0x1913   : > { %v2504_v26 = vpop.f32.mrf.mxu1 }
0x191b   : > { %v2627_v46 = vpop.f32.mrf.mxu1 }
0x191c   : > { %v2628_v47 = vadd.f32 %v4883_v45, %v2627_v46 }
0x191e   : > { %v2631_v48 = vpack.c.bf16 %v2628_v47, %v2628_v47 }
0x1920   : > { %v2672_v49 = vsel %vm783_vm5, %v2631_v48, 0  ;;  %v4887_v48 = vld [vmem:[%s6130_s11 + $0x17] ss:$0 sm:$0xff] }
0x1921   : > { %2681 = vmatpush.bf16.xpose.msrb.mxu3 %v2672_v49 }
0x1923   : > { %v2629_v50 = vpop.f32.mrf.mxu1 }
0x1982   : > { %v2508_v28 = vpop.xlane.xlu0 %2507 }
0x1983   : > { %v2509_v29 = vsub.f32 %v2503_v24, %v2508_v28 }
0x1985   : > { %v2510_v30 = vmul.f32 1.442695, %v2509_v29 }
0x1987   : > { %4953 = vpow2.f32 %v2510_v30 }
0x198d   : > { %v4954_v31 = vpop.eup %4953 }
0x198e   : > { %v2512_v32 = vsel %vm783_vm5, %v4954_v31, 0.0 }
0x198f   : > { %2513 = vadd.xlane.f32.xlu1 %v2512_v32 }
0x1a02   : > { %v2514_v35 = vpop.xlane.xlu1 %2513 }
0x1a03   : > { %4955 = vrcp.f32 %v2514_v35 }
0x1a09   : > { %v4956_v38 = vpop.eup %4955 }
0x1a0a   : > { %v2516_v36 = vmul.f32 %v4956_v38, %v4954_v31 }
0x1a0c   : > { %v2517_v40 = vpack.c.bf16 %v2516_v36, %v2516_v36  ;;  %v4769_v36 = vld [vmem:[%s6129_s10 + $0x178] sm:$0xff] }
0x1a0e   : > { %4389 = vmatmul.msk.bf16.vlgmr.msra.gmra.mxu2 %vm783_vm5, %v2517_v40 }
0x1a0f   : > { %2769 = vmatpush.bf16.msra.mxu2 %v4765_v39  ;;  %v4768_v39 = vld [vmem:[%s6129_s10 + $0x170] sm:$0xff] }
0x1a13   : > { %2770 = vmatpush.bf16.msra.mxu2 %v4764_v43 }
0x1a1e   : > { %4433 = vmatmul.msk.bf16.vlgmr.msrb.gmra.mxu2 %vm634_vm0, %v5449_v42 }
0x1a2e   : > { %4451 = vmatmul.msk.bf16.vlgmr.msra.gmra.mxu2 %vm634_vm0, %v5679_v3  ;;  %v4881_v3 = vld [vmem:[%s6130_s11 + $0xe] ss:$0 sm:$0xff] }
0x1a2f   : > { %v2592_v54 = vadd.f32 %v4881_v3, %v2591_v18 }
0x1a31   : > { %v2595_v57 = vpack.c.bf16 %v2592_v54, %v2592_v54 }
0x1a91   : > { %v2533_v51 = vpop.f32.mrf.mxu2 }
0x1a92   : > { %v2537_v52 = vpack.c.bf16 %v2533_v51, %v2533_v51 }
0x1a94   : > { %4391 = vmatmul.msk.bf16.vlgmr.msra.gmra.mxu3 %vm783_vm5, %v2537_v52 }
0x1a95   : > { %2805 = vmatpush.bf16.msra.mxu3 %v4767_v12 }
0x1a99   : > { %v2535_v53 = vpop.f32.mrf.mxu2  ;;  %2806 = vmatpush.bf16.msra.mxu3 %v4766_v13 }
0x1aa1   : > { %v2663_v56 = vpop.f32.mrf.mxu2 }
0x1aa2   : > { %v2664_v58 = vadd.f32 %v4884_v55, %v2663_v56 }
0x1aa4   : > { %v2667_v59 = vpack.c.bf16 %v2664_v58, %v2664_v58  ;;  %4434 = vmatmul.msk.bf16.vlgmr.msrb.gmra.mxu3 %vm783_vm5, %v2595_v57  ;;  %v4482_v57 = vld [vmem:[%s6131_s12 + $0x1c] sm:$0xf] }
0x1aa5   : > { %v2906_v58 = vsel %vm818_vm6, %v4482_v57, 0 }
0x1aa6   : > { %v2703_v60 = vsel %vm818_vm6, %v2667_v59, 0  ;;  %2915 = vmatpush.bf16.msrb.mxu3 %v2906_v58  ;;  %v5896_v58 = vld [vmem:[%s5206_s20] ss:$0 sm:$0xff]  ;;  %s4695_s20 = sshll.u32 %s5170_s0, 3  ;;  %s3845_s0 = sshll.u32 %s601_s29, 4  ;;  %s3846_s0 = int_to_ptr.vmem [resolvable:$true] %s3845_s0 }
0x1aa7   : > { %2712 = vmatpush.bf16.msra.mxu0 %v2703_v60  ;;  %s3843_s19 = scalar_lea.hbm %s6137_s18, %s4695_s20 }
0x1aa8   : > { %s3847_s1 = sshll.u32 %s3843_s19, 4  ;;  %s3848_s1 = int_to_ptr.hbm [resolvable:$true] %s3847_s1 }
0x1aa9   : > { %v2665_v63 = vpop.f32.mrf.mxu2  ;;  %s5002_s25 = sshra.s32 %s3848_s1, 4  ;;  %s5003_s25 = int_to_ptr.hbm [resolvable:$true] %s5002_s25 }
0x1aaa   : > { %s5004_s20 = scalar_lea.hbm %s5003_s25, 8  ;;  %p5009_p0 = scmp.lt.s32.totalorder %s5003_s25, %s6137_s18 }
0x1aab   : > { %2841 = vmatpush.bf16.msrb.mxu0 %v4769_v36  ;;  %p5005_p11 = scmp.ne.s32.totalorder %s5003_s25, %s5004_s20  ;;  %p5010_p1 = scmp.lt.s32.totalorder %s5008_s30, %s5004_s20 }
0x1aad   : > { %p5006_p12 = pnand %p5005_p11, %p5187_p5  ;;  %p5011_p2 = por %p5010_p1, %p5009_p0 }
0x1aaf   : > { %2842 = vmatpush.bf16.msrb.mxu0 %v4768_v39  ;;  %v4890_v39 = vld [vmem:[%s6130_s11 + $0x1c] ss:$0 sm:$0xff]  ;;  %p5007_p13 = pneg %p5006_p12 }
0x1ab1   : > { %v2772_v0 = vpop.f32.mrf.mxu2  ;;  %p5012_p3 = pnand %p5011_p2, %p5007_p13 }
0x1ab2   : > { %v2773_v35 = vadd.f32 %v4885_v34, %v2772_v0 }
0x1ab4   : > { %4465 = vmatmul.msk.bf16.vlgmr.msra.gmra.mxu3 %vm634_vm0, %v5449_v42  ;;  %v2776_v38 = vpack.c.bf16 %v2773_v35, %v2773_v35 }
0x1ab9   : > { %v2774_v1 = vpop.f32.mrf.mxu2 }
0x1b17   : > { %v2555_v4 = vpop.f32.mrf.mxu3 }
0x1b18   : > { %v2559_v5 = vadd.f32 %v2555_v4, %v2378_v37 }
0x1b1f   : > { %v2557_v6 = vpop.f32.mrf.mxu3 }
0x1b27   : > { %v2683_v7 = vpop.f32.mrf.mxu3 }
0x1b28   : > { %v2684_v9 = vadd.f32 %v5497_v19, %v2683_v7 }
0x1b2a   : > { %v2687_v10 = vsel %vm783_vm5, %v2684_v9, -inf }
0x1b2b   : > { %2688 = vmax.xlane.f32.xlu2 %v2687_v10 }
0x1b2f   : > { %v2685_v11 = vpop.f32.mrf.mxu3 }
0x1b37   : > { %v2808_v23 = vpop.f32.mrf.mxu3 }
0x1b38   : > { %v2809_v24 = vadd.f32 %v4886_v22, %v2808_v23  ;;  %v4776_v22 = vld [vmem:[%s6129_s10 + $0x190] sm:$0xff] }
0x1b3a   : > { %v2812_v25 = vpack.c.bf16 %v2809_v24, %v2809_v24 }
0x1b3c   : > { %v2853_v26 = vsel %vm783_vm5, %v2812_v25, 0 }
0x1b3d   : > { %2862 = vmatpush.bf16.xpose.msrb.mxu1 %v2853_v26 }
0x1b3f   : > { %v2810_v28 = vpop.f32.mrf.mxu3 }
0x1b9e   : > { %v2689_v14 = vpop.xlane.xlu2 %2688 }
0x1b9f   : > { %v2690_v15 = vsub.f32 %v2684_v9, %v2689_v14  ;;  %v4773_v9 = vld [vmem:[%s6129_s10 + $0x1c8] sm:$0xff] }
0x1ba1   : > { %v2691_v16 = vmul.f32 1.442695, %v2690_v15  ;;  %v4775_v15 = vld [vmem:[%s6129_s10 + $0x208] sm:$0xff] }
0x1ba3   : > { %4957 = vpow2.f32 %v2691_v16  ;;  %v4772_v16 = vld [vmem:[%s6129_s10 + $0x1c0] sm:$0xff] }
0x1ba9   : > { %v4958_v17 = vpop.eup %4957 }
0x1baa   : > { %v2693_v18 = vsel %vm783_vm5, %v4958_v17, 0.0 }
0x1bab   : > { %2694 = vadd.xlane.f32.xlu0 %v2693_v18  ;;  %v4771_v18 = vld [vmem:[%s6129_s10 + $0x188] sm:$0xff] }
0x1c1e   : > { %v2695_v27 = vpop.xlane.xlu0 %2694 }
0x1c1f   : > { %4959 = vrcp.f32 %v2695_v27 }
0x1c25   : > { %v4960_v29 = vpop.eup %4959 }
0x1c26   : > { %v2697_v30 = vmul.f32 %v4960_v29, %v4958_v17  ;;  %v4774_v17 = vld [vmem:[%s6129_s10 + $0x200] sm:$0xff] }
0x1c28   : > { %v2698_v31 = vpack.c.bf16 %v2697_v30, %v2697_v30 }
0x1c2a   : > { %4435 = vmatmul.msk.bf16.vlgmr.msra.gmra.mxu0 %vm783_vm5, %v2698_v31 }
0x1c2b   : > { %2985 = vmatpush.bf16.msra.mxu0 %v4771_v18  ;;  %v4782_v18 = vld [vmem:[%s6129_s10 + $0x1a0] sm:$0xff] }
0x1c2f   : > { %2986 = vmatpush.bf16.msra.mxu0 %v4770_v21 }
0x1c3a   : > { %4479 = vmatmul.msk.bf16.vlgmr.msrb.gmra.mxu0 %vm634_vm0, %v5449_v42 }
0x1ca7   : > { %v2714_v32 = vpop.f32.mrf.mxu0 }
0x1ca8   : > { %v2718_v62 = vpack.c.bf16 %v2714_v32, %v2714_v32  ;;  %v4888_v32 = vld [vmem:[%s6123_s4 + $0x3] ss:$0 sm:$0xff] }
0x1caa   : > { %4437 = vmatmul.msk.bf16.vlgmr.msra.gmra.mxu1 %vm783_vm5, %v2718_v62 }
0x1cab   : > { %3021 = vmatpush.bf16.msra.mxu1 %v4773_v9  ;;  %v4780_v9 = vld [vmem:[%s6129_s10 + $0x210] sm:$0xff] }
0x1caf   : > { %v2716_v33 = vpop.f32.mrf.mxu0  ;;  %3022 = vmatpush.bf16.msra.mxu1 %v4772_v16  ;;  %v4894_v16 = vld [vmem:[%s6130_s11 + $0x1d] ss:$0 sm:$0xff] }
0x1cb0   : > { %v4889_v33 = vld [vmem:[%s6124_s5 + $0x3] ss:$0 sm:$0xff] }
0x1cb7   : > { %v2844_v49 = vpop.f32.mrf.mxu0 }
0x1cb8   : > { %v2845_v50 = vadd.f32 %v4887_v48, %v2844_v49 }
0x1cba   : > { %4480 = vmatmul.msk.bf16.vlgmr.msrb.gmra.mxu1 %vm783_vm5, %v2776_v38  ;;  %v2848_v51 = vpack.c.bf16 %v2845_v50, %v2845_v50 }
0x1cbc   : > { %v2884_v52 = vsel %vm818_vm6, %v2848_v51, 0 }
0x1cbd   : > { %2893 = vmatpush.bf16.msrb.mxu2 %v2884_v52  ;;  %v4892_v52 = vld [vmem:[%s6130_s11 + $0x18] ss:$0 sm:$0xff] }
0x1cbf   : > { %v2846_v53 = vpop.f32.mrf.mxu0 }
0x1cc1   : > { %3057 = vmatpush.bf16.msra.mxu2 %v4775_v15  ;;  %v4528_v15 = vld [vmem:[%s6131_s12 + $0x20] sm:$0xf] }
0x1cc5   : > { %3058 = vmatpush.bf16.msra.mxu2 %v4774_v17 }
0x1cca   : > { %4511 = vmatmul.msk.bf16.vlgmr.msra.gmra.mxu1 %vm634_vm0, %v5449_v42 }
0x1d27   : > { %v2736_v40 = vpop.f32.mrf.mxu1 }
0x1d28   : > { %v2740_v41 = vadd.f32 %v2736_v40, %v2559_v5 }
0x1d2f   : > { %v2738_v43 = vpop.f32.mrf.mxu1 }
0x1d37   : > { %v2864_v44 = vpop.f32.mrf.mxu1 }
0x1d38   : > { %v2865_v45 = vadd.f32 %v5497_v19, %v2864_v44  ;;  %v4891_v44 = vld [vmem:[%s6130_s11 + $0x20] ss:$0 sm:$0xff] }
0x1d3a   : > { %v2868_v46 = vsel %vm783_vm5, %v2865_v45, -inf }
0x1d3b   : > { %2869 = vmax.xlane.f32.xlu1 %v2868_v46 }
0x1d3f   : > { %v2866_v47 = vpop.f32.mrf.mxu1 }
0x1d47   : > { %v3024_v40 = vpop.f32.mrf.mxu1 }
0x1d4f   : > { %v3026_v48 = vpop.f32.mrf.mxu1 }
0x1dae   : > { %v2870_v3 = vpop.xlane.xlu1 %2869 }
0x1daf   : > { %v2871_v54 = vsub.f32 %v2865_v45, %v2870_v3 }
0x1db1   : > { %v2872_v55 = vmul.f32 1.442695, %v2871_v54 }
0x1db3   : > { %4961 = vpow2.f32 %v2872_v55 }
0x1db9   : > { %v4962_v19 = vpop.eup %4961 }
0x1dba   : > { %v2874_v56 = vsel %vm783_vm5, %v4962_v19, 0.0 }
0x1dbb   : > { %2875 = vadd.xlane.f32.xlu2 %v2874_v56 }
0x1e2e   : > { %v2876_v59 = vpop.xlane.xlu2 %2875 }
0x1e2f   : > { %4963 = vrcp.f32 %v2876_v59 }
0x1e35   : > { %v4964_v60 = vpop.eup %4963 }
0x1e36   : > { %v2878_v63 = vmul.f32 %v4964_v60, %v4962_v19 }
0x1e38   : > { %v2879_v0 = vpack.c.bf16 %v2878_v63, %v2878_v63 }
0x1e3a   : > { %4481 = vmatmul.msk.bf16.vlgmr.msrb.gmra.mxu2 %vm783_vm5, %v2879_v0  ;;  %v4779_v0 = vld [vmem:[%s6129_s10 + $0x1d8] sm:$0xff] }
0x1e3b   : > { %3166 = vmatpush.bf16.msrb.mxu2 %v4777_v20  ;;  %v3122_v20 = vsel %vm818_vm6, %v4528_v15, 0 }
0x1e3c   : > { %3131 = vmatpush.bf16.msrb.mxu1 %v3122_v20 }
0x1e3f   : > { %3167 = vmatpush.bf16.msrb.mxu2 %v4776_v22 }
0x1e4a   : > { %4525 = vmatmul.msk.bf16.vlgmr.msra.gmra.mxu2 %vm634_vm0, %v5449_v42 }
0x1ebd   : > { %v2895_v1 = vpop.f32.mrf.mxu2 }
0x1ebe   : > { %v2899_v2 = vpack.c.bf16 %v2895_v1, %v2895_v1  ;;  %v4778_v1 = vld [vmem:[%s6129_s10 + $0x1d0] sm:$0xff] }
0x1ec0   : > { %4483 = vmatmul.msk.bf16.vlgmr.msrb.gmra.mxu3 %vm783_vm5, %v2899_v2 }
0x1ec5   : > { %v2897_v37 = vpop.f32.mrf.mxu2 }
0x1ecd   : > { %v3060_v46 = vpop.f32.mrf.mxu2 }
0x1ece   : > { %v3061_v47 = vadd.f32 %v4891_v44, %v3060_v46 }
0x1ed0   : > { %v3064_v49 = vpack.c.bf16 %v3061_v47, %v3061_v47  ;;  %v4785_v47 = vld [vmem:[%s6129_s10 + $0x1e8] sm:$0xff] }
0x1ed2   : > { %v3100_v50 = vsel %vm818_vm6, %v3064_v49, 0 }
0x1ed3   : > { %3109 = vmatpush.bf16.msrb.mxu0 %v3100_v50 }
0x1ed5   : > { %v3062_v51 = vpop.f32.mrf.mxu2 }
0x1f43   : > { %v2917_v4 = vpop.f32.mrf.mxu3 }
0x1f44   : > { %v2921_v5 = vadd.f32 %v2917_v4, %v2740_v41  ;;  %v3025_v41 = vadd.f32 %v4890_v39, %v3024_v40 }
0x1f46   : > { %v2924_v6 = vsel %vm634_vm0, %v2921_v5, 0.0  ;;  %v3028_v43 = vpack.c.bf16 %v3025_v41, %v3025_v41 }
0x1f47   : > { %2925 = vadd.xlane.f32.xlu0 %v2924_v6 }
0x1f48   : > { %v3069_v45 = vsel %vm783_vm5, %v3028_v43, 0 }
0x1f49   : > { %3078 = vmatpush.bf16.xpose.msra.mxu3 %v3069_v45 }
0x1f4b   : > { %v2919_v7 = vpop.f32.mrf.mxu3 }
0x1f4c   : > { %v4781_v7 = vld [vmem:[%s6129_s10 + $0x218] sm:$0xff] }
0x1f51   : > { %3202 = vmatpush.bf16.msrb.mxu3 %v4779_v0 }
0x1f55   : > { %3203 = vmatpush.bf16.msrb.mxu3 %v4778_v1  ;;  %v4898_v1 = vld [vmem:[%s6130_s11 + $0x1e] ss:$0 sm:$0xff] }
0x1fba   : > { %v2926_v10 = vpop.xlane.xlu0 %2925 }
0x1fbb   : > { %v2927_v11 = vmul.f32 %v2926_v10, %v5214_v8 }
0x1fbd   : > { %v2928_v12 = vsub.f32 %v2921_v5, %v2927_v11 }
0x1fbf   : > { %v2929_v13 = vmul.f32 %v2928_v12, %v2928_v12 }
0x1fc1   : > { %v2930_v14 = vsel %vm634_vm0, %v2929_v13, 0.0  ;;  %v4783_v13 = vld [vmem:[%s6129_s10 + $0x1a8] sm:$0xff] }
0x1fc2   : > { %2931 = vadd.xlane.f32.xlu1 %v2930_v14 }
0x2035   : > { %v2932_v23 = vpop.xlane.xlu1 %2931 }
0x2036   : > { %v2933_v24 = vmul.f32 %v2932_v23, %v5214_v8 }
0x2038   : > { %v2934_v25 = vadd.f32 1e-05, %v2933_v24 }
0x203a   : > { %4965 = vrsqrt.f32 %v2934_v25  ;;  %vm2941_vm15 = vweird.f32 %v2934_v25 }
0x2040   : > { %v4966_v26 = vpop.eup %4965 }
0x2041   : > { %v2936_v27 = vmul.f32 %v4966_v26, %v2934_v25  ;;  %vm2942_vm14 = vweird.f32 %v4966_v26 }
0x2042   : > { %vm2943_vm1 = vmor %vm2941_vm15, %vm2942_vm14 }
0x2043   : > { %v2937_v28 = vmul.f32 %v4966_v26, %v2936_v27 }
0x2045   : > { %v2938_v29 = vmul.f32 0.5, %v2937_v28  ;;  %v4893_v28 = vld [vmem:[%s6130_s11 + $0x19] ss:$0 sm:$0xff] }
0x2047   : > { %v2939_v30 = vsub.f32 1.5, %v2938_v29 }
0x2049   : > { %v2940_v31 = vmul.f32 %v4966_v26, %v2939_v30  ;;  %v4895_v30 = vld [vmem:[%s6130_s11 + $0x21] ss:$0 sm:$0xff] }
0x204b   : > { %v2944_v62 = vsel %vm2943_vm1, %v4966_v26, %v2940_v31 }
0x204c   : > { %v2945_v34 = vmul.f32 %v2944_v62, %v2928_v12 }
0x204e   : > { %v2947_v35 = vmul.f32 %v4888_v32, %v2945_v34 }
0x2050   : > { %v2949_v38 = vadd.f32 %v4889_v33, %v2947_v35 }
0x2052   : > { %v5877_v36 = vpack.c.bf16 %v2949_v38, %v2949_v38 }
0x2054   : > { %4497 = vmatmul.msk.bf16.vlgmr.msra.gmra.mxu0 %vm634_vm0, %v5877_v36  ;;  %4543 = vmatmul.msk.bf16.vlgmr.msrb.gmra.mxu2 %vm634_vm0, %v5877_v36 }
0x2055   : > { %3238 = vmatpush.bf16.msra.mxu0 %v4781_v7 }
0x2059   : > { %3239 = vmatpush.bf16.msra.mxu0 %v4780_v9 }
0x20d1   : > { %v2988_v53 = vpop.f32.mrf.mxu0 }
0x20d2   : > { %v2989_v3 = vadd.f32 %v4892_v52, %v2988_v53  ;;  %v4784_v53 = vld [vmem:[%s6129_s10 + $0x1e0] sm:$0xff] }
0x20d4   : > { %v2992_v54 = vpack.c.bf16 %v2989_v3, %v2989_v3  ;;  %v4787_v3 = vld [vmem:[%s6129_s10 + $0x228] sm:$0xff] }
0x20d6   : > { %4526 = vmatmul.msk.bf16.vlgmr.msra.gmra.mxu3 %vm783_vm5, %v2992_v54  ;;  %v4786_v54 = vld [vmem:[%s6129_s10 + $0x220] sm:$0xff] }
0x20d7   : > { %v3169_v55 = vpop.f32.mrf.mxu2 }
0x20d8   : > { %v3170_v29 = vadd.f32 %v4893_v28, %v3169_v55 }
0x20d9   : > { %v2990_v19 = vpop.f32.mrf.mxu0 }
0x20da   : > { %v3173_v32 = vpack.c.bf16 %v3170_v29, %v3170_v29 }
0x20df   : > { %v3171_v56 = vpop.f32.mrf.mxu2 }
0x20e6   : > { %4557 = vmatmul.msk.bf16.vlgmr.msrb.gmra.mxu3 %vm634_vm0, %v5449_v42 }
0x2159   : > { %v3080_v57 = vpop.f32.mrf.mxu3 }
0x215a   : > { %v3081_v59 = vadd.f32 %v5896_v58, %v3080_v57  ;;  %v4789_v57 = vld [vmem:[%s6129_s10 + $0x1b8] sm:$0xff] }
0x215c   : > { %v3084_v60 = vsel %vm783_vm5, %v3081_v59, -inf }
0x215d   : > { %3085 = vmax.xlane.f32.xlu2 %v3084_v60  ;;  %v4574_v60 = vld [vmem:[%s6131_s12 + $0x24] sm:$0xf] }
0x215e   : > { %v3303_v0 = vsel %vm818_vm6, %v4574_v60, 0 }
0x215f   : > { %3312 = vmatpush.bf16.msra.mxu3 %v3303_v0 }
0x2161   : > { %v3082_v63 = vpop.f32.mrf.mxu3 }
0x2162   : > { %v4788_v63 = vld [vmem:[%s6129_s10 + $0x1b0] sm:$0xff] }
0x2169   : > { %v3205_v17 = vpop.f32.mrf.mxu3 }
0x216a   : > { %v3206_v21 = vadd.f32 %v4894_v16, %v3205_v17 }
0x216c   : > { %v3209_v22 = vpack.c.bf16 %v3206_v21, %v3206_v21 }
0x216e   : > { %v3250_v23 = vsel %vm783_vm5, %v3209_v22, 0  ;;  %v4897_v22 = vld [vmem:[%s6132_s13 + $0x2] ss:$0 sm:$0xff] }
0x216f   : > { %3259 = vmatpush.bf16.xpose.msra.mxu1 %v3250_v23 }
0x2171   : > { %v3207_v24 = vpop.f32.mrf.mxu3 }
0x21d0   : > { %v3086_v2 = vpop.xlane.xlu2 %3085 }
0x21d1   : > { %v3087_v37 = vsub.f32 %v3081_v59, %v3086_v2 }
0x21d3   : > { %v3088_v4 = vmul.f32 1.442695, %v3087_v37 }
0x21d5   : > { %4967 = vpow2.f32 %v3088_v4 }
0x21db   : > { %v4968_v5 = vpop.eup %4967 }
0x21dc   : > { %v3090_v6 = vsel %vm783_vm5, %v4968_v5, 0.0 }
0x21dd   : > { %3091 = vadd.xlane.f32.xlu0 %v3090_v6 }
0x2250   : > { %v3092_v10 = vpop.xlane.xlu0 %3091 }
0x2251   : > { %4969 = vrcp.f32 %v3092_v10 }
0x2257   : > { %v4970_v11 = vpop.eup %4969 }
0x2258   : > { %v3094_v12 = vmul.f32 %v4970_v11, %v4968_v5 }
0x225a   : > { %v3095_v14 = vpack.c.bf16 %v3094_v12, %v3094_v12  ;;  %v4899_v12 = vld [vmem:[%s6130_s11 + $0x22] ss:$0 sm:$0xff] }
0x225c   : > { %4527 = vmatmul.msk.bf16.vlgmr.msrb.gmra.mxu0 %vm783_vm5, %v3095_v14 }
0x225d   : > { %3347 = vmatpush.bf16.msrb.mxu0 %v4783_v13 }
0x2261   : > { %3348 = vmatpush.bf16.msrb.mxu0 %v4782_v18 }
0x226c   : > { %4571 = vmatmul.msk.bf16.vlgmr.msra.gmra.mxu0 %vm634_vm0, %v5449_v42 }
0x227c   : > { %4589 = vmatmul.msk.bf16.vlgmr.msrb.gmra.mxu0 %vm634_vm0, %v5877_v36 }
0x22d9   : > { %v3111_v25 = vpop.f32.mrf.mxu0 }
0x22da   : > { %v3115_v26 = vpack.c.bf16 %v3111_v25, %v3111_v25 }
0x22dc   : > { %4529 = vmatmul.msk.bf16.vlgmr.msrb.gmra.mxu1 %vm783_vm5, %v3115_v26 }
0x22dd   : > { %3383 = vmatpush.bf16.msrb.mxu1 %v4785_v47 }
0x22e1   : > { %v3113_v27 = vpop.f32.mrf.mxu0  ;;  %3384 = vmatpush.bf16.msrb.mxu1 %v4784_v53 }
0x22e9   : > { %v3241_v31 = vpop.f32.mrf.mxu0 }
0x22ea   : > { %v3242_v62 = vadd.f32 %v4895_v30, %v3241_v31  ;;  %v4791_v31 = vld [vmem:[%s6129_s10 + $0x1f8] sm:$0xff] }
0x22ec   : > { %v3245_v33 = vpack.c.bf16 %v3242_v62, %v3242_v62  ;;  %4572 = vmatmul.msk.bf16.vlgmr.msra.gmra.mxu1 %vm783_vm5, %v3173_v32  ;;  %v4790_v32 = vld [vmem:[%s6129_s10 + $0x1f0] sm:$0xff] }
0x22ee   : > { %v3281_v34 = vsel %vm818_vm6, %v3245_v33, 0 }
0x22ef   : > { %3290 = vmatpush.bf16.msra.mxu2 %v3281_v34 }
0x22f1   : > { %v3243_v35 = vpop.f32.mrf.mxu0 }
0x22f3   : > { %3419 = vmatpush.bf16.msrb.mxu2 %v4787_v3 }
0x22f7   : > { %3420 = vmatpush.bf16.msrb.mxu2 %v4786_v54  ;;  %v4900_v54 = vld [vmem:[%s6130_s11 + $0x1b] ss:$0 sm:$0xff] }
0x22f9   : > { %v3350_v38 = vpop.f32.mrf.mxu0 }
0x22fc   : > { %4603 = vmatmul.msk.bf16.vlgmr.msrb.gmra.mxu1 %vm634_vm0, %v5449_v42 }
0x2301   : > { %v3352_v39 = vpop.f32.mrf.mxu0 }
0x2302   : > { %v4620_v39 = vld [vmem:[%s6131_s12 + $0x28] sm:$0xf] }
0x2359   : > { %v5943_v40 = vpop.f32.mrf.mxu1 }
0x235a   : > { %v3137_v23 = vadd.f32 %v4897_v22, %v5943_v40  ;;  %v3484_v40 = vsel %vm818_vm6, %v4620_v39, 0 }
0x235b   : > { %3493 = vmatpush.bf16.msra.mxu1 %v3484_v40  ;;  %v4797_v40 = vld [vmem:[%s6135_s16 + $0x8] sm:$0xff] }
0x2361   : > { %v3135_v41 = vpop.f32.mrf.mxu1 }
0x2362   : > { %v4901_v41 = vld [vmem:[%s6130_s11 + $0x1f] ss:$0 sm:$0xff] }
0x2369   : > { %v3261_v43 = vpop.f32.mrf.mxu1 }
0x236a   : > { %v3262_v44 = vadd.f32 %v5896_v58, %v3261_v43 }
0x236c   : > { %v3265_v45 = vsel %vm783_vm5, %v3262_v44, -inf }
0x236d   : > { %3266 = vmax.xlane.f32.xlu1 %v3265_v45 }
0x2371   : > { %v3263_v46 = vpop.f32.mrf.mxu1 }
0x2379   : > { %v3386_v2 = vpop.f32.mrf.mxu1 }
0x237a   : > { %v3387_v37 = vadd.f32 %v4898_v1, %v3386_v2 }
0x237c   : > { %v3390_v4 = vpack.c.bf16 %v3387_v37, %v3387_v37 }
0x237e   : > { %v3431_v5 = vsel %vm783_vm5, %v3390_v4, 0  ;;  %v4902_v4 = vld [vmem:[%s6130_s11 + $0x23] ss:$0 sm:$0xff] }
0x237f   : > { %3440 = vmatpush.bf16.xpose.msrb.mxu3 %v3431_v5 }
0x2381   : > { %v3388_v6 = vpop.f32.mrf.mxu1 }
0x23e0   : > { %v3267_v48 = vpop.xlane.xlu1 %3266 }
0x23e1   : > { %v3268_v49 = vsub.f32 %v3262_v44, %v3267_v48 }
0x23e3   : > { %v3269_v50 = vmul.f32 1.442695, %v3268_v49 }
0x23e5   : > { %4971 = vpow2.f32 %v3269_v50 }
0x23eb   : > { %v4972_v51 = vpop.eup %4971 }
0x23ec   : > { %v3271_v52 = vsel %vm783_vm5, %v4972_v51, 0.0 }
0x23ed   : > { %3272 = vadd.xlane.f32.xlu2 %v3271_v52 }
0x2460   : > { %v3273_v55 = vpop.xlane.xlu2 %3272 }
0x2461   : > { %4973 = vrcp.f32 %v3273_v55 }
0x2467   : > { %v4974_v19 = vpop.eup %4973 }
0x2468   : > { %v3275_v56 = vmul.f32 %v4974_v19, %v4972_v51 }
0x246a   : > { %v3276_v59 = vpack.c.bf16 %v3275_v56, %v3275_v56  ;;  %v4793_v56 = vld [vmem:[%s6129_s10 + $0x238] sm:$0xff] }
0x246c   : > { %4573 = vmatmul.msk.bf16.vlgmr.msra.gmra.mxu2 %vm783_vm5, %v3276_v59 }
0x246d   : > { %3528 = vmatpush.bf16.msra.mxu2 %v4789_v57  ;;  %v4792_v57 = vld [vmem:[%s6129_s10 + $0x230] sm:$0xff] }
0x2471   : > { %3529 = vmatpush.bf16.msra.mxu2 %v4788_v63 }
0x247c   : > { %4617 = vmatmul.msk.bf16.vlgmr.msrb.gmra.mxu2 %vm634_vm0, %v5449_v42 }
0x248c   : > { %4635 = vmatmul.msk.bf16.vlgmr.msra.gmra.mxu2 %vm634_vm0, %v5877_v36  ;;  %v4896_v36 = vld [vmem:[%s6130_s11 + $0x1a] ss:$0 sm:$0xff] }
0x248d   : > { %v3351_v11 = vadd.f32 %v4896_v36, %v3350_v38 }
0x248f   : > { %v3354_v14 = vpack.c.bf16 %v3351_v11, %v3351_v11 }
0x24ef   : > { %v3292_v7 = vpop.f32.mrf.mxu2 }
0x24f0   : > { %v3296_v9 = vpack.c.bf16 %v3292_v7, %v3292_v7 }
0x24f2   : > { %4575 = vmatmul.msk.bf16.vlgmr.msra.gmra.mxu3 %vm783_vm5, %v3296_v9 }
0x24f3   : > { %3564 = vmatpush.bf16.msra.mxu3 %v4791_v31 }
0x24f7   : > { %v3294_v10 = vpop.f32.mrf.mxu2  ;;  %3565 = vmatpush.bf16.msra.mxu3 %v4790_v32 }
0x24ff   : > { %v3422_v13 = vpop.f32.mrf.mxu2 }
0x2500   : > { %v3423_v15 = vadd.f32 %v4899_v12, %v3422_v13  ;;  %v4666_v13 = vld [vmem:[%s6131_s12 + $0x2c] sm:$0xf] }
0x2502   : > { %v3426_v16 = vpack.c.bf16 %v3423_v15, %v3423_v15  ;;  %4618 = vmatmul.msk.bf16.vlgmr.msrb.gmra.mxu3 %vm783_vm5, %v3354_v14  ;;  %v3665_v14 = vsel %vm818_vm6, %v4666_v13, 0 }
0x2503   : > { %3674 = vmatpush.bf16.msrb.mxu3 %v3665_v14 }
0x2504   : > { %v3462_v17 = vsel %vm818_vm6, %v3426_v16, 0 }
0x2505   : > { %3471 = vmatpush.bf16.msra.mxu0 %v3462_v17 }
0x2507   : > { %v3424_v18 = vpop.f32.mrf.mxu2 }
0x2509   : > { %3600 = vmatpush.bf16.msrb.mxu0 %v4793_v56 }
0x250d   : > { %3601 = vmatpush.bf16.msrb.mxu0 %v4792_v57 }
0x250f   : > { %v3531_v20 = vpop.f32.mrf.mxu2 }
0x2510   : > { %v3532_v55 = vadd.f32 %v4900_v54, %v3531_v20  ;;  %v4796_v54 = vld [vmem:[%s6135_s16] sm:$0xff] }
0x2512   : > { %4649 = vmatmul.msk.bf16.vlgmr.msra.gmra.mxu3 %vm634_vm0, %v5449_v42  ;;  %v3535_v19 = vpack.c.bf16 %v3532_v55, %v3532_v55  ;;  %v4905_v55 = vld [vmem:[%s6134_s15] ss:$0 sm:$0xff] }
0x2517   : > { %v3533_v21 = vpop.f32.mrf.mxu2 }
0x2575   : > { %v3314_v24 = vpop.f32.mrf.mxu3 }
0x2576   : > { %v3318_v25 = vadd.f32 %v3314_v24, %v3137_v23 }
0x257d   : > { %v3316_v26 = vpop.f32.mrf.mxu3 }
0x2585   : > { %v3442_v27 = vpop.f32.mrf.mxu3 }
0x2586   : > { %v3443_v28 = vadd.f32 %v5896_v58, %v3442_v27 }
0x2588   : > { %v3446_v29 = vsel %vm783_vm5, %v3443_v28, -inf }
0x2589   : > { %3447 = vmax.xlane.f32.xlu0 %v3446_v29 }
0x258d   : > { %v3444_v30 = vpop.f32.mrf.mxu3 }
0x2595   : > { %v3567_v43 = vpop.f32.mrf.mxu3 }
0x2596   : > { %v3568_v44 = vadd.f32 %v4901_v41, %v3567_v43 }
0x2598   : > { %v3571_v45 = vpack.c.bf16 %v3568_v44, %v3568_v44 }
0x259a   : > { %v3612_v46 = vsel %vm783_vm5, %v3571_v45, 0 }
0x259b   : > { %3621 = vmatpush.bf16.xpose.msrb.mxu1 %v3612_v46 }
0x259d   : > { %v3569_v48 = vpop.f32.mrf.mxu3 }
0x259e   : > { %v4903_v48 = vld [vmem:[%s6123_s4 + $0x4] ss:$0 sm:$0xff] }
0x25fc   : > { %v3448_v62 = vpop.xlane.xlu0 %3447 }
0x25fd   : > { %v3449_v33 = vsub.f32 %v3443_v28, %v3448_v62  ;;  %v4795_v62 = vld [vmem:[%s6133_s14 + $0x8] sm:$0xff] }
0x25ff   : > { %v3450_v34 = vmul.f32 1.442695, %v3449_v33  ;;  %v4799_v33 = vld [vmem:[%s6135_s16 + $0x18] sm:$0xff] }
0x2601   : > { %4975 = vpow2.f32 %v3450_v34 }
0x2607   : > { %v4976_v35 = vpop.eup %4975 }
0x2608   : > { %v3452_v38 = vsel %vm783_vm5, %v4976_v35, 0.0 }
0x2609   : > { %3453 = vadd.xlane.f32.xlu1 %v3452_v38  ;;  %v4798_v38 = vld [vmem:[%s6135_s16 + $0x10] sm:$0xff] }
0x267c   : > { %v3454_v47 = vpop.xlane.xlu1 %3453 }
0x267d   : > { %4977 = vrcp.f32 %v3454_v47 }
0x2683   : > { %v4978_v49 = vpop.eup %4977 }
0x2684   : > { %v3456_v50 = vmul.f32 %v4978_v49, %v4976_v35 }
0x2686   : > { %v3457_v51 = vpack.c.bf16 %v3456_v50, %v3456_v50  ;;  %v4904_v50 = vld [vmem:[%s6124_s5 + $0x4] ss:$0 sm:$0xff] }
0x2688   : > { %4619 = vmatmul.msk.bf16.vlgmr.msra.gmra.mxu0 %vm783_vm5, %v3457_v51 }
0x2689   : > { %3740 = vmatpush.bf16.msra.mxu0 %v4795_v62 }
0x2698   : > { %4663 = vmatmul.msk.bf16.vlgmr.msrb.gmra.mxu0 %vm634_vm0, %v5449_v42 }
0x2705   : > { %v3473_v52 = vpop.f32.mrf.mxu0 }
0x2706   : > { %v3477_v53 = vpack.c.bf16 %v3473_v52, %v3473_v52 }
0x2708   : > { %4621 = vmatmul.msk.bf16.vlgmr.msra.gmra.mxu1 %vm783_vm5, %v3477_v53 }
0x2709   : > { %3793 = vmatpush.bf16.msra.mxu1 %v4799_v33 }
0x270d   : > { %v3475_v3 = vpop.f32.mrf.mxu0  ;;  %3794 = vmatpush.bf16.msra.mxu1 %v4798_v38 }
0x2711   : > { %3795 = vmatpush.bf16.msra.mxu1 %v4797_v40 }
0x2715   : > { %v3603_v5 = vpop.f32.mrf.mxu0  ;;  %3796 = vmatpush.bf16.msra.mxu1 %v4796_v54 }
0x2716   : > { %v3604_v6 = vadd.f32 %v4902_v4, %v3603_v5 }
0x2718   : > { %4664 = vmatmul.msk.bf16.vlgmr.msrb.gmra.mxu1 %vm783_vm5, %v3535_v19  ;;  %v3607_v7 = vpack.c.bf16 %v3604_v6, %v3604_v6 }
0x271a   : > { %v3643_v9 = vsel %vm818_vm6, %v3607_v7, 0 }
0x271b   : > { %3652 = vmatpush.bf16.msrb.mxu2 %v3643_v9 }
0x271d   : > { %v3605_v10 = vpop.f32.mrf.mxu0 }
0x2785   : > { %v3495_v59 = vpop.f32.mrf.mxu1 }
0x2786   : > { %v3499_v60 = vadd.f32 %v3495_v59, %v3318_v25 }
0x278d   : > { %v3497_v63 = vpop.f32.mrf.mxu1 }
0x278e   : > { %v4906_v63 = vld [vmem:[%s6136_s17] ss:$0 sm:$0xff] }
0x2795   : > { %v3623_v0 = vpop.f32.mrf.mxu1 }
0x2796   : > { %v3624_v1 = vadd.f32 %v5896_v58, %v3623_v0 }
0x2798   : > { %v3627_v2 = vsel %vm783_vm5, %v3624_v1, -inf }
0x2799   : > { %3628 = vmax.xlane.f32.xlu2 %v3627_v2 }
0x279d   : > { %v3625_v37 = vpop.f32.mrf.mxu1 }
0x280c   : > { %v3629_v42 = vpop.xlane.xlu2 %3628 }
0x280d   : > { %v3630_v36 = vsub.f32 %v3624_v1, %v3629_v42 }
0x280f   : > { %v3631_v11 = vmul.f32 1.442695, %v3630_v36 }
0x2811   : > { %4979 = vpow2.f32 %v3631_v11 }
0x2817   : > { %v4980_v58 = vpop.eup %4979 }
0x2818   : > { %v3633_v12 = vsel %vm783_vm5, %v4980_v58, 0.0 }
0x2819   : > { %3634 = vadd.xlane.f32.xlu0 %v3633_v12 }
0x288c   : > { %v3635_v15 = vpop.xlane.xlu0 %3634 }
0x288d   : > { %4981 = vrcp.f32 %v3635_v15 }
0x2893   : > { %v4982_v16 = vpop.eup %4981 }
0x2894   : > { %v3637_v17 = vmul.f32 %v4982_v16, %v4980_v58 }
0x2896   : > { %v3638_v18 = vpack.c.bf16 %v3637_v17, %v3637_v17  ;;  %v4907_v17 = vld [vmem:[%s6123_s4 + $0x5] ss:$0 sm:$0xff] }
0x2898   : > { %4665 = vmatmul.msk.bf16.vlgmr.msrb.gmra.mxu2 %vm783_vm5, %v3638_v18 }
0x291b   : > { %v3654_v20 = vpop.f32.mrf.mxu2 }
0x291c   : > { %v3658_v21 = vpack.c.bf16 %v3654_v20, %v3654_v20  ;;  %v4908_v20 = vld [vmem:[%s6124_s5 + $0x5] ss:$0 sm:$0xff] }
0x291e   : > { %4667 = vmatmul.msk.bf16.vlgmr.msrb.gmra.mxu3 %vm783_vm5, %v3658_v21  ;;  %vm3785_vm5 = vcmask 523264  }
0x2923   : > { %v3656_v22 = vpop.f32.mrf.mxu2 }
0x29a1   : > { %v3676_v23 = vpop.f32.mrf.mxu3 }
0x29a2   : > { %v3680_v24 = vadd.f32 %v3676_v23, %v3499_v60 }
0x29a4   : > { %v3681_v25 = vadd.f32 %v3680_v24, %v5474_v61  ;;  %v4794_v61 = vld [vmem:[%s6133_s14] sm:$0xff] }
0x29a5   : > { %3741 = vmatpush.bf16.msra.mxu0 %v4794_v61 }
0x29a6   : > { %v3684_v26 = vsel %vm634_vm0, %v3681_v25, 0.0 }
0x29a7   : > { %3685 = vadd.xlane.f32.xlu1 %v3684_v26 }
0x29a9   : > { %v3678_v27 = vpop.f32.mrf.mxu3 }
0x2a1a   : > { %v3686_v28 = vpop.xlane.xlu1 %3685 }
0x2a1b   : > { %v3687_v29 = vmul.f32 %v3686_v28, %v5214_v8 }
0x2a1d   : > { %v3688_v30 = vsub.f32 %v3681_v25, %v3687_v29 }
0x2a1f   : > { %v3689_v31 = vmul.f32 %v3688_v30, %v3688_v30 }
0x2a21   : > { %v3690_v32 = vsel %vm634_vm0, %v3689_v31, 0.0 }
0x2a22   : > { %3691 = vadd.xlane.f32.xlu2 %v3690_v32 }
0x2a95   : > { %v3692_v34 = vpop.xlane.xlu2 %3691 }
0x2a96   : > { %v3693_v35 = vmul.f32 %v3692_v34, %v5214_v8 }
0x2a98   : > { %v3694_v39 = vadd.f32 1e-05, %v3693_v35 }
0x2a9a   : > { %4983 = vrsqrt.f32 %v3694_v39  ;;  %vm3701_vm3 = vweird.f32 %v3694_v39 }
0x2aa0   : > { %v4984_v41 = vpop.eup %4983 }
0x2aa1   : > { %v3696_v43 = vmul.f32 %v4984_v41, %v3694_v39  ;;  %vm3702_vm2 = vweird.f32 %v4984_v41 }
0x2aa2   : > { %vm3703_vm4 = vmor %vm3701_vm3, %vm3702_vm2 }
0x2aa3   : > { %v3697_v44 = vmul.f32 %v4984_v41, %v3696_v43 }
0x2aa5   : > { %v3698_v45 = vmul.f32 0.5, %v3697_v44 }
0x2aa7   : > { %v3699_v46 = vsub.f32 1.5, %v3698_v45 }
0x2aa9   : > { %v3700_v47 = vmul.f32 %v4984_v41, %v3699_v46 }
0x2aab   : > { %v3704_v49 = vsel %vm3703_vm4, %v4984_v41, %v3700_v47 }
0x2aac   : > { %v3705_v51 = vmul.f32 %v3704_v49, %v3688_v30 }
0x2aae   : > { %v3707_v52 = vmul.f32 %v4903_v48, %v3705_v51 }
0x2ab0   : > { %v3709_v53 = vadd.f32 %v4904_v50, %v3707_v52 }
0x2ab2   : > { %v3710_v3 = vpack.c.bf16 %v3709_v53, %v3709_v53 }
0x2ab4   : > { %4676 = vmatmul.msk.bf16.vlgmr.msra.gmra.mxu0 %vm634_vm0, %v3710_v3 }
0x2b31   : > { %v3743_v19 = vpop.f32.mrf.mxu0 }
0x2b32   : > { %v3744_v56 = vadd.f32 %v4905_v55, %v3743_v19 }
0x2b34   : > { %v3747_v57 = vmax.f32 %v3744_v56, 0.0 }
0x2b36   : > { %v3748_v59 = vpack.c.bf16 %v3747_v57, %v3747_v57 }
0x2b38   : > { %4693 = vmatmul.msk.bf16.vlgmr.msra.gmra.mxu1 %vm3785_vm5, %v3748_v59 }
0x2b39   : > { %v3745_v60 = vpop.f32.mrf.mxu0 }
0x2bb5   : > { %v3798_v0 = vpop.f32.mrf.mxu1 }
0x2bb6   : > { %v3799_v1 = vadd.f32 %v4906_v63, %v3798_v0 }
0x2bb8   : > { %v3802_v2 = vadd.f32 %v3799_v1, %v3709_v53 }
0x2bba   : > { %v3805_v37 = vsel %vm634_vm0, %v3802_v2, 0.0 }
0x2bbb   : > { %3806 = vadd.xlane.f32.xlu0 %v3805_v37 }
0x2bbd   : > { %v3800_v4 = vpop.f32.mrf.mxu1 }
0x2c2e   : > { %v3807_v5 = vpop.xlane.xlu0 %3806 }
0x2c2f   : > { %v3808_v6 = vmul.f32 %v3807_v5, %v5214_v8 }
0x2c31   : > { %v3809_v7 = vsub.f32 %v3802_v2, %v3808_v6 }
0x2c33   : > { %v3810_v9 = vmul.f32 %v3809_v7, %v3809_v7 }
0x2c35   : > { %v3811_v10 = vsel %vm634_vm0, %v3810_v9, 0.0 }
0x2c36   : > { %3812 = vadd.xlane.f32.xlu1 %v3811_v10 }
0x2ca9   : > { %v3813_v42 = vpop.xlane.xlu1 %3812 }
0x2caa   : > { %v3814_v36 = vmul.f32 %v3813_v42, %v5214_v8 }
0x2cac   : > { %v3815_v11 = vadd.f32 1e-05, %v3814_v36 }
0x2cae   : > { %4985 = vrsqrt.f32 %v3815_v11  ;;  %vm3822_vm7 = vweird.f32 %v3815_v11 }
0x2cb4   : > { %v4986_v58 = vpop.eup %4985 }
0x2cb5   : > { %v3817_v12 = vmul.f32 %v4986_v58, %v3815_v11  ;;  %vm3823_vm6 = vweird.f32 %v4986_v58 }
0x2cb6   : > { %vm3824_vm8 = vmor %vm3822_vm7, %vm3823_vm6 }
0x2cb7   : > { %v3818_v13 = vmul.f32 %v4986_v58, %v3817_v12 }
0x2cb9   : > { %v3819_v14 = vmul.f32 0.5, %v3818_v13 }
0x2cbb   : > { %v3820_v15 = vsub.f32 1.5, %v3819_v14 }
0x2cbd   : > { %v3821_v16 = vmul.f32 %v4986_v58, %v3820_v15 }
0x2cbf   : > { %v3825_v8 = vsel %vm3824_vm8, %v4986_v58, %v3821_v16 }
0x2cc0   : > { %v3826_v18 = vmul.f32 %v3825_v8, %v3809_v7 }
0x2cc2   : > { %v3828_v21 = vmul.f32 %v4907_v17, %v3826_v18 }
0x2cc4   : > { %v3830_v22 = vadd.f32 %v4908_v20, %v3828_v21 }
0x2cc6   : > { %3831 = vst.msk [vmem:[%s601_s29] sm:$0xff] %vm634_vm0, %v3830_v22 }
0x2cc7   : > { %5015 = shalt.err (!%p5012_p3)
}
0x2cc8   : > { %4800 = dma.vmem_to_hbm [thread:$0]  (%p5187_p5), %s3846_s0, 128, %s3848_s1, %s3833_s3  }
0x2cc9 PF: > { %s6165_s24 = sld [smem:[#allocation7_spill]] }
0x2cca   : > { %s6166_s21 = sld [smem:[#allocation5_spill]] }
0x2ccf   : > { %p4806_p4 = scmp.ge.s32.totalorder %s6165_s24, 2 }
0x2cd0   : > { %s3859_s29 = sand.u32 1, %s6166_s21  }
0x2cd1   : > { %p4803_p7 = pnand %p4806_p4, %p5191_p6  ;;  %s3860_s27 = scalar_lea.sflag [#allocation3], %s3859_s29 }
0x2cd3   : > { %p4804_p8 = pneg %p4803_p7 }
0x2cd5   : > { %5033 = dma.done.wait (%p4804_p8), %s3860_s27, 128  }
0x2cd6   : > { %5035 = vsyncadd (%p4804_p8), %s3860_s27, 4294967168  ;;  %s6168_s30 = sld [smem:[#allocation8_spill]]  ;;  %s6171_s27 = smov %s5042_s28 }
0x2cd7   : > { %s6169_s25 = sld [smem:[#allocation6_spill]] }
0x2cd8   : > { %s6170_s29 = sld [smem:[#allocation9_spill]] }
0x2cdc   : > { %p28_p9 = scmp.ge.s32.totalorder %s6168_s30, 4  }
0x2cdd   : > { %s6172_s28 = smov %s6169_s25 }
0x2cde   :  { %30 = sbr.rel (!%p28_p9) target bundleno = 9 (0x9), region = 242 }
0x2ce3   :  { %3866 = vsyncpa [#allocation3], 1 }
0x2ce4   :  { %3868 = vsyncpa [#allocation3 + $0x1], 1 }

</bundles_post_ra>
